<compile_context>
chip_gen: v5e
topology: v5e:2x2
jax: 0.10.0
libtpu: 0.0.40
codegen_flags: <defaults>
</compile_context>

<pallas_src>
import functools

import jax
import jax.numpy as jnp
from jax import lax
from jax.experimental import pallas as pl
from jax.experimental.pallas import tpu as pltpu

EPS = 1e-5


def _default_block_c(C):
    """Pick the channel tile per TPU generation (v7x has 2 TensorCores/chip)."""
    try:
        kind = jax.devices()[0].device_kind.lower()
    except Exception:  # pragma: no cover - defensive
        kind = ""
    target = 128 if ("v7" in kind or "7x" in kind) else 256
    bc = min(target, C)
    while bc > 8 and C % bc != 0:
        bc //= 2
    return bc


@functools.partial(jax.jit, static_argnames=("block_c",))
def _bn_add_relu_impl(x, residual, gamma, beta, block_c):
    N, C, H, W = x.shape
    S = N * H * W
    assert C % block_c == 0, "channel count must be divisible by channel tile"

    def kernel(x_ref, r_ref, g_ref, b_ref, o_ref):
        # x_ref / r_ref / o_ref: (block_c, S) tiles; g_ref / b_ref: (block_c, 1).
        xv = x_ref[...].astype(jnp.float32)

        # Training-mode (batch-stat) BatchNorm: biased mean/var over N*H*W per
        # channel, computed in a single sweep (sum and sum-of-squares).
        inv_s = jnp.float32(1.0 / S)
        s1 = jnp.sum(xv, axis=1, keepdims=True)
        s2 = jnp.sum(xv * xv, axis=1, keepdims=True)
        mean = s1 * inv_s
        var = jnp.maximum(s2 * inv_s - mean * mean, 0.0)  # clamp: cancellation guard
        inv = lax.rsqrt(var + EPS)

        scale = g_ref[...] * inv              # (block_c, 1)
        shift = b_ref[...] - mean * scale     # (block_c, 1)

        # Residual read at its point of use keeps the stats sweep x-only.
        y = xv * scale + shift + r_ref[...].astype(jnp.float32)
        o_ref[...] = jnp.maximum(y, 0.0).astype(o_ref.dtype)

    # For N == 1 this transpose is a pure relabeling (no data movement).
    x2 = jnp.transpose(x, (1, 0, 2, 3)).reshape(C, S)
    r2 = jnp.transpose(residual, (1, 0, 2, 3)).reshape(C, S)
    g2 = gamma.reshape(C, 1).astype(jnp.float32)
    b2 = beta.reshape(C, 1).astype(jnp.float32)

    out = pl.pallas_call(
        kernel,
        out_shape=jax.ShapeDtypeStruct((C, S), x.dtype),
        grid_spec=pltpu.PrefetchScalarGridSpec(
            num_scalar_prefetch=0,
            grid=(C // block_c,),
            in_specs=[
                pl.BlockSpec((block_c, S), lambda i: (i, 0)),
                pl.BlockSpec((block_c, S), lambda i: (i, 0)),
                pl.BlockSpec((block_c, 1), lambda i: (i, 0)),
                pl.BlockSpec((block_c, 1), lambda i: (i, 0)),
            ],
            out_specs=pl.BlockSpec((block_c, S), lambda i: (i, 0)),
        ),
        compiler_params=pltpu.CompilerParams(
            dimension_semantics=("parallel",)),
        # x is dead after normalization; reuse its HBM buffer for the output.
        input_output_aliases={0: 0},
    )(x2, r2, g2, b2)

    return out.reshape(C, N, H, W).transpose(1, 0, 2, 3)


def bn_add_relu(x, residual, gamma, beta, block_c=None):
    """x, residual: (N, C, H, W); gamma, beta: (C,). Returns (N, C, H, W)."""
    C = x.shape[1]
    if block_c is None:
        block_c = _default_block_c(C)
    return _bn_add_relu_impl(x, residual, gamma, beta, block_c)


def reference(x, residual, gamma, beta):
    mean = jnp.mean(x, axis=(0, 2, 3), keepdims=True)
    var = jnp.mean(jnp.square(x - mean), axis=(0, 2, 3), keepdims=True)
    y = (x - mean) * lax.rsqrt(var + EPS)
    y = y * gamma[None, :, None, None] + beta[None, :, None, None]
    return jnp.maximum(y + residual, 0.0)


if __name__ == "__main__":
    key = jax.random.PRNGKey(0)
    k1, k2, k3, k4 = jax.random.split(key, 4)

    N, C, H, W = 1, 512, 28, 28  # shapes implied by the module's forward
    x115 = jax.random.normal(k1, (N, C, H, W), dtype=jnp.float32)
    x108 = jax.random.normal(k2, (N, C, H, W), dtype=jnp.float32)

    # BatchNorm2d(512) affine params (PyTorch default weight=1, bias=0;
    # perturbed slightly so the affine path is exercised).
    gamma = 1.0 + 0.05 * jax.random.normal(k3, (C,), dtype=jnp.float32)
    beta = 0.05 * jax.random.normal(k4, (C,), dtype=jnp.float32)

    out = bn_add_relu(x115, x108, gamma, beta)
    out = jax.block_until_ready(out)

    ref = reference(x115, x108, gamma, beta)
    assert out.shape == (N, C, H, W)
    assert jnp.allclose(out, ref, atol=1e-4, rtol=1e-4)

    print("KERNEL_OK")
</pallas_src>

<mosaic_0001>
module attributes {stable_mosaic.version = 11 : i64} {
  func.func @kernel(%arg0: i32, %arg1: memref<256x784xf32, #tpu.memory_space<vmem>>, %arg2: memref<256x784xf32, #tpu.memory_space<vmem>>, %arg3: memref<256x1xf32, #tpu.memory_space<vmem>>, %arg4: memref<256x1xf32, #tpu.memory_space<vmem>>, %arg5: memref<256x784xf32, #tpu.memory_space<vmem>>) attributes {dimension_semantics = [#tpu.dimension_semantics<parallel>], iteration_bounds = array<i64: 2>, scalar_prefetch = 0 : i64, scratch_operands = 0 : i64, tpu.core_type = #tpu.core_type<tc>, window_params = [{transform_indices = @transform_0, window_bounds = array<i64: 256, 784>}, {transform_indices = @transform_1, window_bounds = array<i64: 256, 784>}, {transform_indices = @transform_2, window_bounds = array<i64: 256, 1>}, {transform_indices = @transform_3, window_bounds = array<i64: 256, 1>}, {transform_indices = @transform_4, window_bounds = array<i64: 256, 784>}]} {
    %c0 = arith.constant 0 : index
    %c0_0 = arith.constant 0 : index
    %0 = vector.load %arg1[%c0, %c0_0] : memref<256x784xf32, #tpu.memory_space<vmem>>, vector<256x784xf32>
    %cst = arith.constant dense<0.000000e+00> : vector<256xf32>
    %1 = vector.multi_reduction <add>, %0, %cst [1] : vector<256x784xf32> to vector<256xf32>
    %2 = vector.shape_cast %1 : vector<256xf32> to vector<256x1xf32>
    %3 = arith.mulf %0, %0 : vector<256x784xf32>
    %cst_1 = arith.constant dense<0.000000e+00> : vector<256xf32>
    %4 = vector.multi_reduction <add>, %3, %cst_1 [1] : vector<256x784xf32> to vector<256xf32>
    %5 = vector.shape_cast %4 : vector<256xf32> to vector<256x1xf32>
    %cst_2 = arith.constant 0.00127551018 : f32
    %6 = vector.broadcast %cst_2 : f32 to vector<256x1xf32>
    %7 = arith.mulf %2, %6 : vector<256x1xf32>
    %cst_3 = arith.constant 0.00127551018 : f32
    %8 = vector.broadcast %cst_3 : f32 to vector<256x1xf32>
    %9 = arith.mulf %5, %8 : vector<256x1xf32>
    %10 = arith.mulf %7, %7 : vector<256x1xf32>
    %11 = arith.subf %9, %10 : vector<256x1xf32>
    %cst_4 = arith.constant 0.000000e+00 : f32
    %12 = vector.broadcast %cst_4 : f32 to vector<256x1xf32>
    %13 = arith.maximumf %11, %12 : vector<256x1xf32>
    %cst_5 = arith.constant 9.99999974E-6 : f32
    %14 = vector.broadcast %cst_5 : f32 to vector<256x1xf32>
    %15 = arith.addf %13, %14 : vector<256x1xf32>
    %16 = math.rsqrt %15 : vector<256x1xf32>
    %c0_6 = arith.constant 0 : index
    %c0_7 = arith.constant 0 : index
    %17 = vector.load %arg3[%c0_6, %c0_7] : memref<256x1xf32, #tpu.memory_space<vmem>>, vector<256x1xf32>
    %18 = arith.mulf %17, %16 : vector<256x1xf32>
    %c0_8 = arith.constant 0 : index
    %c0_9 = arith.constant 0 : index
    %19 = vector.load %arg4[%c0_8, %c0_9] : memref<256x1xf32, #tpu.memory_space<vmem>>, vector<256x1xf32>
    %20 = arith.mulf %7, %18 : vector<256x1xf32>
    %21 = arith.subf %19, %20 : vector<256x1xf32>
    %22 = vector.broadcast %18 : vector<256x1xf32> to vector<256x784xf32>
    %23 = arith.mulf %0, %22 : vector<256x784xf32>
    %24 = vector.broadcast %21 : vector<256x1xf32> to vector<256x784xf32>
    %25 = arith.addf %23, %24 : vector<256x784xf32>
    %c0_10 = arith.constant 0 : index
    %c0_11 = arith.constant 0 : index
    %26 = vector.load %arg2[%c0_10, %c0_11] : memref<256x784xf32, #tpu.memory_space<vmem>>, vector<256x784xf32>
    %27 = arith.addf %25, %26 : vector<256x784xf32>
    %cst_12 = arith.constant 0.000000e+00 : f32
    %28 = vector.broadcast %cst_12 : f32 to vector<256x784xf32>
    %29 = arith.maximumf %27, %28 : vector<256x784xf32>
    %c0_13 = arith.constant 0 : index
    %c0_14 = arith.constant 0 : index
    %30 = vector.load %arg5[%c0_13, %c0_14] : memref<256x784xf32, #tpu.memory_space<vmem>>, vector<256x784xf32>
    tpu.vector_store %arg5[%c0_13, %c0_14], %29 {strides = array<i32>} : memref<256x784xf32, #tpu.memory_space<vmem>>, vector<256x784xf32>,
    return
  }
  func.func @transform_0(%arg0: i32) -> (i32, i32) {
    %c0_i32 = arith.constant 0 : i32
    %c0_i32_0 = arith.constant 0 : i32
    return %arg0, %c0_i32 : i32, i32
  }
  func.func @transform_1(%arg0: i32) -> (i32, i32) {
    %c0_i32 = arith.constant 0 : i32
    %c0_i32_0 = arith.constant 0 : i32
    return %arg0, %c0_i32 : i32, i32
  }
  func.func @transform_2(%arg0: i32) -> (i32, i32) {
    %c0_i32 = arith.constant 0 : i32
    %c0_i32_0 = arith.constant 0 : i32
    return %arg0, %c0_i32 : i32, i32
  }
  func.func @transform_3(%arg0: i32) -> (i32, i32) {
    %c0_i32 = arith.constant 0 : i32
    %c0_i32_0 = arith.constant 0 : i32
    return %arg0, %c0_i32 : i32, i32
  }
  func.func @transform_4(%arg0: i32) -> (i32, i32) {
    %c0_i32 = arith.constant 0 : i32
    %c0_i32_0 = arith.constant 0 : i32
    return %arg0, %c0_i32 : i32, i32
  }
}

</mosaic_0001>

<bundles_post_ra>
// kernel: _bn_add_relu_impl.1
= control target key start
LH: loop header
LB: loop body
LE: loop exit
PB: predicated region body
PF: predicated region fallthrough
CT: control target
= control target key end

     0   :  { %s3947_s15 = smov 0   ;;  %s7487_s0 = inlined_call_operand.vmem [shape: f32[512,784], index: 0, kind: input, shape index: {}, may-alias: {0,4}]   ;;  %s7488_s1 = inlined_call_operand.vmem [shape: f32[512,784], index: 1, kind: input, shape index: {}]   ;;  %s7489_s2 = inlined_call_operand.vmem [shape: f32[512,1], index: 2, kind: input, shape index: {}]   ;;  %s7490_s3 = inlined_call_operand.vmem [shape: f32[512,1], index: 3, kind: input, shape index: {}]   ;;  %s7491_s4 = inlined_call_operand.vmem [shape: f32[512,784], index: 4, kind: output, shape index: {}, may-alias: {0,4}]  }
   0x1 LB: > { %s3730_s16 = sadd.s32 4294967295, %s3919_s15   ;;  %p3734_p0 = scmp.ge.s32.totalorder %s3919_s15, 1  ;;  %s3919_s15 = sphi %s3947_s15, %s14_s15  }
   0x2   : > { %p198_p1 = scmp.lt.s32.totalorder %s3919_s15, 3 }
   0x4   : > { %p199_p2 = pnand %p3734_p0, %p198_p1 }
   0x6   : > { %202 = sbr.rel (%p199_p2) target bundleno = 749 (0x2ed), region = 36 }
   0xb   : > { %s3735_s17 = sshll.u32 %s3730_s16, 5  ;;  %vm504_vm0 = vcmask 130048  }
   0xc   : > { %p243_p3 = scmp.lt.s32.totalorder %s3735_s17, 63 }
   0xe   : > { %s8440_s17 = smov (!%p243_p3, %s3735_s17), 63 }
   0xf   : > { %s3958_s18 = smul.u32 56, %s8440_s17  ;;  %s3740_s22 = sshll.u32 %s8440_s17, 3 }
  0x10   : > { %s5614_s25 = scalar_lea.vmem %s7489_s2, %s3740_s22  ;;  %s6353_s28 = scalar_lea.vmem %s7490_s3, %s3740_s22 }
  0x11   : > { %s3964_s21 = scalar_lea.vmem %s7487_s0, %s3958_s18  ;;  %s6523_s5 = scalar_lea.vmem %s7488_s1, %s3958_s18 }
  0x12   : > { %v303_v0 = vld [vmem:[%s3964_s21 + $0xe0] sm:$0xff]  ;;  %v304_v1 = vld [vmem:[%s3964_s21 + $0xe8] sm:$0xff]  ;;  %v305_v2 = vld [vmem:[%s3964_s21 + $0xf0] sm:$0xff]  ;;  %s6568_s8 = scalar_lea.vmem %s7491_s4, %s3958_s18 }
  0x13   : > { %v536_v3 = vadd.f32 %v304_v1, %v303_v0  ;;  %v306_v4 = vld [vmem:[%s3964_s21 + $0xf8] sm:$0xff]  ;;  %v3971_v5 = vld [vmem:[%s3964_s21 + $0x70] sm:$0xff]  ;;  %v307_v7 = vld [vmem:[%s3964_s21 + $0x100] sm:$0xff] }
  0x14   : > { %v3974_v6 = vld [vmem:[%s3964_s21 + $0x78] sm:$0xff]  ;;  %v3978_v9 = vld [vmem:[%s3964_s21 + $0x80] sm:$0xff]  ;;  %v308_v11 = vld [vmem:[%s3964_s21 + $0x108] sm:$0xff] }
  0x15   : > { %v537_v8 = vadd.f32 %v536_v3, %v305_v2  ;;  %v518_v10 = vadd.f32 %v3974_v6, %v3971_v5  ;;  %v3984_v12 = vld [vmem:[%s3964_s21 + $0x88] sm:$0xff]  ;;  %v3987_v13 = vld [vmem:[%s3964_s21] sm:$0xff]  ;;  %v309_v14 = vld [vmem:[%s3964_s21 + $0x110] sm:$0xff] }
  0x16   : > { %7832 = vst [vmem:[#allocation2_spill] sm:$0xff] %v3987_v13  ;;  %v3992_v17 = vld [vmem:[%s3964_s21 + $0x8] sm:$0xff]  ;;  %v3995_v18 = vld [vmem:[%s3964_s21 + $0x10] sm:$0xff]  ;;  %v4001_v20 = vld [vmem:[%s3964_s21 + $0xa0] sm:$0xff]  ;;  %v541_v28 = vsel %vm504_vm0, %v309_v14, 0.0 }
  0x17   : > { %v538_v15 = vadd.f32 %v537_v8, %v306_v4  ;;  %v519_v16 = vadd.f32 %v518_v10, %v3978_v9  ;;  %7833 = vst [vmem:[#allocation3_spill] sm:$0xff] %v3992_v17  ;;  %v3998_v19 = vld [vmem:[%s3964_s21 + $0x90] sm:$0xff]  ;;  %v4004_v21 = vld [vmem:[%s3964_s21 + $0x18] sm:$0xff]  ;;  %v499_v22 = vadd.f32 %v3992_v17, %v3987_v13  ;;  %v4013_v26 = vld [vmem:[%s3964_s21 + $0x120] sm:$0xff]  ;;  %v523_v39 = vsel %vm504_vm0, %v4001_v20, 0.0 }
  0x18   : > { %7834 = vst [vmem:[#allocation4_spill] sm:$0xff] %v3995_v18  ;;  %v4010_v25 = vld [vmem:[%s3964_s21 + $0x118] sm:$0xff]  ;;  %v4016_v27 = vld [vmem:[%s3964_s21 + $0x128] sm:$0xff]  ;;  %v4023_v30 = vld [vmem:[%s3964_s21 + $0x20] sm:$0xff] }
  0x19   : > { %7835 = vst [vmem:[#allocation5_spill] sm:$0xff] %v4004_v21  ;;  %v539_v23 = vadd.f32 %v538_v15, %v307_v7  ;;  %v520_v24 = vadd.f32 %v519_v16, %v3984_v12  ;;  %v4020_v29 = vld [vmem:[%s3964_s21 + $0x98] sm:$0xff]  ;;  %v500_v31 = vadd.f32 %v499_v22, %v3995_v18  ;;  %v545_v32 = vadd.f32 %v4013_v26, %v4010_v25  ;;  %v4030_v35 = vld [vmem:[%s3964_s21 + $0x28] sm:$0xff]  ;;  %v4033_v36 = vld [vmem:[%s3964_s21 + $0x130] sm:$0xff] }
  0x1a   : > { %7836 = vst [vmem:[#allocation6_spill] sm:$0xff] %v4023_v30  ;;  %v4036_v37 = vld [vmem:[%s3964_s21 + $0xa8] sm:$0xff]  ;;  %v4039_v38 = vld [vmem:[%s3964_s21 + $0xb0] sm:$0xff]  ;;  %v4048_v42 = vld [vmem:[%s3964_s21 + $0x138] sm:$0xff] }
  0x1b   : > { %v540_v33 = vadd.f32 %v539_v23, %v308_v11  ;;  %v521_v34 = vadd.f32 %v520_v24, %v3998_v19  ;;  %7837 = vst [vmem:[#allocation7_spill] sm:$0xff] %v4030_v35  ;;  %v4044_v40 = vld [vmem:[%s3964_s21 + $0x30] sm:$0xff]  ;;  %v501_v41 = vadd.f32 %v500_v31, %v4004_v21  ;;  %v546_v43 = vadd.f32 %v545_v32, %v4016_v27  ;;  %v4052_v44 = vld [vmem:[%s3964_s21 + $0xb8] sm:$0xff]  ;;  %v4058_v48 = vld [vmem:[%s3964_s21 + $0x140] sm:$0xff] }
  0x1c   : > { %7838 = vst [vmem:[#allocation8_spill] sm:$0xff] %v4036_v37  ;;  %v527_v45 = vadd.f32 %v4039_v38, %v4036_v37  ;;  %v4061_v49 = vld [vmem:[%s3964_s21 + $0xc0] sm:$0xff]  ;;  %v4064_v50 = vld [vmem:[%s3964_s21 + $0x38] sm:$0xff]  ;;  %v4068_v52 = vld [vmem:[%s3964_s21 + $0x148] sm:$0xff]  ;;  %v505_v58 = vsel %vm504_vm0, %v4044_v40, 0.0 }
  0x1d   : > { %7839 = vst [vmem:[#allocation9_spill] sm:$0xff] %v4039_v38  ;;  %v542_v46 = vadd.f32 %v541_v28, %v540_v33  ;;  %v522_v47 = vadd.f32 %v521_v34, %v4020_v29  ;;  %v502_v51 = vadd.f32 %v501_v41, %v4023_v30  ;;  %v547_v53 = vadd.f32 %v546_v43, %v4033_v36  ;;  %v4073_v55 = vld [vmem:[%s3964_s21 + $0x40] sm:$0xff]  ;;  %v4076_v56 = vld [vmem:[%s3964_s21 + $0x48] sm:$0xff]  ;;  %v4084_v60 = vld [vmem:[%s3964_s21 + $0xd8] sm:$0xff] }
  0x1e   : > { %7840 = vst [vmem:[#allocation10_spill] sm:$0xff] %v4044_v40  ;;  %v528_v54 = vadd.f32 %v527_v45, %v4052_v44  ;;  %v4081_v59 = vld [vmem:[%s3964_s21 + $0xc8] sm:$0xff]  ;;  %v4087_v61 = vld [vmem:[%s3964_s21 + $0x50] sm:$0xff]  ;;  %v509_v62 = vadd.f32 %v4073_v55, %v4064_v50  ;;  %v4095_v2 = vld [vmem:[%s3964_s21 + $0x1c0] sm:$0xff]  ;;  %v550_v7 = vsel %vm504_vm0, %v4068_v52, 0.0  ;;  %v532_v32 = vsel %vm504_vm0, %v4084_v60, 0.0 }
  0x1f   : > { %7841 = vst [vmem:[#allocation11_spill] sm:$0xff] %v4048_v42  ;;  %543 = vadd.xlane.f32.xlu2 %v542_v46  ;;  %v524_v57 = vadd.f32 %v523_v39, %v522_v47  ;;  %v503_v63 = vadd.f32 %v502_v51, %v4030_v35  ;;  %v548_v0 = vadd.f32 %v547_v53, %v4048_v42  ;;  %v4098_v3 = vld [vmem:[%s3964_s21 + $0x1c8] sm:$0xff]  ;;  %v4101_v4 = vld [vmem:[%s3964_s21 + $0x1d0] sm:$0xff]  ;;  %v4109_v10 = vld [vmem:[%s3964_s21 + $0x58] sm:$0xff] }
  0x20   : > { %7842 = vst [vmem:[#allocation12_spill] sm:$0xff] %v4052_v44  ;;  %v529_v1 = vadd.f32 %v528_v54, %v4061_v49  ;;  %v4106_v8 = vld [vmem:[%s3964_s21 + $0xd0] sm:$0xff]  ;;  %v510_v11 = vadd.f32 %v509_v62, %v4076_v56  ;;  %v572_v14 = vadd.f32 %v4098_v3, %v4095_v2  ;;  %v4117_v23 = vld [vmem:[%s3964_s21 + $0x60] sm:$0xff]  ;;  %v4120_v24 = vld [vmem:[%s3964_s21 + $0x1d8] sm:$0xff] }
  0x21   : > { %7843 = vst [vmem:[#allocation13_spill] sm:$0xff] %v4058_v48  ;;  %525 = vadd.xlane.f32.xlu1 %v524_v57  ;;  %v506_v15 = vadd.f32 %v505_v58, %v503_v63  ;;  %v549_v16 = vadd.f32 %v548_v0, %v4058_v48  ;;  %v4123_v28 = vld [vmem:[%s3964_s21 + $0x188] sm:$0xff]  ;;  %v4126_v31 = vld [vmem:[%s3964_s21 + $0x190] sm:$0xff]  ;;  %v4135_v39 = vld [vmem:[%s3964_s21 + $0x1e0] sm:$0xff] }
  0x22   : > { %7844 = vst [vmem:[#allocation14_spill] sm:$0xff] %v4061_v49  ;;  %v530_v22 = vadd.f32 %v529_v1, %v4081_v59  ;;  %v4131_v33 = vld [vmem:[%s3964_s21 + $0x68] sm:$0xff]  ;;  %v511_v34 = vadd.f32 %v510_v11, %v4087_v61  ;;  %v573_v41 = vadd.f32 %v572_v14, %v4101_v4  ;;  %v4139_v43 = vld [vmem:[%s3964_s21 + $0x198] sm:$0xff]  ;;  %v563_v45 = vadd.f32 %v4126_v31, %v4123_v28  ;;  %v4148_v53 = vld [vmem:[%s3964_s21 + $0x1a0] sm:$0xff] }
  0x23   : > { %7845 = vst [vmem:[#allocation15_spill] sm:$0xff] %v4068_v52  ;;  %507 = vadd.xlane.f32.xlu0 %v506_v15  ;;  %v551_v46 = vadd.f32 %v550_v7, %v549_v16  ;;  %v4145_v51 = vld [vmem:[%s3964_s21 + $0x1e8] sm:$0xff]  ;;  %v4151_v54 = vld [vmem:[%s3964_s21 + $0x150] sm:$0xff]  ;;  %v4160_v0 = vld [vmem:[%s3964_s21 + $0x158] sm:$0xff]  ;;  %v514_v11 = vsel %vm504_vm0, %v4131_v33, 0.0 }
  0x24   : > { %7846 = vst [vmem:[#allocation16_spill] sm:$0xff] %v4081_v59  ;;  %v531_v47 = vadd.f32 %v530_v22, %v4106_v8  ;;  %v512_v57 = vadd.f32 %v511_v34, %v4109_v10  ;;  %v4155_v58 = vld [vmem:[%s3964_s21 + $0x1f0] sm:$0xff]  ;;  %v574_v62 = vadd.f32 %v573_v41, %v4120_v24  ;;  %v564_v63 = vadd.f32 %v563_v45, %v4139_v43  ;;  %v4163_v1 = vld [vmem:[%s3964_s21 + $0x160] sm:$0xff]  ;;  %v4168_v14 = vld [vmem:[%s3964_s21 + $0x1a8] sm:$0xff] }
  0x25   : > { %7847 = vst [vmem:[#allocation17_spill] sm:$0xff] %v4084_v60  ;;  %v4171_v15 = vld [vmem:[%s3964_s21 + $0x1b8] sm:$0xff]  ;;  %v4174_v16 = vld [vmem:[%s3964_s21 + $0x168] sm:$0xff]  ;;  %v554_v22 = vadd.f32 %v4160_v0, %v4151_v54  ;;  %v4465_v52 = vld [vmem:[%s3964_s21 + $0x490] sm:$0xff] }
  0x26   : > { %7848 = vst [vmem:[#allocation18_spill] sm:$0xff] %v4095_v2  ;;  %v533_v7 = vadd.f32 %v532_v32, %v531_v47  ;;  %v513_v34 = vadd.f32 %v512_v57, %v4117_v23  ;;  %v575_v41 = vadd.f32 %v574_v62, %v4135_v39  ;;  %v565_v32 = vadd.f32 %v564_v63, %v4148_v53  ;;  %v4182_v45 = vld [vmem:[%s3964_s21 + $0x268] sm:$0xff]  ;;  %v4185_v47 = vld [vmem:[%s3964_s21 + $0x270] sm:$0xff]  ;;  %v4261_v2 = vld [vmem:[%s3964_s21 + $0x320] sm:$0xff] }
  0x27   : > { %7849 = vst [vmem:[#allocation19_spill] sm:$0xff] %v4098_v3  ;;  %552 = vadd.xlane.f32.xlu2 %v551_v46  ;;  %v577_v46 = vsel %vm504_vm0, %v4155_v58, 0.0  ;;  %v4196_v57 = vld [vmem:[%s3964_s21 + $0x170] sm:$0xff]  ;;  %v555_v62 = vadd.f32 %v554_v22, %v4163_v1  ;;  %v599_v63 = vadd.f32 %v4185_v47, %v4182_v45  ;;  %v568_v22 = vsel %vm504_vm0, %v4171_v15, 0.0  ;;  %v4213_v3 = vld [vmem:[%s3964_s21 + $0x178] sm:$0xff] }
  0x28   : > { %7850 = vst [vmem:[#allocation20_spill] sm:$0xff] %v4101_v4  ;;  %v346_v4 = vld [vmem:[%s3964_s21 + $0x238] sm:$0xff] }
  0x29   : > { %7851 = vst [vmem:[#allocation21_spill] sm:$0xff] %v4106_v8  ;;  %534 = vadd.xlane.f32.xlu1 %v533_v7  ;;  %v4216_v7 = vld [vmem:[%s3964_s21 + $0x180] sm:$0xff] }
  0x2a   : > { %7852 = vst [vmem:[#allocation22_spill] sm:$0xff] %v4120_v24  ;;  %v4207_v24 = vld [vmem:[%s3964_s21 + $0x230] sm:$0xff] }
  0x2b   : > { %7853 = vst [vmem:[#allocation23_spill] sm:$0xff] %v4123_v28  ;;  %v576_v28 = vadd.f32 %v575_v41, %v4145_v51  ;;  %v347_v41 = vld [vmem:[%s3964_s21 + $0x240] sm:$0xff] }
  0x2c   : > { %7854 = vst [vmem:[#allocation24_spill] sm:$0xff] %v4126_v31  ;;  %v4193_v31 = vld [vmem:[%s3964_s21 + $0x1b0] sm:$0xff] }
  0x2d   : > { %7855 = vst [vmem:[#allocation25_spill] sm:$0xff] %v4135_v39  ;;  %v566_v39 = vadd.f32 %v565_v32, %v4168_v14  ;;  %v590_v32 = vadd.f32 %v346_v4, %v4207_v24 }
  0x2e   : > { %7856 = vst [vmem:[#allocation26_spill] sm:$0xff] %v4139_v43  ;;  %v4188_v43 = vld [vmem:[%s3964_s21 + $0x278] sm:$0xff] }
  0x2f   : > { %7857 = vst [vmem:[#allocation27_spill] sm:$0xff] %v4145_v51  ;;  %v4228_v51 = vld [vmem:[%s3964_s21 + $0x1f8] sm:$0xff] }
  0x30   : > { %7858 = vst [vmem:[#allocation28_spill] sm:$0xff] %v4148_v53  ;;  %v515_v53 = vadd.f32 %v514_v11, %v513_v34  ;;  %v556_v11 = vadd.f32 %v555_v62, %v4174_v16  ;;  %v600_v34 = vadd.f32 %v599_v63, %v4188_v43  ;;  %v4232_v63 = vld [vmem:[%s3964_s21 + $0x290] sm:$0xff] }
  0x31   : > { %7859 = vst [vmem:[#allocation29_spill] sm:$0xff] %v4151_v54 }
  0x32   : > { %7860 = vst [vmem:[#allocation30_spill] sm:$0xff] %v4155_v58  ;;  %v4204_v58 = vld [vmem:[%s3964_s21 + $0x280] sm:$0xff]  ;;  %516 = vadd.xlane.f32.xlu0 %v515_v53  ;;  %v557_v62 = vadd.f32 %v556_v11, %v4196_v57  ;;  %v559_v53 = vsel %vm504_vm0, %v4216_v7, 0.0  ;;  %v349_v11 = vld [vmem:[%s3964_s21 + $0x250] sm:$0xff] }
  0x33   : > { %7861 = vst [vmem:[#allocation31_spill] sm:$0xff] %v4160_v0  ;;  %v601_v4 = vadd.f32 %v600_v34, %v4204_v58 }
  0x34   : > { %7862 = vst [vmem:[#allocation32_spill] sm:$0xff] %v4163_v1  ;;  %v431_v1 = vld [vmem:[%s3964_s21 + $0x4e0] sm:$0xff] }
  0x35   : > { %7863 = vst [vmem:[#allocation33_spill] sm:$0xff] %v4168_v14  ;;  %v578_v14 = vadd.f32 %v577_v46, %v576_v28  ;;  %v4236_v28 = vld [vmem:[%s3964_s21 + $0x200] sm:$0xff] }
  0x36   : > { %7864 = vst [vmem:[#allocation34_spill] sm:$0xff] %v4171_v15  ;;  %v4224_v15 = vld [vmem:[%s3964_s21 + $0x288] sm:$0xff]  ;;  %v581_v34 = vadd.f32 %v4236_v28, %v4228_v51 }
  0x37   : > { %7865 = vst [vmem:[#allocation35_spill] sm:$0xff] %v4174_v16  ;;  %579 = vadd.xlane.f32.xlu2 %v578_v14  ;;  %v367_v16 = vld [vmem:[%s3964_s21 + $0x2e0] sm:$0xff] }
  0x38   : > { %7866 = vst [vmem:[#allocation36_spill] sm:$0xff] %v4182_v45  ;;  %v348_v45 = vld [vmem:[%s3964_s21 + $0x248] sm:$0xff] }
  0x39   : > { %7867 = vst [vmem:[#allocation37_spill] sm:$0xff] %v4185_v47  ;;  %v567_v47 = vadd.f32 %v566_v39, %v4193_v31  ;;  %v4239_v39 = vld [vmem:[%s3964_s21 + $0x208] sm:$0xff] }
  0x3a   : > { %7868 = vst [vmem:[#allocation38_spill] sm:$0xff] %v4188_v43  ;;  %v4248_v43 = vld [vmem:[%s3964_s21 + $0x210] sm:$0xff] }
  0x3b   : > { %7869 = vst [vmem:[#allocation39_spill] sm:$0xff] %v4193_v31  ;;  %v569_v46 = vadd.f32 %v568_v22, %v567_v47  ;;  %v4244_v31 = vld [vmem:[%s3964_s21 + $0x298] sm:$0xff]  ;;  %v4255_v47 = vld [vmem:[%s3964_s21 + $0x310] sm:$0xff] }
  0x3c   : > { %7870 = vst [vmem:[#allocation40_spill] sm:$0xff] %v4196_v57  ;;  %v4258_v22 = vld [vmem:[%s3964_s21 + $0x318] sm:$0xff]  ;;  %v604_v14 = vsel %vm504_vm0, %v4244_v31, 0.0 }
  0x3d   : > { %7871 = vst [vmem:[#allocation41_spill] sm:$0xff] %v4204_v58  ;;  %v4264_v57 = vld [vmem:[%s3964_s21 + $0x258] sm:$0xff]  ;;  %570 = vadd.xlane.f32.xlu1 %v569_v46 }
  0x3e   : > { %7872 = vst [vmem:[#allocation42_spill] sm:$0xff] %v4207_v24  ;;  %v591_v24 = vadd.f32 %v590_v32, %v347_v41  ;;  %v558_v41 = vadd.f32 %v557_v62, %v4213_v3  ;;  %v602_v32 = vadd.f32 %v601_v4, %v4224_v15  ;;  %v4270_v62 = vld [vmem:[%s3964_s21 + $0x218] sm:$0xff]  ;;  %v582_v4 = vadd.f32 %v581_v34, %v4239_v39  ;;  %v4284_v34 = vld [vmem:[%s3964_s21 + $0x220] sm:$0xff] }
  0x3f   : > { %7873 = vst [vmem:[#allocation43_spill] sm:$0xff] %v4213_v3  ;;  %v4279_v3 = vld [vmem:[%s3964_s21 + $0x328] sm:$0xff] }
  0x40   : > { %7874 = vst [vmem:[#allocation44_spill] sm:$0xff] %v4216_v7  ;;  %v592_v58 = vadd.f32 %v591_v24, %v348_v45  ;;  %v626_v24 = vadd.f32 %v4258_v22, %v4255_v47  ;;  %v560_v45 = vadd.f32 %v559_v53, %v558_v41  ;;  %v366_v7 = vld [vmem:[%s3964_s21 + $0x2d8] sm:$0xff]  ;;  %v583_v53 = vadd.f32 %v582_v4, %v4248_v43 }
  0x41   : > { %7875 = vst [vmem:[#allocation45_spill] sm:$0xff] %v4224_v15  ;;  %v603_v15 = vadd.f32 %v602_v32, %v4232_v63  ;;  %v368_v32 = vld [vmem:[%s3964_s21 + $0x2e8] sm:$0xff] }
  0x42   : > { %7876 = vst [vmem:[#allocation46_spill] sm:$0xff] %v4228_v51  ;;  %v593_v51 = vadd.f32 %v592_v58, %v349_v11  ;;  %v627_v41 = vadd.f32 %v626_v24, %v4261_v2  ;;  %v4296_v11 = vld [vmem:[%s3964_s21 + $0x330] sm:$0xff]  ;;  %v584_v4 = vadd.f32 %v583_v53, %v4270_v62  ;;  %v4304_v24 = vld [vmem:[%s3964_s21 + $0x338] sm:$0xff]  ;;  %561 = vadd.xlane.f32.xlu0 %v560_v45 }
  0x43   : > { %7877 = vst [vmem:[#allocation47_spill] sm:$0xff] %v4232_v63  ;;  %v369_v63 = vld [vmem:[%s3964_s21 + $0x2f0] sm:$0xff]  ;;  %v4319_v53 = vld [vmem:[%s3964_s21 + $0x2f8] sm:$0xff] }
  0x44   : > { %7878 = vst [vmem:[#allocation48_spill] sm:$0xff] %v4236_v28  ;;  %v4267_v28 = vld [vmem:[%s3964_s21 + $0x260] sm:$0xff]  ;;  %v594_v58 = vadd.f32 %v593_v51, %v4264_v57 }
  0x45   : > { %7879 = vst [vmem:[#allocation49_spill] sm:$0xff] %v4239_v39  ;;  %v595_v46 = vsel %vm504_vm0, %v4267_v28, 0.0  ;;  %v605_v39 = vadd.f32 %v604_v14, %v603_v15  ;;  %v4316_v14 = vld [vmem:[%s3964_s21 + $0x340] sm:$0xff] }
  0x46   : > { %7880 = vst [vmem:[#allocation50_spill] sm:$0xff] %v4244_v31  ;;  %v4300_v31 = vld [vmem:[%s3964_s21 + $0x2a0] sm:$0xff] }
  0x47   : > { %7881 = vst [vmem:[#allocation51_spill] sm:$0xff] %v4248_v43  ;;  %v4338_v43 = vld [vmem:[%s3964_s21 + $0x300] sm:$0xff]  ;;  %606 = vadd.xlane.f32.xlu2 %v605_v39 }
  0x48   : > { %7882 = vst [vmem:[#allocation52_spill] sm:$0xff] %v4255_v47  ;;  %v617_v47 = vadd.f32 %v367_v16, %v366_v7  ;;  %v628_v16 = vadd.f32 %v627_v41, %v4279_v3  ;;  %v4308_v7 = vld [vmem:[%s3964_s21 + $0x2a8] sm:$0xff]  ;;  %v596_v41 = vadd.f32 %v595_v46, %v594_v58  ;;  %v4344_v58 = vld [vmem:[%s3964_s21 + $0x2c0] sm:$0xff] }
  0x49   : > { %7883 = vst [vmem:[#allocation53_spill] sm:$0xff] %v4258_v22  ;;  %v4287_v22 = vld [vmem:[%s3964_s21 + $0x228] sm:$0xff] }
  0x4a   : > { %7884 = vst [vmem:[#allocation54_spill] sm:$0xff] %v4261_v2  ;;  %v618_v51 = vadd.f32 %v617_v47, %v368_v32  ;;  %v586_v15 = vsel %vm504_vm0, %v4287_v22, 0.0  ;;  %v4322_v2 = vld [vmem:[%s3964_s21 + $0x2b8] sm:$0xff]  ;;  %v608_v47 = vadd.f32 %v4308_v7, %v4300_v31  ;;  %v585_v32 = vadd.f32 %v584_v4, %v4284_v34  ;;  %597 = vadd.xlane.f32.xlu1 %v596_v41  ;;  %v4380_v41 = vld [vmem:[%s3964_s21 + $0x350] sm:$0xff] }
  0x4b   : > { %7885 = vst [vmem:[#allocation55_spill] sm:$0xff] %v4264_v57  ;;  %v4311_v57 = vld [vmem:[%s3964_s21 + $0x2b0] sm:$0xff] }
  0x4c   : > { %7886 = vst [vmem:[#allocation56_spill] sm:$0xff] %v4267_v28  ;;  %v619_v45 = vadd.f32 %v618_v51, %v369_v63  ;;  %v4329_v28 = vld [vmem:[%s3964_s21 + $0x3b8] sm:$0xff]  ;;  %v609_v46 = vadd.f32 %v608_v47, %v4311_v57  ;;  %v587_v47 = vadd.f32 %v586_v15, %v585_v32  ;;  %v4370_v15 = vld [vmem:[%s3964_s21 + $0x348] sm:$0xff] }
  0x4d   : > { %7887 = vst [vmem:[#allocation57_spill] sm:$0xff] %v4270_v62  ;;  %v4335_v62 = vld [vmem:[%s3964_s21 + $0x3c8] sm:$0xff] }
  0x4e   : > { %7888 = vst [vmem:[#allocation58_spill] sm:$0xff] %v4279_v3  ;;  %v629_v3 = vadd.f32 %v628_v16, %v4296_v11  ;;  %v631_v16 = vsel %vm504_vm0, %v4316_v14, 0.0  ;;  %v620_v51 = vadd.f32 %v619_v45, %v4319_v53  ;;  %v610_v39 = vadd.f32 %v609_v46, %v4322_v2  ;;  %v4375_v46 = vld [vmem:[%s3964_s21 + $0x2d0] sm:$0xff]  ;;  %588 = vadd.xlane.f32.xlu0 %v587_v47  ;;  %v4406_v47 = vld [vmem:[%s3964_s21 + $0x3e8] sm:$0xff] }
  0x4f   : > { %7889 = vst [vmem:[#allocation59_spill] sm:$0xff] %v4284_v34  ;;  %v388_v34 = vld [vmem:[%s3964_s21 + $0x388] sm:$0xff] }
  0x50   : > { %7890 = vst [vmem:[#allocation60_spill] sm:$0xff] %v4287_v22  ;;  %v4332_v22 = vld [vmem:[%s3964_s21 + $0x3c0] sm:$0xff]  ;;  %v630_v63 = vadd.f32 %v629_v3, %v4304_v24  ;;  %v621_v45 = vadd.f32 %v620_v51, %v4338_v43  ;;  %v4383_v51 = vld [vmem:[%s3964_s21 + $0x358] sm:$0xff] }
  0x51   : > { %7891 = vst [vmem:[#allocation61_spill] sm:$0xff] %v4296_v11  ;;  %v653_v4 = vadd.f32 %v4332_v22, %v4329_v28  ;;  %v4354_v11 = vld [vmem:[%s3964_s21 + $0x3d0] sm:$0xff] }
  0x52   : > { %7892 = vst [vmem:[#allocation62_spill] sm:$0xff] %v4300_v31  ;;  %v387_v31 = vld [vmem:[%s3964_s21 + $0x380] sm:$0xff] }
  0x53   : > { %7893 = vst [vmem:[#allocation63_spill] sm:$0xff] %v4304_v24  ;;  %v654_v3 = vadd.f32 %v653_v4, %v4335_v62  ;;  %v611_v4 = vadd.f32 %v610_v39, %v4344_v58  ;;  %v4390_v24 = vld [vmem:[%s3964_s21 + $0x360] sm:$0xff]  ;;  %v635_v39 = vadd.f32 %v4380_v41, %v4370_v15 }
  0x54   : > { %7894 = vst [vmem:[#allocation64_spill] sm:$0xff] %v4308_v7  ;;  %v4341_v7 = vld [vmem:[%s3964_s21 + $0x308] sm:$0xff] }
  0x55   : > { %7895 = vst [vmem:[#allocation65_spill] sm:$0xff] %v4311_v57  ;;  %v4359_v57 = vld [vmem:[%s3964_s21 + $0x2c8] sm:$0xff]  ;;  %v622_v32 = vsel %vm504_vm0, %v4341_v7, 0.0 }
  0x56   : > { %7896 = vst [vmem:[#allocation66_spill] sm:$0xff] %v4316_v14  ;;  %v390_v14 = vld [vmem:[%s3964_s21 + $0x398] sm:$0xff] }
  0x57   : > { %7897 = vst [vmem:[#allocation67_spill] sm:$0xff] %v4319_v53  ;;  %v4366_v53 = vld [vmem:[%s3964_s21 + $0x3d8] sm:$0xff] }
  0x58   : > { %7898 = vst [vmem:[#allocation68_spill] sm:$0xff] %v4322_v2  ;;  %v4423_v2 = vld [vmem:[%s3964_s21 + $0x370] sm:$0xff] }
  0x59   : > { %7899 = vst [vmem:[#allocation69_spill] sm:$0xff] %v4329_v28  ;;  %v644_v28 = vadd.f32 %v388_v34, %v387_v31  ;;  %v655_v31 = vadd.f32 %v654_v3, %v4354_v11 }
  0x5a   : > { %7900 = vst [vmem:[#allocation70_spill] sm:$0xff] %v4332_v22  ;;  %v389_v22 = vld [vmem:[%s3964_s21 + $0x390] sm:$0xff] }
  0x5b   : > { %7901 = vst [vmem:[#allocation71_spill] sm:$0xff] %v4335_v62  ;;  %v645_v34 = vadd.f32 %v644_v28, %v389_v22  ;;  %v4386_v62 = vld [vmem:[%s3964_s21 + $0x3e0] sm:$0xff]  ;;  %v612_v28 = vadd.f32 %v611_v4, %v4359_v57  ;;  %v656_v22 = vadd.f32 %v655_v31, %v4366_v53  ;;  %v4410_v4 = vld [vmem:[%s3964_s21 + $0x368] sm:$0xff]  ;;  %v636_v31 = vadd.f32 %v635_v39, %v4383_v51 }
  0x5c   : > { %7902 = vst [vmem:[#allocation72_spill] sm:$0xff] %v4338_v43  ;;  %v632_v43 = vadd.f32 %v631_v16, %v630_v63  ;;  %v4400_v63 = vld [vmem:[%s3964_s21 + $0x468] sm:$0xff]  ;;  %v417_v16 = vld [vmem:[%s3964_s21 + $0x470] sm:$0xff] }
  0x5d   : > { %7903 = vst [vmem:[#allocation73_spill] sm:$0xff] %v4341_v7  ;;  %v391_v7 = vld [vmem:[%s3964_s21 + $0x3a0] sm:$0xff]  ;;  %v646_v3 = vadd.f32 %v645_v34, %v390_v14  ;;  %v637_v39 = vadd.f32 %v636_v31, %v4390_v24  ;;  %v4437_v31 = vld [vmem:[%s3964_s21 + $0x378] sm:$0xff] }
  0x5e   : > { %7904 = vst [vmem:[#allocation74_spill] sm:$0xff] %v4344_v58  ;;  %v623_v58 = vadd.f32 %v622_v32, %v621_v45  ;;  %v408_v45 = vld [vmem:[%s3964_s21 + $0x428] sm:$0xff]  ;;  %v409_v32 = vld [vmem:[%s3964_s21 + $0x430] sm:$0xff]  ;;  %633 = vadd.xlane.f32.xlu2 %v632_v43  ;;  %v658_v43 = vsel %vm504_vm0, %v4406_v47, 0.0 }
  0x5f   : > { %7905 = vst [vmem:[#allocation75_spill] sm:$0xff] %v4354_v11  ;;  %v4397_v11 = vld [vmem:[%s3964_s21 + $0x460] sm:$0xff]  ;;  %v647_v34 = vadd.f32 %v646_v3, %v391_v7  ;;  %v671_v7 = vadd.f32 %v409_v32, %v408_v45 }
  0x60   : > { %7906 = vst [vmem:[#allocation76_spill] sm:$0xff] %v4359_v57  ;;  %v680_v14 = vadd.f32 %v4400_v63, %v4397_v11  ;;  %v657_v57 = vadd.f32 %v656_v22, %v4386_v62  ;;  %v411_v22 = vld [vmem:[%s3964_s21 + $0x440] sm:$0xff]  ;;  %624 = vadd.xlane.f32.xlu1 %v623_v58  ;;  %v4449_v58 = vld [vmem:[%s3964_s21 + $0x488] sm:$0xff] }
  0x61   : > { %7907 = vst [vmem:[#allocation77_spill] sm:$0xff] %v4366_v53  ;;  %v418_v53 = vld [vmem:[%s3964_s21 + $0x478] sm:$0xff]  ;;  %v4444_v45 = vld [vmem:[%s3964_s21 + $0x400] sm:$0xff] }
  0x62   : > { %7908 = vst [vmem:[#allocation78_spill] sm:$0xff] %v4370_v15  ;;  %v392_v15 = vld [vmem:[%s3964_s21 + $0x3a8] sm:$0xff] }
  0x63   : > { %7909 = vst [vmem:[#allocation79_spill] sm:$0xff] %v4375_v46  ;;  %v648_v48 = vadd.f32 %v647_v34, %v392_v15  ;;  %v412_v15 = vld [vmem:[%s3964_s21 + $0x448] sm:$0xff] }
  0x64   : > { %7910 = vst [vmem:[#allocation80_spill] sm:$0xff] %v4380_v41  ;;  %v613_v41 = vsel %vm504_vm0, %v4375_v46, 0.0  ;;  %v4420_v46 = vld [vmem:[%s3964_s21 + $0x3b0] sm:$0xff]  ;;  %v4453_v34 = vld [vmem:[%s3964_s21 + $0x408] sm:$0xff] }
  0x65   : > { %7911 = vst [vmem:[#allocation81_spill] sm:$0xff] %v4383_v51  ;;  %v681_v51 = vadd.f32 %v680_v14, %v417_v16  ;;  %v614_v3 = vadd.f32 %v613_v41, %v612_v28  ;;  %v638_v16 = vadd.f32 %v637_v39, %v4410_v4  ;;  %v4441_v28 = vld [vmem:[%s3964_s21 + $0x3f8] sm:$0xff]  ;;  %v649_v32 = vsel %vm504_vm0, %v4420_v46, 0.0 }
  0x66   : > { %7912 = vst [vmem:[#allocation82_spill] sm:$0xff] %v4386_v62  ;;  %v4434_v62 = vld [vmem:[%s3964_s21 + $0x3f0] sm:$0xff] }
  0x67   : > { %7913 = vst [vmem:[#allocation83_spill] sm:$0xff] %v4390_v24  ;;  %v682_v14 = vadd.f32 %v681_v51, %v418_v53  ;;  %v662_v39 = vadd.f32 %v4441_v28, %v4434_v62  ;;  %v659_v53 = vadd.f32 %v658_v43, %v657_v57  ;;  %v639_v51 = vadd.f32 %v638_v16, %v4423_v2  ;;  %v413_v57 = vld [vmem:[%s3964_s21 + $0x450] sm:$0xff] }
  0x68   : > { %7914 = vst [vmem:[#allocation84_spill] sm:$0xff] %v4397_v11  ;;  %v4430_v11 = vld [vmem:[%s3964_s21 + $0x480] sm:$0xff]  ;;  %615 = vadd.xlane.f32.xlu0 %v614_v3  ;;  %v640_v24 = vsel %vm504_vm0, %v4437_v31, 0.0  ;;  %v4469_v43 = vld [vmem:[%s3964_s21 + $0x410] sm:$0xff] }
  0x69   : > { %7915 = vst [vmem:[#allocation85_spill] sm:$0xff] %v4400_v63  ;;  %v410_v63 = vld [vmem:[%s3964_s21 + $0x438] sm:$0xff]  ;;  %v663_v16 = vadd.f32 %v662_v39, %v4444_v45  ;;  %v429_v3 = vld [vmem:[%s3964_s21 + $0x4d0] sm:$0xff]  ;;  %660 = vadd.xlane.f32.xlu2 %v659_v53 }
  0x6a   : > { %7916 = vst [vmem:[#allocation86_spill] sm:$0xff] %v4406_v47  ;;  %v672_v41 = vadd.f32 %v671_v7, %v410_v63  ;;  %v683_v63 = vadd.f32 %v682_v14, %v4430_v11  ;;  %v436_v47 = vld [vmem:[%s3964_s21 + $0x508] sm:$0xff] }
  0x6b   : > { %7917 = vst [vmem:[#allocation87_spill] sm:$0xff] %v4410_v4  ;;  %v438_v4 = vld [vmem:[%s3964_s21 + $0x518] sm:$0xff] }
  0x6c   : > { %7918 = vst [vmem:[#allocation88_spill] sm:$0xff] %v4420_v46  ;;  %v673_v7 = vadd.f32 %v672_v41, %v411_v22  ;;  %v437_v46 = vld [vmem:[%s3964_s21 + $0x510] sm:$0xff]  ;;  %v650_v22 = vadd.f32 %v649_v32, %v648_v48  ;;  %v641_v48 = vadd.f32 %v640_v24, %v639_v51  ;;  %v440_v32 = vld [vmem:[%s3964_s21 + $0x528] sm:$0xff]  ;;  %v4496_v24 = vld [vmem:[%s3964_s21 + $0x420] sm:$0xff] }
  0x6d   : > { %7919 = vst [vmem:[#allocation89_spill] sm:$0xff] %v4423_v2  ;;  %v707_v14 = vadd.f32 %v437_v46, %v436_v47  ;;  %v4477_v2 = vld [vmem:[%s3964_s21 + $0x458] sm:$0xff]  ;;  %v685_v46 = vsel %vm504_vm0, %v4465_v52, 0.0 }
  0x6e   : > { %7920 = vst [vmem:[#allocation90_spill] sm:$0xff] %v4430_v11  ;;  %v674_v41 = vadd.f32 %v673_v7, %v412_v15  ;;  %v439_v11 = vld [vmem:[%s3964_s21 + $0x520] sm:$0xff]  ;;  %v4484_v47 = vld [vmem:[%s3964_s21 + $0x418] sm:$0xff]  ;;  %v432_v15 = vld [vmem:[%s3964_s21 + $0x4e8] sm:$0xff]  ;;  %651 = vadd.xlane.f32.xlu1 %v650_v22 }
  0x6f   : > { %7921 = vst [vmem:[#allocation91_spill] sm:$0xff] %v4434_v62  ;;  %v684_v62 = vadd.f32 %v683_v63, %v4449_v58  ;;  %v708_v42 = vadd.f32 %v707_v14, %v438_v4  ;;  %v4489_v63 = vld [vmem:[%s3964_s21 + $0x498] sm:$0xff]  ;;  %v788_v4 = vmul.f32 %v3987_v13, %v3987_v13  ;;  %v4500_v14 = vld [vmem:[%s3964_s21 + $0x4a0] sm:$0xff]  ;;  %v4519_v13 = vld [vmem:[%s3964_s21 + $0x530] sm:$0xff] }
  0x70   : > { %7922 = vst [vmem:[#allocation92_spill] sm:$0xff] %v4437_v31  ;;  %v664_v31 = vadd.f32 %v663_v16, %v4453_v34  ;;  %v675_v53 = vadd.f32 %v674_v41, %v413_v57  ;;  %v676_v57 = vsel %vm504_vm0, %v4477_v2, 0.0  ;;  %v4508_v41 = vld [vmem:[%s3964_s21 + $0x538] sm:$0xff]  ;;  %642 = vadd.xlane.f32.xlu0 %v641_v48 }
  0x71   : > { %7923 = vst [vmem:[#allocation93_spill] sm:$0xff] %v4441_v28  ;;  %v430_v28 = vld [vmem:[%s3964_s21 + $0x4d8] sm:$0xff]  ;;  %v709_v7 = vadd.f32 %v708_v42, %v439_v11  ;;  %v689_v42 = vadd.f32 %v4500_v14, %v4489_v63 }
  0x72   : > { %7924 = vst [vmem:[#allocation94_spill] sm:$0xff] %v4444_v45  ;;  %v698_v39 = vadd.f32 %v430_v28, %v429_v3  ;;  %v789_v28 = vmul.f32 %v3992_v17, %v3992_v17  ;;  %v665_v51 = vadd.f32 %v664_v31, %v4469_v43  ;;  %v4503_v3 = vld [vmem:[%s3964_s21 + $0x4a8] sm:$0xff]  ;;  %v433_v17 = vld [vmem:[%s3964_s21 + $0x4f0] sm:$0xff]  ;;  %v4526_v45 = vld [vmem:[%s3964_s21 + $0x4b8] sm:$0xff] }
  0x73   : > { %7925 = vst [vmem:[#allocation95_spill] sm:$0xff] %v4449_v58  ;;  %v4512_v31 = vld [vmem:[%s3964_s21 + $0x4b0] sm:$0xff]  ;;  %v710_v22 = vadd.f32 %v709_v7, %v440_v32  ;;  %v458_v58 = vld [vmem:[%s3964_s21 + $0x5b8] sm:$0xff]  ;;  %v667_v7 = vsel %vm504_vm0, %v4496_v24, 0.0 }
  0x74   : > { %7926 = vst [vmem:[#allocation96_spill] sm:$0xff] %v4453_v34  ;;  %v699_v16 = vadd.f32 %v698_v39, %v431_v1  ;;  %v790_v1 = vmul.f32 %v3995_v18, %v3995_v18  ;;  %v1012_v11 = vadd.f32 %v789_v28, %v788_v4  ;;  %v686_v39 = vadd.f32 %v685_v46, %v684_v62  ;;  %v435_v34 = vld [vmem:[%s3964_s21 + $0x500] sm:$0xff]  ;;  %v460_v18 = vld [vmem:[%s3964_s21 + $0x5c8] sm:$0xff] }
  0x75   : > { %7927 = vst [vmem:[#allocation97_spill] sm:$0xff] %v4465_v52  ;;  %v690_v4 = vadd.f32 %v689_v42, %v4503_v3  ;;  %v791_v46 = vmul.f32 %v4004_v21, %v4004_v21  ;;  %v666_v28 = vadd.f32 %v665_v51, %v4484_v47  ;;  %v450_v42 = vld [vmem:[%s3964_s21 + $0x578] sm:$0xff]  ;;  %v4544_v21 = vld [vmem:[%s3964_s21 + $0x4c0] sm:$0xff] }
  0x76   : > { %7928 = vst [vmem:[#allocation98_spill] sm:$0xff] %v4469_v43  ;;  %v700_v52 = vadd.f32 %v699_v16, %v432_v15  ;;  %v459_v43 = vld [vmem:[%s3964_s21 + $0x5c0] sm:$0xff]  ;;  %v1013_v32 = vadd.f32 %v1012_v11, %v790_v1  ;;  %v677_v15 = vadd.f32 %v676_v57, %v675_v53  ;;  %v434_v16 = vld [vmem:[%s3964_s21 + $0x4f8] sm:$0xff]  ;;  %v461_v53 = vld [vmem:[%s3964_s21 + $0x5d0] sm:$0xff]  ;;  %v712_v11 = vsel %vm504_vm0, %v4508_v41, 0.0  ;;  %687 = vadd.xlane.f32.xlu2 %v686_v39 }
  0x77   : > { %7929 = vst [vmem:[#allocation99_spill] sm:$0xff] %v4477_v2  ;;  %v457_v2 = vld [vmem:[%s3964_s21 + $0x5b0] sm:$0xff]  ;;  %v691_v48 = vadd.f32 %v690_v4, %v4512_v31  ;;  %v452_v57 = vld [vmem:[%s3964_s21 + $0x588] sm:$0xff]  ;;  %v4557_v4 = vld [vmem:[%s3964_s21 + $0x540] sm:$0xff] }
  0x78   : > { %7930 = vst [vmem:[#allocation100_spill] sm:$0xff] %v4484_v47  ;;  %v734_v62 = vadd.f32 %v458_v58, %v457_v2  ;;  %v792_v2 = vmul.f32 %v4023_v30, %v4023_v30  ;;  %v701_v58 = vadd.f32 %v700_v52, %v433_v17  ;;  %v462_v52 = vld [vmem:[%s3964_s21 + $0x5d8] sm:$0xff]  ;;  %v453_v30 = vld [vmem:[%s3964_s21 + $0x590] sm:$0xff]  ;;  %678 = vadd.xlane.f32.xlu1 %v677_v15  ;;  %v4589_v15 = vld [vmem:[%s3964_s21 + $0x560] sm:$0xff] }
  0x79   : > { %7931 = vst [vmem:[#allocation101_spill] sm:$0xff] %v4489_v63  ;;  %v703_v63 = vsel %vm504_vm0, %v435_v34, 0.0  ;;  %v454_v47 = vld [vmem:[%s3964_s21 + $0x598] sm:$0xff] }
  0x7a   : > { %7932 = vst [vmem:[#allocation102_spill] sm:$0xff] %v4496_v24  ;;  %v735_v51 = vadd.f32 %v734_v62, %v459_v43  ;;  %v1014_v43 = vadd.f32 %v1013_v32, %v791_v46  ;;  %v711_v62 = vadd.f32 %v710_v22, %v4519_v13  ;;  %v668_v24 = vadd.f32 %v667_v7, %v666_v28  ;;  %v456_v46 = vld [vmem:[%s3964_s21 + $0x5a8] sm:$0xff]  ;;  %v4573_v39 = vld [vmem:[%s3964_s21 + $0x558] sm:$0xff]  ;;  %v479_v7 = vld [vmem:[%s3964_s21 + $0x660] sm:$0xff] }
  0x7b   : > { %7933 = vst [vmem:[#allocation103_spill] sm:$0xff] %v4500_v14  ;;  %v4529_v14 = vld [vmem:[%s3964_s21 + $0x4c8] sm:$0xff]  ;;  %v478_v28 = vld [vmem:[%s3964_s21 + $0x658] sm:$0xff] }
  0x7c   : > { %7934 = vst [vmem:[#allocation104_spill] sm:$0xff] %v4503_v3  ;;  %v451_v3 = vld [vmem:[%s3964_s21 + $0x580] sm:$0xff]  ;;  %v694_v17 = vsel %vm504_vm0, %v4529_v14, 0.0  ;;  %v1015_v32 = vadd.f32 %v1014_v43, %v792_v2  ;;  %669 = vadd.xlane.f32.xlu0 %v668_v24  ;;  %v4608_v24 = vld [vmem:[%s3964_s21 + $0x678] sm:$0xff] }
  0x7d   : > { %7935 = vst [vmem:[#allocation105_spill] sm:$0xff] %v4508_v41  ;;  %v725_v1 = vadd.f32 %v451_v3, %v450_v42  ;;  %v692_v3 = vadd.f32 %v691_v48, %v4526_v45  ;;  %v4562_v42 = vld [vmem:[%s3964_s21 + $0x5e0] sm:$0xff]  ;;  %v736_v41 = vadd.f32 %v735_v51, %v460_v18  ;;  %v793_v18 = vmul.f32 %v4030_v35, %v4030_v35 }
  0x7e   : > { %7936 = vst [vmem:[#allocation106_spill] sm:$0xff] %v4512_v31  ;;  %v4565_v31 = vld [vmem:[%s3964_s21 + $0x548] sm:$0xff]  ;;  %v702_v48 = vadd.f32 %v701_v58, %v434_v16  ;;  %v739_v35 = vsel %vm504_vm0, %v4562_v42, 0.0  ;;  %v455_v2 = vld [vmem:[%s3964_s21 + $0x5a0] sm:$0xff]  ;;  %v761_v16 = vadd.f32 %v479_v7, %v478_v28  ;;  %v713_v58 = vadd.f32 %v712_v11, %v711_v62 }
  0x7f   : > { %7937 = vst [vmem:[#allocation107_spill] sm:$0xff] %v4519_v13  ;;  %v726_v34 = vadd.f32 %v725_v1, %v452_v57  ;;  %v716_v22 = vadd.f32 %v4565_v31, %v4557_v4  ;;  %v737_v51 = vadd.f32 %v736_v41, %v461_v53  ;;  %v480_v1 = vld [vmem:[%s3964_s21 + $0x668] sm:$0xff]  ;;  %v794_v13 = vmul.f32 %v4044_v40, %v4044_v40  ;;  %v471_v40 = vld [vmem:[%s3964_s21 + $0x620] sm:$0xff] }
  0x80   : > { %7938 = vst [vmem:[#allocation108_spill] sm:$0xff] %v4526_v45  ;;  %v693_v45 = vadd.f32 %v692_v3, %v4544_v21  ;;  %v730_v3 = vsel %vm504_vm0, %v456_v46, 0.0  ;;  %v4612_v28 = vld [vmem:[%s3964_s21 + $0x5e8] sm:$0xff]  ;;  %714 = vadd.xlane.f32.xlu2 %v713_v58 }
  0x81   : > { %7939 = vst [vmem:[#allocation109_spill] sm:$0xff] %v4529_v14  ;;  %v4568_v14 = vld [vmem:[%s3964_s21 + $0x550] sm:$0xff]  ;;  %v727_v57 = vadd.f32 %v726_v34, %v453_v30  ;;  %v738_v53 = vadd.f32 %v737_v51, %v462_v52  ;;  %v1016_v52 = vadd.f32 %v1015_v32, %v793_v18  ;;  %v4603_v51 = vld [vmem:[%s3964_s21 + $0x568] sm:$0xff]  ;;  %v1017_v7 = vsel %vm504_vm0, %v794_v13, 0.0  ;;  %v4626_v13 = vld [vmem:[%s3964_s21 + $0x600] sm:$0xff] }
  0x82   : > { %7940 = vst [vmem:[#allocation110_spill] sm:$0xff] %v4544_v21  ;;  %v4592_v30 = vld [vmem:[%s3964_s21 + $0x570] sm:$0xff]  ;;  %v717_v41 = vadd.f32 %v716_v22, %v4568_v14  ;;  %v762_v21 = vadd.f32 %v761_v16, %v480_v1  ;;  %v4621_v1 = vld [vmem:[%s3964_s21 + $0x5f8] sm:$0xff]  ;;  %v475_v16 = vld [vmem:[%s3964_s21 + $0x640] sm:$0xff] }
  0x83   : > { %7941 = vst [vmem:[#allocation111_spill] sm:$0xff] %v4557_v4  ;;  %v728_v43 = vadd.f32 %v727_v57, %v454_v47  ;;  %v481_v34 = vld [vmem:[%s3964_s21 + $0x670] sm:$0xff]  ;;  %v484_v4 = vld [vmem:[%s3964_s21 + $0x688] sm:$0xff]  ;;  %v704_v47 = vadd.f32 %v703_v63, %v702_v48  ;;  %v721_v46 = vsel %vm504_vm0, %v4592_v30, 0.0  ;;  %v474_v57 = vld [vmem:[%s3964_s21 + $0x638] sm:$0xff] }
  0x84   : > { %7942 = vst [vmem:[#allocation112_spill] sm:$0xff] %v4562_v42  ;;  %v472_v42 = vld [vmem:[%s3964_s21 + $0x628] sm:$0xff]  ;;  %v473_v22 = vld [vmem:[%s3964_s21 + $0x630] sm:$0xff]  ;;  %v763_v63 = vadd.f32 %v762_v21, %v481_v34  ;;  %v803_v34 = vmul.f32 %v3974_v6, %v3974_v6  ;;  %v495_v6 = vld [vmem:[%s3964_s21 + $0x6e0] sm:$0xff] }
  0x85   : > { %7943 = vst [vmem:[#allocation113_spill] sm:$0xff] %v4565_v31  ;;  %v718_v31 = vadd.f32 %v717_v41, %v4573_v39  ;;  %v752_v11 = vadd.f32 %v472_v42, %v471_v40  ;;  %v729_v62 = vadd.f32 %v728_v43, %v455_v2  ;;  %v695_v40 = vadd.f32 %v694_v17, %v693_v45  ;;  %v477_v18 = vld [vmem:[%s3964_s21 + $0x650] sm:$0xff]  ;;  %v4629_v45 = vld [vmem:[%s3964_s21 + $0x618] sm:$0xff] }
  0x86   : > { %7944 = vst [vmem:[#allocation114_spill] sm:$0xff] %v4568_v14  ;;  %v4618_v48 = vld [vmem:[%s3964_s21 + $0x5f0] sm:$0xff]  ;;  %v740_v2 = vadd.f32 %v739_v35, %v738_v53  ;;  %v766_v41 = vsel %vm504_vm0, %v484_v4, 0.0  ;;  %v764_v17 = vadd.f32 %v763_v63, %v4608_v24  ;;  %v492_v35 = vld [vmem:[%s3964_s21 + $0x6c8] sm:$0xff]  ;;  %v494_v53 = vld [vmem:[%s3964_s21 + $0x6d8] sm:$0xff]  ;;  %v4639_v43 = vadd.f32 %v1017_v7, %v1016_v52  ;;  %705 = vadd.xlane.f32.xlu1 %v704_v47 }
  0x87   : > { %7945 = vst [vmem:[#allocation115_spill] sm:$0xff] %v4573_v39  ;;  %v719_v42 = vadd.f32 %v718_v31, %v4589_v15  ;;  %v753_v32 = vadd.f32 %v752_v11, %v473_v22  ;;  %v743_v21 = vadd.f32 %v4618_v48, %v4612_v28  ;;  %v802_v31 = vmul.f32 %v3971_v5, %v3971_v5  ;;  %v493_v4 = vld [vmem:[%s3964_s21 + $0x6d0] sm:$0xff]  ;;  %v4644_v11 = vld [vmem:[%s3964_s21 + $0x680] sm:$0xff]  ;;  %v4648_v63 = vld [vmem:[%s3964_s21 + $0x608] sm:$0xff] }
  0x88   : > { %7946 = vst [vmem:[#allocation116_spill] sm:$0xff] %v4589_v15  ;;  %v731_v22 = vadd.f32 %v730_v3, %v729_v62  ;;  %v757_v5 = vsel %vm504_vm0, %v477_v18, 0.0  ;;  %v748_v7 = vsel %vm504_vm0, %v4629_v45, 0.0  ;;  %v4656_v3 = vld [vmem:[%s3964_s21 + $0x690] sm:$0xff]  ;;  %v4659_v47 = vld [vmem:[%s3964_s21 + $0x698] sm:$0xff]  ;;  %v804_v62 = vmul.f32 %v3978_v9, %v3978_v9  ;;  %696 = vadd.xlane.f32.xlu0 %v695_v40  ;;  %741 = vadd.xlane.f32.xlu2 %v740_v2 }
  0x89   : > { %7947 = vst [vmem:[#allocation117_spill] sm:$0xff] %v4592_v30  ;;  %v754_v58 = vadd.f32 %v753_v32, %v474_v57  ;;  %v744_v57 = vadd.f32 %v743_v21, %v4621_v1  ;;  %v779_v32 = vadd.f32 %v493_v4, %v492_v35  ;;  %v720_v52 = vadd.f32 %v719_v42, %v4603_v51  ;;  %v4666_v21 = vld [vmem:[%s3964_s21 + $0x648] sm:$0xff] }
  0x8a   : > { %7948 = vst [vmem:[#allocation118_spill] sm:$0xff] %v4603_v51  ;;  %v805_v18 = vmul.f32 %v3984_v12, %v3984_v12  ;;  %v765_v9 = vadd.f32 %v764_v17, %v4644_v11  ;;  %v498_v12 = vld [vmem:[%s3964_s21 + $0x6f8] sm:$0xff]  ;;  %v807_v17 = vmul.f32 %v4020_v29, %v4020_v29 }
  0x8b   : > { %7949 = vst [vmem:[#allocation119_spill] sm:$0xff] %v4608_v24  ;;  %v755_v35 = vadd.f32 %v754_v58, %v475_v16  ;;  %v745_v42 = vadd.f32 %v744_v57, %v4626_v13  ;;  %v780_v4 = vadd.f32 %v779_v32, %v494_v53  ;;  %v4670_v24 = vld [vmem:[%s3964_s21 + $0x6a0] sm:$0xff]  ;;  %v806_v16 = vmul.f32 %v3998_v19, %v3998_v19 }
  0x8c   : > { %7950 = vst [vmem:[#allocation120_spill] sm:$0xff] %v4612_v28  ;;  %v808_v58 = vmul.f32 %v4001_v20, %v4001_v20  ;;  %v1030_v53 = vadd.f32 %v803_v34, %v802_v31  ;;  %v809_v20 = vmul.f32 %v4036_v37, %v4036_v37  ;;  %v810_v31 = vmul.f32 %v4039_v38, %v4039_v38  ;;  %v7995_v38 = vld [vmem:[#allocation24_spill] sm:$0xff] }
  0x8d   : > { %7951 = vst [vmem:[#allocation121_spill] sm:$0xff] %v4618_v48  ;;  %v4680_v48 = vld [vmem:[%s3964_s21 + $0x6a8] sm:$0xff]  ;;  %v746_v57 = vadd.f32 %v745_v42, %v4648_v63  ;;  %v781_v32 = vadd.f32 %v780_v4, %v495_v6  ;;  %v4708_v6 = vld [vmem:[%s3964_s21 + $0x6f0] sm:$0xff]  ;;  %v811_v4 = vmul.f32 %v4052_v44, %v4052_v44  ;;  %v7991_v44 = vld [vmem:[#allocation49_spill] sm:$0xff] }
  0x8e   : > { %7952 = vst [vmem:[#allocation122_spill] sm:$0xff] %v4621_v1  ;;  %v4676_v1 = vld [vmem:[%s3964_s21 + $0x6e8] sm:$0xff]  ;;  %v1031_v19 = vadd.f32 %v1030_v53, %v804_v62  ;;  %v1035_v62 = vsel %vm504_vm0, %v808_v58, 0.0  ;;  %732 = vadd.xlane.f32.xlu1 %v731_v22  ;;  %v4715_v53 = vld [vmem:[%s3964_s21 + $0x6b8] sm:$0xff]  ;;  %v795_v58 = vmul.f32 %v4064_v50, %v4064_v50  ;;  %v796_v22 = vmul.f32 %v4073_v55, %v4073_v55 }
  0x8f   : > { %7953 = vst [vmem:[#allocation123_spill] sm:$0xff] %v4626_v13  ;;  %v4697_v13 = vld [vmem:[%s3964_s21 + $0x6c0] sm:$0xff]  ;;  %v782_v29 = vadd.f32 %v781_v32, %v4676_v1  ;;  %v815_v50 = vmul.f32 %v4084_v60, %v4084_v60  ;;  %v7989_v60 = vld [vmem:[#allocation48_spill] sm:$0xff] }
  0x90   : > { %7954 = vst [vmem:[#allocation124_spill] sm:$0xff] %v4629_v45  ;;  %v770_v45 = vadd.f32 %v4659_v47, %v4656_v3  ;;  %v1032_v42 = vadd.f32 %v1031_v19, %v805_v18  ;;  %v1039_v18 = vadd.f32 %v810_v31, %v809_v20  ;;  %v797_v19 = vmul.f32 %v4076_v56, %v4076_v56 }
  0x91   : > { %7955 = vst [vmem:[#allocation125_spill] sm:$0xff] %v4644_v11  ;;  %v722_v11 = vadd.f32 %v721_v46, %v720_v52  ;;  %v784_v46 = vsel %vm504_vm0, %v498_v12, 0.0  ;;  %v767_v52 = vadd.f32 %v766_v41, %v765_v9  ;;  %v775_v12 = vsel %vm504_vm0, %v4697_v13, 0.0 }
  0x92   : > { %7956 = vst [vmem:[#allocation126_spill] sm:$0xff] %v4648_v63  ;;  %v771_v40 = vadd.f32 %v770_v45, %v4670_v24  ;;  %v756_v45 = vadd.f32 %v755_v35, %v4666_v21  ;;  %v812_v41 = vmul.f32 %v4061_v49, %v4061_v49  ;;  %v1033_v9 = vadd.f32 %v1032_v42, %v806_v16 }
  0x93   : > { %7957 = vst [vmem:[#allocation127_spill] sm:$0xff] %v4656_v3  ;;  %v4694_v3 = vld [vmem:[%s3964_s21 + $0x6b0] sm:$0xff]  ;;  %723 = vadd.xlane.f32.xlu0 %v722_v11  ;;  %v814_v16 = vmul.f32 %v4106_v8, %v4106_v8  ;;  %v1040_v20 = vadd.f32 %v1039_v18, %v811_v4  ;;  %v798_v31 = vmul.f32 %v4087_v61, %v4087_v61  ;;  %v7990_v8 = vld [vmem:[#allocation25_spill] sm:$0xff] }
  0x94   : > { %7958 = vst [vmem:[#allocation128_spill] sm:$0xff] %v4659_v47  ;;  %v4691_v47 = vld [vmem:[%s3964_s21 + $0x610] sm:$0xff]  ;;  %v772_v34 = vadd.f32 %v771_v40, %v4680_v48  ;;  %v758_v32 = vadd.f32 %v757_v5, %v756_v45  ;;  %v813_v40 = vmul.f32 %v4081_v59, %v4081_v59  ;;  %v1034_v5 = vadd.f32 %v1033_v9, %v807_v17 }
  0x95   : > { %7959 = vst [vmem:[#allocation129_spill] sm:$0xff] %v4666_v21  ;;  %v747_v2 = vadd.f32 %v746_v57, %v4691_v47  ;;  %v783_v57 = vadd.f32 %v782_v29, %v4708_v6  ;;  %v1021_v45 = vadd.f32 %v796_v22, %v795_v58  ;;  %v1041_v29 = vadd.f32 %v1040_v20, %v812_v41  ;;  %v7968_v9 = vld [vmem:[#allocation32_spill] sm:$0xff]  ;;  %v7969_v58 = vld [vmem:[#allocation11_spill] sm:$0xff]  ;;  %v4771_v20 = vld [vmem:[%s3964_s21 + $0xe0] sm:$0xff] }
  0x96   : > { %7960 = vst [vmem:[#allocation130_spill] sm:$0xff] %v4670_v24  ;;  %v773_v35 = vadd.f32 %v772_v34, %v4694_v3  ;;  %v801_v56 = vmul.f32 %v4131_v33, %v4131_v33  ;;  %v823_v11 = vmul.f32 %v4010_v25, %v4010_v25  ;;  %v824_v42 = vmul.f32 %v4013_v26, %v4013_v26 }
  0x97   : > { %7961 = vst [vmem:[#allocation131_spill] sm:$0xff] %v4676_v1  ;;  %v749_v55 = vadd.f32 %v748_v7, %v747_v2  ;;  %768 = vadd.xlane.f32.xlu2 %v767_v52  ;;  %v799_v7 = vmul.f32 %v4109_v10, %v4109_v10  ;;  %v1022_v17 = vadd.f32 %v1021_v45, %v797_v19  ;;  %v1044_v41 = vsel %vm504_vm0, %v815_v50, 0.0 }
  0x98   : > { %7962 = vst [vmem:[#allocation132_spill] sm:$0xff] %v4680_v48  ;;  %v774_v34 = vadd.f32 %v773_v35, %v4715_v53  ;;  %v785_v35 = vadd.f32 %v784_v46, %v783_v57  ;;  %v825_v61 = vmul.f32 %v4016_v27, %v4016_v27  ;;  %v1042_v2 = vadd.f32 %v1041_v29, %v813_v40  ;;  %v7974_v29 = vld [vmem:[#allocation44_spill] sm:$0xff] }
  0x99   : > { %7963 = vst [vmem:[#allocation133_spill] sm:$0xff] %v4691_v47  ;;  %v826_v33 = vmul.f32 %v4033_v36, %v4033_v36  ;;  %759 = vadd.xlane.f32.xlu1 %v758_v32  ;;  %v1023_v25 = vadd.f32 %v1022_v17, %v798_v31  ;;  %v1057_v26 = vadd.f32 %v824_v42, %v823_v11  ;;  %v7970_v32 = vld [vmem:[#allocation15_spill] sm:$0xff] }
  0x9a   : > { %7964 = vst [vmem:[#allocation134_spill] sm:$0xff] %v4694_v3  ;;  %v776_v4 = vadd.f32 %v775_v12, %v774_v34  ;;  %v830_v46 = vmul.f32 %v4151_v54, %v4151_v54  ;;  %v831_v10 = vmul.f32 %v4160_v0, %v4160_v0  ;;  %v4755_v52 = vadd.f32 %v1035_v62, %v1034_v5  ;;  %v7971_v62 = vld [vmem:[#allocation13_spill] sm:$0xff]  ;;  %v4778_v11 = vld [vmem:[%s3964_s21 + $0xe8] sm:$0xff]  ;;  %v7987_v0 = vld [vmem:[#allocation46_spill] sm:$0xff] }
  0x9b   : > { %7965 = vst [vmem:[#allocation135_spill] sm:$0xff] %v4697_v13  ;;  %v800_v27 = vmul.f32 %v4117_v23, %v4117_v23  ;;  %v1026_v12 = vsel %vm504_vm0, %v801_v56, 0.0  ;;  %v832_v36 = vmul.f32 %v7968_v9, %v7968_v9  ;;  %v1024_v18 = vadd.f32 %v1023_v25, %v799_v7  ;;  %750 = vadd.xlane.f32.xlu0 %v749_v55  ;;  %v7972_v23 = vld [vmem:[#allocation35_spill] sm:$0xff]  ;;  %v7976_v7 = vld [vmem:[#allocation40_spill] sm:$0xff] }
  0x9c   : > { %7966 = vst [vmem:[#allocation136_spill] sm:$0xff] %v4708_v6  ;;  %v827_v22 = vmul.f32 %v7969_v58, %v7969_v58  ;;  %v829_v57 = vmul.f32 %v7970_v32, %v7970_v32  ;;  %v1058_v40 = vadd.f32 %v1057_v26, %v825_v61  ;;  %v828_v19 = vmul.f32 %v7971_v62, %v7971_v62  ;;  %v4785_v25 = vld [vmem:[%s3964_s21 + $0xf0] sm:$0xff]  ;;  %v7978_v26 = vld [vmem:[#allocation43_spill] sm:$0xff]  ;;  %v7980_v58 = vld [vmem:[#allocation18_spill] sm:$0xff] }
  0x9d   : > { %7967 = vst [vmem:[#allocation137_spill] sm:$0xff] %v4715_v53  ;;  %v833_v34 = vmul.f32 %v7972_v23, %v7972_v23  ;;  %v1066_v50 = vadd.f32 %v831_v10, %v830_v46  ;;  %v816_v5 = vmul.f32 %v4771_v20, %v4771_v20  ;;  %v1043_v31 = vadd.f32 %v1042_v2, %v814_v16  ;;  %v4794_v10 = vld [vmem:[%s3964_s21 + $0xf8] sm:$0xff] }
  0x9e   : > { %7973 = vst [vmem:[#allocation11_spill] sm:$0xff] %v4771_v20  ;;  %v1059_v45 = vadd.f32 %v1058_v40, %v826_v33  ;;  %v836_v56 = vmul.f32 %v7974_v29, %v7974_v29  ;;  %v817_v55 = vmul.f32 %v4778_v11, %v4778_v11  ;;  %v1025_v42 = vadd.f32 %v1024_v18, %v800_v27 }
  0x9f   : > { %7975 = vst [vmem:[#allocation138_spill] sm:$0xff] %v4778_v11  ;;  %v834_v17 = vmul.f32 %v7976_v7, %v7976_v7  ;;  %v1067_v61 = vadd.f32 %v1066_v50, %v832_v36  ;;  %v818_v16 = vmul.f32 %v4785_v25, %v4785_v25  ;;  %1019 = vadd.xlane.f32.xlu2 %v4639_v43  ;;  %v1062_v33 = vsel %vm504_vm0, %v829_v57, 0.0  ;;  %v7981_v50 = vld [vmem:[#allocation19_spill] sm:$0xff] }
  0xa0   : > { %7977 = vst [vmem:[#allocation139_spill] sm:$0xff] %v4785_v25  ;;  %v1060_v2 = vadd.f32 %v1059_v45, %v827_v22  ;;  %v835_v46 = vmul.f32 %v7978_v26, %v7978_v26  ;;  %v819_v27 = vmul.f32 %v4794_v10, %v4794_v10  ;;  %v1048_v18 = vadd.f32 %v817_v55, %v816_v5  ;;  %v4804_v45 = vld [vmem:[%s3964_s21 + $0x100] sm:$0xff]  ;;  %v7983_v26 = vld [vmem:[#allocation20_spill] sm:$0xff] }
  0xa1   : > { %7979 = vst [vmem:[#allocation140_spill] sm:$0xff] %v4794_v10  ;;  %v1068_v36 = vadd.f32 %v1067_v61, %v833_v34  ;;  %v844_v40 = vmul.f32 %v7980_v58, %v7980_v58  ;;  %v845_v43 = vmul.f32 %v7981_v50, %v7981_v50  ;;  %786 = vadd.xlane.f32.xlu1 %v785_v35  ;;  %v1071_v57 = vsel %vm504_vm0, %v836_v56, 0.0  ;;  %v4811_v55 = vld [vmem:[%s3964_s21 + $0x110] sm:$0xff]  ;;  %v4816_v35 = vld [vmem:[%s3964_s21 + $0x108] sm:$0xff] }
  0xa2   : > { %v1045_v22 = vadd.f32 %v1044_v41, %v1043_v31  ;;  %7982 = vst [vmem:[#allocation141_spill] sm:$0xff] %v4804_v45  ;;  %v820_v29 = vmul.f32 %v4804_v45, %v4804_v45  ;;  %v846_v7 = vmul.f32 %v7983_v26, %v7983_v26  ;;  %v1027_v34 = vadd.f32 %v1026_v12, %v1025_v42  ;;  %v7986_v31 = vld [vmem:[#allocation22_spill] sm:$0xff] }
  0xa3   : > { %v1069_v5 = vadd.f32 %v1068_v36, %v834_v17  ;;  %7984 = vst [vmem:[#allocation142_spill] sm:$0xff] %v4811_v55  ;;  %v822_v61 = vmul.f32 %v4811_v55, %v4811_v55  ;;  %v1049_v23 = vadd.f32 %v1048_v18, %v818_v16  ;;  %v821_v41 = vmul.f32 %v4816_v35, %v4816_v35  ;;  %v7988_v17 = vld [vmem:[#allocation30_spill] sm:$0xff] }
  0xa4   : > { %7985 = vst [vmem:[#allocation143_spill] sm:$0xff] %v4816_v35  ;;  %v847_v56 = vmul.f32 %v7986_v31, %v7986_v31  ;;  %v1084_v9 = vadd.f32 %v845_v43, %v844_v40  ;;  %v851_v54 = vmul.f32 %v7987_v0, %v7987_v0  ;;  %777 = vadd.xlane.f32.xlu0 %v776_v4  ;;  %v7992_v4 = vld [vmem:[#allocation27_spill] sm:$0xff]  ;;  %v8002_v35 = vld [vmem:[#allocation34_spill] sm:$0xff] }
  0xa5   : > { %v1061_v12 = vadd.f32 %v1060_v2, %v828_v19  ;;  %v1050_v42 = vadd.f32 %v1049_v23, %v819_v27  ;;  %v850_v36 = vmul.f32 %v7988_v17, %v7988_v17  ;;  %v852_v16 = vmul.f32 %v7989_v60, %v7989_v60  ;;  %v7993_v23 = vld [vmem:[#allocation51_spill] sm:$0xff] }
  0xa6   : > { %v1070_v18 = vadd.f32 %v1069_v5, %v835_v46  ;;  %v848_v59 = vmul.f32 %v7990_v8, %v7990_v8  ;;  %v1085_v49 = vadd.f32 %v1084_v9, %v846_v7  ;;  %v853_v40 = vmul.f32 %v7991_v44, %v7991_v44  ;;  %v7994_v46 = vld [vmem:[#allocation23_spill] sm:$0xff]  ;;  %v7997_v44 = vld [vmem:[#allocation26_spill] sm:$0xff] }
  0xa7   : > { %v1051_v43 = vadd.f32 %v1050_v42, %v820_v29  ;;  %v1053_v0 = vsel %vm504_vm0, %v822_v61, 0.0  ;;  %v849_v19 = vmul.f32 %v7992_v4, %v7992_v4  ;;  %v854_v2 = vmul.f32 %v7993_v23, %v7993_v23  ;;  %1046 = vadd.xlane.f32.xlu2 %v1045_v22  ;;  %v7996_v42 = vld [vmem:[#allocation57_spill] sm:$0xff]  ;;  %v7999_v23 = vld [vmem:[#allocation59_spill] sm:$0xff] }
  0xa8   : > { %v1086_v27 = vadd.f32 %v1085_v49, %v847_v56  ;;  %v1093_v60 = vadd.f32 %v852_v16, %v851_v54  ;;  %v837_v5 = vmul.f32 %v7994_v46, %v7994_v46  ;;  %v838_v9 = vmul.f32 %v7995_v38, %v7995_v38  ;;  %v7998_v54 = vld [vmem:[#allocation60_spill] sm:$0xff] }
  0xa9   : > { %v1063_v7 = vadd.f32 %v1062_v33, %v1061_v12  ;;  %v1089_v29 = vsel %vm504_vm0, %v850_v36, 0.0  ;;  %v855_v61 = vmul.f32 %v7996_v42, %v7996_v42  ;;  %v839_v37 = vmul.f32 %v7997_v44, %v7997_v44  ;;  %1037 = vadd.xlane.f32.xlu1 %v4755_v52  ;;  %v8000_v33 = vld [vmem:[#allocation28_spill] sm:$0xff] }
  0xaa   : > { %v1072_v22 = vadd.f32 %v1071_v57, %v1070_v18  ;;  %v1087_v49 = vadd.f32 %v1086_v27, %v848_v59  ;;  %v857_v56 = vmul.f32 %v7998_v54, %v7998_v54  ;;  %v1094_v16 = vadd.f32 %v1093_v60, %v853_v40  ;;  %v8001_v46 = vld [vmem:[#allocation36_spill] sm:$0xff]  ;;  %v8003_v59 = vld [vmem:[#allocation37_spill] sm:$0xff]  ;;  %v8005_v54 = vld [vmem:[#allocation38_spill] sm:$0xff] }
  0xab   : > { %v856_v38 = vmul.f32 %v7999_v23, %v7999_v23  ;;  %v840_v12 = vmul.f32 %v8000_v33, %v8000_v33  ;;  %v1075_v36 = vadd.f32 %v838_v9, %v837_v5  ;;  %v865_v42 = vmul.f32 %v8001_v46, %v8001_v46  ;;  %v8004_v18 = vld [vmem:[#allocation33_spill] sm:$0xff] }
  0xac   : > { %v1052_v55 = vadd.f32 %v1051_v43, %v821_v41  ;;  %v1095_v44 = vadd.f32 %v1094_v16, %v854_v2  ;;  %v843_v52 = vmul.f32 %v8002_v35, %v8002_v35  ;;  %v866_v57 = vmul.f32 %v8003_v59, %v8003_v59  ;;  %1028 = vadd.xlane.f32.xlu0 %v1027_v34  ;;  %v8006_v41 = vld [vmem:[#allocation39_spill] sm:$0xff]  ;;  %v8007_v2 = vld [vmem:[#allocation41_spill] sm:$0xff]  ;;  %v8008_v34 = vld [vmem:[#allocation62_spill] sm:$0xff] }
  0xad   : > { %v1088_v60 = vadd.f32 %v1087_v49, %v849_v19  ;;  %v841_v40 = vmul.f32 %v8004_v18, %v8004_v18  ;;  %v1076_v27 = vadd.f32 %v1075_v36, %v839_v37  ;;  %v867_v5 = vmul.f32 %v8005_v54, %v8005_v54  ;;  %v8009_v49 = vld [vmem:[#allocation64_spill] sm:$0xff] }
  0xae   : > { %v1096_v9 = vadd.f32 %v1095_v44, %v855_v61  ;;  %v1098_v23 = vsel %vm504_vm0, %v857_v56, 0.0  ;;  %v842_v43 = vmul.f32 %v8006_v41, %v8006_v41  ;;  %v868_v16 = vmul.f32 %v8007_v2, %v8007_v2  ;;  %v8010_v56 = vld [vmem:[#allocation65_spill] sm:$0xff] }
  0xaf   : > { %v1077_v35 = vadd.f32 %v1076_v27, %v840_v12  ;;  %v1111_v33 = vadd.f32 %v866_v57, %v865_v42  ;;  %v872_v19 = vmul.f32 %v8008_v34, %v8008_v34  ;;  %v873_v37 = vmul.f32 %v8009_v49, %v8009_v49  ;;  %1073 = vadd.xlane.f32.xlu2 %v1072_v22  ;;  %v8011_v2 = vld [vmem:[#allocation45_spill] sm:$0xff]  ;;  %v8012_v57 = vld [vmem:[#allocation50_spill] sm:$0xff]  ;;  %v8013_v22 = vld [vmem:[#allocation68_spill] sm:$0xff] }
  0xb0   : > { %v1054_v36 = vadd.f32 %v1053_v0, %v1052_v55  ;;  %v1097_v44 = vadd.f32 %v1096_v9, %v856_v38  ;;  %v1080_v61 = vsel %vm504_vm0, %v843_v52, 0.0  ;;  %v874_v41 = vmul.f32 %v8010_v56, %v8010_v56  ;;  %v8014_v55 = vld [vmem:[#allocation42_spill] sm:$0xff]  ;;  %v4902_v34 = vld [vmem:[%s3964_s21 + $0x248] sm:$0xff] }
  0xb1   : > { %v1090_v18 = vadd.f32 %v1089_v29, %v1088_v60  ;;  %v1078_v54 = vadd.f32 %v1077_v35, %v841_v40  ;;  %v869_v42 = vmul.f32 %v8011_v2, %v8011_v2  ;;  %v1112_v12 = vadd.f32 %v1111_v33, %v867_v5  ;;  %1064 = vadd.xlane.f32.xlu1 %v1063_v7  ;;  %v8015_v29 = vld [vmem:[#allocation74_spill] sm:$0xff]  ;;  %v8016_v60 = vld [vmem:[#allocation79_spill] sm:$0xff]  ;;  %v4888_v33 = vld [vmem:[%s3964_s21 + $0x238] sm:$0xff] }
  0xb2   : > { %v871_v27 = vmul.f32 %v8012_v57, %v8012_v57  ;;  %v875_v0 = vmul.f32 %v8013_v22, %v8013_v22  ;;  %v1120_v38 = vadd.f32 %v873_v37, %v872_v19  ;;  %v858_v52 = vmul.f32 %v8014_v55, %v8014_v55  ;;  %8017 = vst [vmem:[#allocation144_spill] sm:$0xff] %v4888_v33  ;;  %v4893_v19 = vld [vmem:[%s3964_s21 + $0x240] sm:$0xff] }
  0xb3   : > { %v1113_v9 = vadd.f32 %v1112_v12, %v868_v16  ;;  %v876_v35 = vmul.f32 %v8015_v29, %v8015_v29  ;;  %v878_v40 = vmul.f32 %v8016_v60, %v8016_v60  ;;  %v859_v7 = vmul.f32 %v4888_v33, %v4888_v33  ;;  %8018 = vst [vmem:[#allocation145_spill] sm:$0xff] %v4893_v19  ;;  %v8019_v16 = vld [vmem:[#allocation47_spill] sm:$0xff]  ;;  %v8020_v60 = vld [vmem:[#allocation76_spill] sm:$0xff]  ;;  %v8025_v33 = vld [vmem:[#allocation54_spill] sm:$0xff] }
  0xb4   : > { %v1099_v5 = vadd.f32 %v1098_v23, %v1097_v44  ;;  %v1079_v56 = vadd.f32 %v1078_v54, %v842_v43  ;;  %v1121_v22 = vadd.f32 %v1120_v38, %v874_v41  ;;  %v860_v37 = vmul.f32 %v4893_v19, %v4893_v19  ;;  %1055 = vadd.xlane.f32.xlu0 %v1054_v36  ;;  %v8022_v43 = vld [vmem:[#allocation52_spill] sm:$0xff]  ;;  %v8023_v38 = vld [vmem:[#allocation53_spill] sm:$0xff] }
  0xb5   : > { %v870_v12 = vmul.f32 %v8019_v16, %v8019_v16  ;;  %v1114_v29 = vadd.f32 %v1113_v9, %v869_v42  ;;  %v877_v49 = vmul.f32 %v8020_v60, %v8020_v60  ;;  %8021 = vst [vmem:[#allocation146_spill] sm:$0xff] %v4902_v34  ;;  %v861_v23 = vmul.f32 %v4902_v34, %v4902_v34  ;;  %v8024_v9 = vld [vmem:[#allocation56_spill] sm:$0xff] }
  0xb6   : > { %v1122_v54 = vadd.f32 %v1121_v22, %v875_v0  ;;  %v1102_v41 = vadd.f32 %v859_v7, %v858_v52  ;;  %v886_v44 = vmul.f32 %v8022_v43, %v8022_v43  ;;  %v887_v36 = vmul.f32 %v8023_v38, %v8023_v38  ;;  %v4917_v0 = vld [vmem:[%s3964_s21 + $0x250] sm:$0xff]  ;;  %v8027_v38 = vld [vmem:[#allocation55_spill] sm:$0xff]  ;;  %v8028_v43 = vld [vmem:[#allocation58_spill] sm:$0xff] }
  0xb7   : > { %v1116_v19 = vsel %vm504_vm0, %v871_v27, 0.0  ;;  %v1125_v42 = vsel %vm504_vm0, %v878_v40, 0.0  ;;  %v864_v60 = vmul.f32 %v8024_v9, %v8024_v9  ;;  %v888_v55 = vmul.f32 %v8025_v33, %v8025_v33  ;;  %1100 = vadd.xlane.f32.xlu2 %v1099_v5  ;;  %8026 = vst [vmem:[#allocation147_spill] sm:$0xff] %v4917_v0  ;;  %v8029_v9 = vld [vmem:[#allocation78_spill] sm:$0xff]  ;;  %v8030_v5 = vld [vmem:[#allocation80_spill] sm:$0xff] }
  0xb8   : > { %v1081_v34 = vadd.f32 %v1080_v61, %v1079_v56  ;;  %v1123_v22 = vadd.f32 %v1122_v54, %v876_v35  ;;  %v862_v52 = vmul.f32 %v4917_v0, %v4917_v0  ;;  %v1103_v7 = vadd.f32 %v1102_v41, %v860_v37  ;;  %v8031_v41 = vld [vmem:[#allocation61_spill] sm:$0xff] }
  0xb9   : > { %v863_v27 = vmul.f32 %v8027_v38, %v8027_v38  ;;  %v889_v40 = vmul.f32 %v8028_v43, %v8028_v43  ;;  %v1138_v57 = vadd.f32 %v887_v36, %v886_v44  ;;  %v893_v16 = vmul.f32 %v8029_v9, %v8029_v9  ;;  %1091 = vadd.xlane.f32.xlu1 %v1090_v18  ;;  %v8032_v43 = vld [vmem:[#allocation81_spill] sm:$0xff]  ;;  %v8033_v9 = vld [vmem:[#allocation63_spill] sm:$0xff] }
  0xba   : > { %v1115_v61 = vadd.f32 %v1114_v29, %v870_v12  ;;  %v1124_v56 = vadd.f32 %v1123_v22, %v877_v49  ;;  %v1104_v35 = vadd.f32 %v1103_v7, %v861_v23  ;;  %v894_v54 = vmul.f32 %v8030_v5, %v8030_v5  ;;  %v8034_v29 = vld [vmem:[#allocation83_spill] sm:$0xff]  ;;  %v4939_v22 = vld [vmem:[%s3964_s21 + $0x2d8] sm:$0xff] }
  0xbb   : > { %v1107_v37 = vsel %vm504_vm0, %v864_v60, 0.0  ;;  %v890_v38 = vmul.f32 %v8031_v41, %v8031_v41  ;;  %v1139_v0 = vadd.f32 %v1138_v57, %v888_v55  ;;  %v895_v44 = vmul.f32 %v8032_v43, %v8032_v43  ;;  %8035 = vst [vmem:[#allocation148_spill] sm:$0xff] %v4939_v22  ;;  %v4944_v55 = vld [vmem:[%s3964_s21 + $0x2e0] sm:$0xff]  ;;  %v8073_v41 = vld [vmem:[#allocation103_spill] sm:$0xff] }
  0xbc   : > { %v1126_v36 = vadd.f32 %v1125_v42, %v1124_v56  ;;  %v1105_v18 = vadd.f32 %v1104_v35, %v862_v52  ;;  %v891_v49 = vmul.f32 %v8033_v9, %v8033_v9  ;;  %v896_v12 = vmul.f32 %v8034_v29, %v8034_v29  ;;  %1082 = vadd.xlane.f32.xlu0 %v1081_v34  ;;  %v8037_v56 = vld [vmem:[#allocation66_spill] sm:$0xff]  ;;  %v4951_v29 = vld [vmem:[%s3964_s21 + $0x2e8] sm:$0xff] }
  0xbd   : > { %v1140_v23 = vadd.f32 %v1139_v0, %v889_v40  ;;  %v1147_v60 = vadd.f32 %v894_v54, %v893_v16  ;;  %v879_v57 = vmul.f32 %v4939_v22, %v4939_v22  ;;  %8036 = vst [vmem:[#allocation149_spill] sm:$0xff] %v4944_v55  ;;  %v880_v42 = vmul.f32 %v4944_v55, %v4944_v55  ;;  %v8039_v0 = vld [vmem:[#allocation87_spill] sm:$0xff]  ;;  %v8040_v54 = vld [vmem:[#allocation92_spill] sm:$0xff] }
  0xbe   : > { %v1117_v52 = vadd.f32 %v1116_v19, %v1115_v61  ;;  %v1106_v7 = vadd.f32 %v1105_v18, %v863_v27  ;;  %v892_v35 = vmul.f32 %v8037_v56, %v8037_v56  ;;  %8038 = vst [vmem:[#allocation150_spill] sm:$0xff] %v4951_v29  ;;  %v881_v34 = vmul.f32 %v4951_v29, %v4951_v29  ;;  %v4960_v55 = vld [vmem:[%s3964_s21 + $0x2f0] sm:$0xff]  ;;  %v8042_v61 = vld [vmem:[#allocation69_spill] sm:$0xff]  ;;  %v8046_v9 = vld [vmem:[#allocation71_spill] sm:$0xff] }
  0xbf   : > { %v1141_v16 = vadd.f32 %v1140_v23, %v890_v38  ;;  %v897_v40 = vmul.f32 %v8039_v0, %v8039_v0  ;;  %v899_v43 = vmul.f32 %v8040_v54, %v8040_v54  ;;  %v1148_v5 = vadd.f32 %v1147_v60, %v895_v44  ;;  %1127 = vadd.xlane.f32.xlu2 %v1126_v36  ;;  %v8043_v29 = vld [vmem:[#allocation89_spill] sm:$0xff]  ;;  %v8044_v0 = vld [vmem:[#allocation70_spill] sm:$0xff]  ;;  %v8045_v36 = vld [vmem:[#allocation67_spill] sm:$0xff] }
  0xc0   : > { %8041 = vst [vmem:[#allocation151_spill] sm:$0xff] %v4960_v55  ;;  %v882_v19 = vmul.f32 %v4960_v55, %v4960_v55  ;;  %v1129_v27 = vadd.f32 %v880_v42, %v879_v57  ;;  %v907_v18 = vmul.f32 %v8042_v61, %v8042_v61  ;;  %v1108_v22 = vadd.f32 %v1107_v37, %v1106_v7  ;;  %v4974_v42 = vpop.xlane.xlu2 %543  ;;  %v8048_v55 = vld [vmem:[#allocation72_spill] sm:$0xff]  ;;  %v8052_v61 = vld [vmem:[#allocation77_spill] sm:$0xff] }
  0xc1   : > { %v898_v38 = vmul.f32 %v8043_v29, %v8043_v29  ;;  %v1149_v23 = vadd.f32 %v1148_v5, %v896_v12  ;;  %v908_v56 = vmul.f32 %v8044_v0, %v8044_v0  ;;  %1118 = vadd.xlane.f32.xlu1 %v1117_v52  ;;  %v1142_v44 = vadd.f32 %v1141_v16, %v891_v49  ;;  %v8047_v5 = vld [vmem:[#allocation73_spill] sm:$0xff]  ;;  %v8049_v16 = vld [vmem:[#allocation75_spill] sm:$0xff] }
  0xc2   : > { %v883_v60 = vmul.f32 %v8045_v36, %v8045_v36  ;;  %v1130_v54 = vadd.f32 %v1129_v27, %v881_v34  ;;  %v909_v57 = vmul.f32 %v8046_v9, %v8046_v9  ;;  %v1143_v37 = vsel %vm504_vm0, %v892_v35, 0.0  ;;  %v4984_v36 = vpop.xlane.xlu1 %525  ;;  %v8050_v0 = vld [vmem:[#allocation91_spill] sm:$0xff] }
  0xc3   : > { %v1150_v7 = vadd.f32 %v1149_v23, %v897_v40  ;;  %v1152_v29 = vsel %vm504_vm0, %v899_v43, 0.0  ;;  %v885_v12 = vmul.f32 %v8047_v5, %v8047_v5  ;;  %v884_v49 = vmul.f32 %v8048_v55, %v8048_v55  ;;  %v8051_v40 = vld [vmem:[#allocation93_spill] sm:$0xff] }
  0xc4   : > { %v1131_v52 = vadd.f32 %v1130_v54, %v882_v19  ;;  %v910_v34 = vmul.f32 %v8049_v16, %v8049_v16  ;;  %v1165_v27 = vadd.f32 %v908_v56, %v907_v18  ;;  %1109 = vadd.xlane.f32.xlu0 %v1108_v22  ;;  %v914_v35 = vmul.f32 %v8050_v0, %v8050_v0  ;;  %v8053_v56 = vld [vmem:[#allocation86_spill] sm:$0xff]  ;;  %v4997_v0 = vpop.xlane.xlu0 %507 }
  0xc5   : > { %v1151_v9 = vadd.f32 %v1150_v7, %v898_v38  ;;  %v915_v43 = vmul.f32 %v8051_v40, %v8051_v40  ;;  %v1144_v23 = vadd.f32 %v1143_v37, %v1142_v44  ;;  %v911_v54 = vmul.f32 %v8052_v61, %v8052_v61  ;;  %v8054_v38 = vld [vmem:[#allocation94_spill] sm:$0xff]  ;;  %v8056_v37 = vld [vmem:[#allocation96_spill] sm:$0xff] }
  0xc6   : > { %v1132_v5 = vadd.f32 %v1131_v52, %v883_v60  ;;  %v1166_v19 = vadd.f32 %v1165_v27, %v909_v57  ;;  %v1134_v22 = vsel %vm504_vm0, %v885_v12, 0.0  ;;  %v913_v18 = vmul.f32 %v8053_v56, %v8053_v56  ;;  %v8055_v16 = vld [vmem:[#allocation82_spill] sm:$0xff]  ;;  %v5009_v52 = vld [vmem:[%s3964_s21 + $0x388] sm:$0xff]  ;;  %v8061_v56 = vld [vmem:[#allocation100_spill] sm:$0xff] }
  0xc7   : > { %v1153_v55 = vadd.f32 %v1152_v29, %v1151_v9  ;;  %v916_v7 = vmul.f32 %v8054_v38, %v8054_v38  ;;  %v912_v44 = vmul.f32 %v8055_v16, %v8055_v16  ;;  %v917_v9 = vmul.f32 %v8056_v37, %v8056_v37  ;;  %v5004_v57 = vld [vmem:[%s3964_s21 + $0x380] sm:$0xff]  ;;  %8058 = vst [vmem:[#allocation153_spill] sm:$0xff] %v5009_v52  ;;  %v5019_v37 = vld [vmem:[%s3964_s21 + $0x390] sm:$0xff] }
  0xc8   : > { %v1133_v40 = vadd.f32 %v1132_v5, %v884_v49  ;;  %v1167_v60 = vadd.f32 %v1166_v19, %v910_v34  ;;  %v1174_v29 = vadd.f32 %v915_v43, %v914_v35  ;;  %8057 = vst [vmem:[#allocation152_spill] sm:$0xff] %v5004_v57  ;;  %v900_v12 = vmul.f32 %v5004_v57, %v5004_v57  ;;  %v5013_v34 = vpop.xlane.xlu2 %552  ;;  %v8059_v19 = vld [vmem:[#allocation98_spill] sm:$0xff] }
  0xc9   : > { %1154 = vadd.xlane.f32.xlu2 %v1153_v55  ;;  %v901_v5 = vmul.f32 %v5009_v52, %v5009_v52  ;;  %1145 = vadd.xlane.f32.xlu1 %v1144_v23  ;;  %v1170_v55 = vsel %vm504_vm0, %v913_v18, 0.0  ;;  %v918_v35 = vmul.f32 %v8059_v19, %v8059_v19  ;;  %8060 = vst [vmem:[#allocation154_spill] sm:$0xff] %v5019_v37  ;;  %v8062_v23 = vld [vmem:[#allocation102_spill] sm:$0xff]  ;;  %v8064_v19 = vld [vmem:[#allocation84_spill] sm:$0xff] }
  0xca   : > { %v1135_v49 = vadd.f32 %v1134_v22, %v1133_v40  ;;  %v1168_v27 = vadd.f32 %v1167_v60, %v911_v54  ;;  %v1175_v43 = vadd.f32 %v1174_v29, %v916_v7  ;;  %v902_v38 = vmul.f32 %v5019_v37, %v5019_v37  ;;  %v5028_v22 = vld [vmem:[%s3964_s21 + $0x398] sm:$0xff]  ;;  %v5032_v7 = vpop.xlane.xlu1 %534  ;;  %v5039_v52 = vld [vmem:[%s3964_s21 + $0x3a0] sm:$0xff] }
  0xcb   : > { %v919_v40 = vmul.f32 %v8061_v56, %v8061_v56  ;;  %v920_v54 = vmul.f32 %v8062_v23, %v8062_v23  ;;  %8063 = vst [vmem:[#allocation155_spill] sm:$0xff] %v5028_v22  ;;  %v903_v18 = vmul.f32 %v5028_v22, %v5028_v22  ;;  %v1156_v29 = vadd.f32 %v901_v5, %v900_v12 }
  0xcc   : > { %v1169_v57 = vadd.f32 %v1168_v27, %v912_v44  ;;  %1136 = vadd.xlane.f32.xlu0 %v1135_v49  ;;  %v1176_v60 = vadd.f32 %v1175_v43, %v917_v9  ;;  %v928_v44 = vmul.f32 %v8064_v19, %v8064_v19  ;;  %v8065_v27 = vld [vmem:[#allocation85_spill] sm:$0xff]  ;;  %8066 = vst [vmem:[#allocation156_spill] sm:$0xff] %v5039_v52  ;;  %v5044_v49 = vld [vmem:[%s3964_s21 + $0x470] sm:$0xff]  ;;  %v5048_v12 = vpop.xlane.xlu0 %516  ;;  %v5052_v43 = vld [vmem:[%s3964_s21 + $0x3a8] sm:$0xff] }
  0xcd   : > { %v929_v56 = vmul.f32 %v8065_v27, %v8065_v27  ;;  %v904_v22 = vmul.f32 %v5039_v52, %v5039_v52  ;;  %v1157_v16 = vadd.f32 %v1156_v29, %v902_v38  ;;  %8067 = vst [vmem:[#allocation157_spill] sm:$0xff] %v5044_v49  ;;  %v930_v9 = vmul.f32 %v5044_v49, %v5044_v49  ;;  %v5059_v38 = vld [vmem:[%s3964_s21 + $0x478] sm:$0xff]  ;;  %v8071_v27 = vld [vmem:[#allocation90_spill] sm:$0xff] }
  0xce   : > { %v1171_v37 = vadd.f32 %v1170_v55, %v1169_v57  ;;  %v1177_v23 = vadd.f32 %v1176_v60, %v918_v35  ;;  %v1179_v5 = vsel %vm504_vm0, %v920_v54, 0.0  ;;  %8068 = vst [vmem:[#allocation158_spill] sm:$0xff] %v5052_v43  ;;  %v905_v57 = vmul.f32 %v5052_v43, %v5052_v43  ;;  %v8069_v55 = vld [vmem:[#allocation88_spill] sm:$0xff]  ;;  %v8072_v19 = vld [vmem:[#allocation101_spill] sm:$0xff] }
  0xcf   : > { %v906_v35 = vmul.f32 %v8069_v55, %v8069_v55  ;;  %v1158_v52 = vadd.f32 %v1157_v16, %v903_v18  ;;  %8070 = vst [vmem:[#allocation159_spill] sm:$0xff] %v5059_v38  ;;  %v931_v29 = vmul.f32 %v5059_v38, %v5059_v38  ;;  %v1192_v49 = vadd.f32 %v929_v56, %v928_v44  ;;  %v8074_v18 = vld [vmem:[#allocation104_spill] sm:$0xff]  ;;  %v8075_v44 = vld [vmem:[#allocation95_spill] sm:$0xff]  ;;  %v8076_v38 = vld [vmem:[#allocation97_spill] sm:$0xff] }
  0xd0   : > { %v1178_v60 = vadd.f32 %v1177_v23, %v919_v40  ;;  %v932_v54 = vmul.f32 %v8071_v27, %v8071_v27  ;;  %v935_v61 = vmul.f32 %v8072_v19, %v8072_v19  ;;  %v936_v43 = vmul.f32 %v8073_v41, %v8073_v41  ;;  %v5069_v40 = vpop.xlane.xlu2 %579  ;;  %v8080_v41 = vld [vmem:[#allocation108_spill] sm:$0xff] }
  0xd1   : > { %1172 = vadd.xlane.f32.xlu1 %v1171_v37  ;;  %v1159_v16 = vadd.f32 %v1158_v52, %v904_v22  ;;  %v1193_v23 = vadd.f32 %v1192_v49, %v930_v9  ;;  %v937_v56 = vmul.f32 %v8074_v18, %v8074_v18  ;;  %v1161_v37 = vsel %vm504_vm0, %v906_v35, 0.0  ;;  %v8077_v22 = vld [vmem:[#allocation106_spill] sm:$0xff]  ;;  %v5088_v18 = vld [vmem:[%s3964_s21 + $0x430] sm:$0xff] }
  0xd2   : > { %v1180_v55 = vadd.f32 %v1179_v5, %v1178_v60  ;;  %v933_v27 = vmul.f32 %v8075_v44, %v8075_v44  ;;  %v934_v19 = vmul.f32 %v8076_v38, %v8076_v38  ;;  %v5078_v5 = vpop.xlane.xlu1 %570  ;;  %v938_v49 = vmul.f32 %v8077_v22, %v8077_v22  ;;  %v5083_v60 = vld [vmem:[%s3964_s21 + $0x428] sm:$0xff]  ;;  %8079 = vst [vmem:[#allocation161_spill] sm:$0xff] %v5088_v18  ;;  %v8081_v22 = vld [vmem:[#allocation109_spill] sm:$0xff] }
  0xd3   : > { %v1160_v33 = vadd.f32 %v1159_v16, %v905_v57  ;;  %v1194_v52 = vadd.f32 %v1193_v23, %v931_v29  ;;  %v1201_v9 = vadd.f32 %v936_v43, %v935_v61  ;;  %8078 = vst [vmem:[#allocation160_spill] sm:$0xff] %v5083_v60  ;;  %v921_v35 = vmul.f32 %v5083_v60, %v5083_v60  ;;  %v5100_v38 = vld [vmem:[%s3964_s21 + $0x438] sm:$0xff] }
  0xd4   : > { %1181 = vadd.xlane.f32.xlu2 %v1180_v55  ;;  %v922_v55 = vmul.f32 %v5088_v18, %v5088_v18  ;;  %v939_v29 = vmul.f32 %v8080_v41, %v8080_v41  ;;  %v5094_v61 = vpop.xlane.xlu0 %561  ;;  %v1197_v43 = vsel %vm504_vm0, %v934_v19, 0.0  ;;  %v941_v60 = vmul.f32 %v8081_v22, %v8081_v22  ;;  %8082 = vst [vmem:[#allocation162_spill] sm:$0xff] %v5100_v38  ;;  %v5112_v22 = vld [vmem:[%s3964_s21 + $0x508] sm:$0xff] }
  0xd5   : > { %v1162_v57 = vadd.f32 %v1161_v37, %v1160_v33  ;;  %v1195_v16 = vadd.f32 %v1194_v52, %v932_v54  ;;  %v1202_v23 = vadd.f32 %v1201_v9, %v937_v56  ;;  %v923_v18 = vmul.f32 %v5100_v38, %v5100_v38  ;;  %v8083_v54 = vld [vmem:[#allocation110_spill] sm:$0xff]  ;;  %8085 = vst [vmem:[#allocation164_spill] sm:$0xff] %v5112_v22  ;;  %v5117_v38 = vld [vmem:[%s3964_s21 + $0x510] sm:$0xff] }
  0xd6   : > { %v940_v37 = vmul.f32 %v8083_v54, %v8083_v54  ;;  %v5107_v52 = vld [vmem:[%s3964_s21 + $0x440] sm:$0xff]  ;;  %v1183_v9 = vadd.f32 %v922_v55, %v921_v35  ;;  %v949_v41 = vmul.f32 %v5112_v22, %v5112_v22  ;;  %8086 = vst [vmem:[#allocation165_spill] sm:$0xff] %v5117_v38  ;;  %v5125_v54 = vld [vmem:[%s3964_s21 + $0x448] sm:$0xff] }
  0xd7   : > { %1163 = vadd.xlane.f32.xlu0 %v1162_v57  ;;  %v1196_v33 = vadd.f32 %v1195_v16, %v933_v27  ;;  %v1203_v56 = vadd.f32 %v1202_v23, %v938_v49  ;;  %8084 = vst [vmem:[#allocation163_spill] sm:$0xff] %v5107_v52  ;;  %v924_v19 = vmul.f32 %v5107_v52, %v5107_v52  ;;  %v1206_v23 = vsel %vm504_vm0, %v941_v60, 0.0  ;;  %v5130_v52 = vld [vmem:[%s3964_s21 + $0x518] sm:$0xff]  ;;  %v5139_v60 = vld [vmem:[%s3964_s21 + $0x450] sm:$0xff] }
  0xd8   : > { %v950_v27 = vmul.f32 %v5117_v38, %v5117_v38  ;;  %v5121_v16 = vpop.xlane.xlu2 %606  ;;  %8087 = vst [vmem:[#allocation166_spill] sm:$0xff] %v5125_v54  ;;  %v925_v35 = vmul.f32 %v5125_v54, %v5125_v54  ;;  %v1184_v55 = vadd.f32 %v1183_v9, %v923_v18  ;;  %v951_v22 = vmul.f32 %v5130_v52, %v5130_v52  ;;  %v5144_v18 = vld [vmem:[%s3964_s21 + $0x520] sm:$0xff] }
  0xd9   : > { %v1198_v57 = vadd.f32 %v1197_v43, %v1196_v33  ;;  %v1204_v49 = vadd.f32 %v1203_v56, %v939_v29  ;;  %8088 = vst [vmem:[#allocation167_spill] sm:$0xff] %v5130_v52  ;;  %v8089_v33 = vld [vmem:[#allocation99_spill] sm:$0xff]  ;;  %v926_v38 = vmul.f32 %v5139_v60, %v5139_v60  ;;  %v952_v9 = vmul.f32 %v5144_v18, %v5144_v18 }
  0xda   : > { %v927_v29 = vmul.f32 %v8089_v33, %v8089_v33  ;;  %v5136_v56 = vpop.xlane.xlu1 %597  ;;  %8090 = vst [vmem:[#allocation168_spill] sm:$0xff] %v5139_v60  ;;  %v1185_v54 = vadd.f32 %v1184_v55, %v924_v19  ;;  %v1219_v52 = vadd.f32 %v950_v27, %v949_v41  ;;  %v5155_v60 = vld [vmem:[%s3964_s21 + $0x528] sm:$0xff]  ;;  %v958_v41 = vmul.f32 %v4568_v14, %v4568_v14 }
  0xdb   : > { %1199 = vadd.xlane.f32.xlu1 %v1198_v57  ;;  %v1205_v43 = vadd.f32 %v1204_v49, %v940_v37  ;;  %8091 = vst [vmem:[#allocation169_spill] sm:$0xff] %v5144_v18  ;;  %v8092_v57 = vld [vmem:[#allocation111_spill] sm:$0xff]  ;;  %v8093_v49 = vld [vmem:[#allocation113_spill] sm:$0xff]  ;;  %v953_v19 = vmul.f32 %v5155_v60, %v5155_v60  ;;  %v959_v18 = vmul.f32 %v4573_v39, %v4573_v39 }
  0xdc   : > { %v956_v37 = vmul.f32 %v8092_v57, %v8092_v57  ;;  %v957_v33 = vmul.f32 %v8093_v49, %v8093_v49  ;;  %v1186_v2 = vadd.f32 %v1185_v54, %v925_v35  ;;  %v5152_v59 = vpop.xlane.xlu0 %588  ;;  %8094 = vst [vmem:[#allocation170_spill] sm:$0xff] %v5155_v60  ;;  %v1220_v55 = vadd.f32 %v1219_v52, %v951_v22  ;;  %v8096_v54 = vld [vmem:[#allocation105_spill] sm:$0xff]  ;;  %v5171_v52 = vld [vmem:[%s3964_s21 + $0x4d0] sm:$0xff] }
  0xdd   : > { %v1207_v44 = vadd.f32 %v1206_v23, %v1205_v43  ;;  %v1188_v27 = vsel %vm504_vm0, %v927_v29, 0.0  ;;  %v8095_v23 = vld [vmem:[#allocation107_spill] sm:$0xff]  ;;  %v955_v35 = vmul.f32 %v8096_v54, %v8096_v54  ;;  %v960_v22 = vmul.f32 %v4589_v15, %v4589_v15  ;;  %8097 = vst [vmem:[#allocation171_spill] sm:$0xff] %v5171_v52  ;;  %v5176_v29 = vld [vmem:[%s3964_s21 + $0x4d8] sm:$0xff]  ;;  %v8109_v54 = vld [vmem:[#allocation122_spill] sm:$0xff] }
  0xde   : > { %v954_v43 = vmul.f32 %v8095_v23, %v8095_v23  ;;  %v1187_v49 = vadd.f32 %v1186_v2, %v926_v38  ;;  %v1221_v57 = vadd.f32 %v1220_v55, %v952_v9  ;;  %v1228_v60 = vadd.f32 %v957_v33, %v956_v37  ;;  %8098 = vst [vmem:[#allocation172_spill] sm:$0xff] %v5176_v29  ;;  %v5183_v37 = vld [vmem:[%s3964_s21 + $0x4e0] sm:$0xff] }
  0xdf   : > { %1208 = vadd.xlane.f32.xlu2 %v1207_v44  ;;  %v942_v44 = vmul.f32 %v5171_v52, %v5171_v52  ;;  %v943_v14 = vmul.f32 %v5176_v29, %v5176_v29  ;;  %8099 = vst [vmem:[#allocation173_spill] sm:$0xff] %v5183_v37  ;;  %v944_v55 = vmul.f32 %v5183_v37, %v5183_v37  ;;  %v1224_v15 = vsel %vm504_vm0, %v955_v35, 0.0 }
  0xe0   : > { %v5180_v2 = vpop.xlane.xlu2 %633  ;;  %v1189_v38 = vadd.f32 %v1188_v27, %v1187_v49  ;;  %v1222_v9 = vadd.f32 %v1221_v57, %v953_v19  ;;  %v1229_v33 = vadd.f32 %v1228_v60, %v958_v41  ;;  %v961_v39 = vmul.f32 %v4603_v51, %v4603_v51  ;;  %v5195_v49 = vld [vmem:[%s3964_s21 + $0x4e8] sm:$0xff]  ;;  %v5200_v27 = vld [vmem:[%s3964_s21 + $0x5b0] sm:$0xff] }
  0xe1   : > { %v962_v29 = vmul.f32 %v4592_v30, %v4592_v30  ;;  %8100 = vst [vmem:[#allocation174_spill] sm:$0xff] %v5195_v49  ;;  %v945_v19 = vmul.f32 %v5195_v49, %v5195_v49  ;;  %v1210_v41 = vadd.f32 %v943_v14, %v942_v44  ;;  %v970_v35 = vmul.f32 %v5200_v27, %v5200_v27  ;;  %v5205_v30 = vld [vmem:[%s3964_s21 + $0x5b8] sm:$0xff]  ;;  %v5218_v49 = vld [vmem:[%s3964_s21 + $0x500] sm:$0xff] }
  0xe2   : > { %v5192_v52 = vpop.xlane.xlu1 %624  ;;  %1190 = vadd.xlane.f32.xlu0 %v1189_v38  ;;  %v1223_v57 = vadd.f32 %v1222_v9, %v954_v43  ;;  %v1230_v60 = vadd.f32 %v1229_v33, %v959_v18  ;;  %8101 = vst [vmem:[#allocation175_spill] sm:$0xff] %v5200_v27  ;;  %v971_v43 = vmul.f32 %v5205_v30, %v5205_v30  ;;  %v5210_v9 = vld [vmem:[%s3964_s21 + $0x4f0] sm:$0xff]  ;;  %v5223_v27 = vld [vmem:[%s3964_s21 + $0x5c0] sm:$0xff] }
  0xe3   : > { %8102 = vst [vmem:[#allocation176_spill] sm:$0xff] %v5205_v30  ;;  %v946_v33 = vmul.f32 %v5210_v9, %v5210_v9  ;;  %v1211_v14 = vadd.f32 %v1210_v41, %v944_v55  ;;  %v1233_v51 = vsel %vm504_vm0, %v962_v29, 0.0  ;;  %v948_v37 = vmul.f32 %v5218_v49, %v5218_v49  ;;  %v5233_v29 = vld [vmem:[%s3964_s21 + $0x5c8] sm:$0xff] }
  0xe4   : > { %v1225_v38 = vadd.f32 %v1224_v15, %v1223_v57  ;;  %v1231_v18 = vadd.f32 %v1230_v60, %v960_v22  ;;  %8103 = vst [vmem:[#allocation177_spill] sm:$0xff] %v5210_v9  ;;  %v5214_v44 = vpop.xlane.xlu0 %615  ;;  %v972_v15 = vmul.f32 %v5223_v27, %v5223_v27  ;;  %v5228_v57 = vld [vmem:[%s3964_s21 + $0x4f8] sm:$0xff]  ;;  %v973_v41 = vmul.f32 %v5233_v29, %v5233_v29 }
  0xe5   : > { %8104 = vst [vmem:[#allocation178_spill] sm:$0xff] %v5218_v49  ;;  %v947_v55 = vmul.f32 %v5228_v57, %v5228_v57  ;;  %v1212_v60 = vadd.f32 %v1211_v14, %v945_v19  ;;  %v1246_v49 = vadd.f32 %v971_v43, %v970_v35  ;;  %v977_v9 = vmul.f32 %v4612_v28, %v4612_v28  ;;  %v8111_v43 = vld [vmem:[#allocation112_spill] sm:$0xff] }
  0xe6   : > { %8105 = vst [vmem:[#allocation179_spill] sm:$0xff] %v5223_v27  ;;  %1226 = vadd.xlane.f32.xlu1 %v1225_v38  ;;  %v1232_v22 = vadd.f32 %v1231_v18, %v961_v39  ;;  %v8108_v18 = vld [vmem:[#allocation121_spill] sm:$0xff]  ;;  %v979_v19 = vmul.f32 %v8109_v54, %v8109_v54  ;;  %v1215_v14 = vsel %vm504_vm0, %v948_v37, 0.0  ;;  %v976_v28 = vmul.f32 %v8111_v43, %v8111_v43  ;;  %v8113_v54 = vld [vmem:[#allocation123_spill] sm:$0xff]  ;;  %v8116_v43 = vld [vmem:[#allocation124_spill] sm:$0xff] }
  0xe7   : > { %8106 = vst [vmem:[#allocation180_spill] sm:$0xff] %v5228_v57  ;;  %v1213_v39 = vadd.f32 %v1212_v60, %v946_v33  ;;  %v978_v30 = vmul.f32 %v8108_v18, %v8108_v18  ;;  %v5247_v57 = vld [vmem:[%s3964_s21 + $0x5d0] sm:$0xff]  ;;  %v5256_v60 = vld [vmem:[%s3964_s21 + $0x5d8] sm:$0xff]  ;;  %v980_v18 = vmul.f32 %v8113_v54, %v8113_v54 }
  0xe8   : > { %8107 = vst [vmem:[#allocation181_spill] sm:$0xff] %v5233_v29  ;;  %v5239_v27 = vpop.xlane.xlu2 %660  ;;  %v1234_v38 = vadd.f32 %v1233_v51, %v1232_v22  ;;  %v974_v35 = vmul.f32 %v5247_v57, %v5247_v57  ;;  %v1247_v51 = vadd.f32 %v1246_v49, %v972_v15  ;;  %v975_v37 = vmul.f32 %v5256_v60, %v5256_v60  ;;  %v5265_v49 = vld [vmem:[%s3964_s21 + $0x578] sm:$0xff] }
  0xe9   : > { %8110 = vst [vmem:[#allocation182_spill] sm:$0xff] %v5247_v57  ;;  %v1214_v22 = vadd.f32 %v1213_v39, %v947_v55  ;;  %v1255_v29 = vadd.f32 %v978_v30, %v977_v9  ;;  %v981_v57 = vmul.f32 %v4648_v63, %v4648_v63  ;;  %v963_v15 = vmul.f32 %v5265_v49, %v5265_v49  ;;  %v5270_v55 = vld [vmem:[%s3964_s21 + $0x580] sm:$0xff] }
  0xea   : > { %v5253_v33 = vpop.xlane.xlu1 %651  ;;  %1235 = vadd.xlane.f32.xlu2 %v1234_v38  ;;  %8112 = vst [vmem:[#allocation183_spill] sm:$0xff] %v5256_v60  ;;  %v1248_v23 = vadd.f32 %v1247_v51, %v973_v41  ;;  %v964_v38 = vmul.f32 %v5270_v55, %v5270_v55  ;;  %v983_v30 = vmul.f32 %v8116_v43, %v8116_v43  ;;  %v5277_v41 = vld [vmem:[%s3964_s21 + $0x588] sm:$0xff]  ;;  %v5287_v43 = vld [vmem:[%s3964_s21 + $0x590] sm:$0xff] }
  0xeb   : > { %8114 = vst [vmem:[#allocation184_spill] sm:$0xff] %v5265_v49  ;;  %v1216_v39 = vadd.f32 %v1215_v14, %v1214_v22  ;;  %v1256_v9 = vadd.f32 %v1255_v29, %v979_v19  ;;  %v965_v51 = vmul.f32 %v5277_v41, %v5277_v41  ;;  %v1251_v49 = vsel %vm504_vm0, %v976_v28, 0.0 }
  0xec   : > { %8115 = vst [vmem:[#allocation185_spill] sm:$0xff] %v5270_v55  ;;  %v5281_v63 = vpop.xlane.xlu0 %642  ;;  %v1249_v54 = vadd.f32 %v1248_v23, %v974_v35  ;;  %v982_v14 = vmul.f32 %v4691_v47, %v4691_v47  ;;  %v966_v29 = vmul.f32 %v5287_v43, %v5287_v43  ;;  %v1237_v19 = vadd.f32 %v964_v38, %v963_v15  ;;  %v5292_v55 = vld [vmem:[%s3964_s21 + $0x658] sm:$0xff]  ;;  %v5310_v38 = vld [vmem:[%s3964_s21 + $0x660] sm:$0xff] }
  0xed   : > { %8117 = vst [vmem:[#allocation186_spill] sm:$0xff] %v5277_v41  ;;  %1217 = vadd.xlane.f32.xlu0 %v1216_v39  ;;  %v1257_v22 = vadd.f32 %v1256_v9, %v980_v18  ;;  %v991_v28 = vmul.f32 %v5292_v55, %v5292_v55  ;;  %v1260_v18 = vsel %vm504_vm0, %v983_v30, 0.0  ;;  %v5300_v39 = vld [vmem:[%s3964_s21 + $0x598] sm:$0xff] }
  0xee   : > { %8118 = vst [vmem:[#allocation187_spill] sm:$0xff] %v5287_v43  ;;  %v1250_v41 = vadd.f32 %v1249_v54, %v975_v37  ;;  %v967_v9 = vmul.f32 %v5300_v39, %v5300_v39  ;;  %v1238_v47 = vadd.f32 %v1237_v19, %v965_v51  ;;  %v5305_v54 = vld [vmem:[%s3964_s21 + $0x5a8] sm:$0xff]  ;;  %v5327_v19 = vld [vmem:[%s3964_s21 + $0x670] sm:$0xff] }
  0xef   : > { %8119 = vst [vmem:[#allocation188_spill] sm:$0xff] %v5292_v55  ;;  %v1258_v35 = vadd.f32 %v1257_v22, %v981_v57  ;;  %v969_v37 = vmul.f32 %v5305_v54, %v5305_v54  ;;  %v992_v57 = vmul.f32 %v5310_v38, %v5310_v38  ;;  %v5315_v22 = vld [vmem:[%s3964_s21 + $0x668] sm:$0xff] }
  0xf0   : > { %v5296_v23 = vpop.xlane.xlu2 %687  ;;  %8120 = vst [vmem:[#allocation189_spill] sm:$0xff] %v5300_v39  ;;  %v1252_v15 = vadd.f32 %v1251_v49, %v1250_v41  ;;  %v993_v30 = vmul.f32 %v5315_v22, %v5315_v22  ;;  %v5322_v49 = vld [vmem:[%s3964_s21 + $0x5a0] sm:$0xff]  ;;  %v1239_v51 = vadd.f32 %v1238_v47, %v966_v29  ;;  %v8126_v55 = vld [vmem:[#allocation127_spill] sm:$0xff] }
  0xf1   : > { %8121 = vst [vmem:[#allocation190_spill] sm:$0xff] %v5305_v54  ;;  %v1259_v39 = vadd.f32 %v1258_v35, %v982_v14  ;;  %v968_v41 = vmul.f32 %v5322_v49, %v5322_v49  ;;  %v994_v54 = vmul.f32 %v5327_v19, %v5327_v19  ;;  %v8127_v14 = vld [vmem:[#allocation128_spill] sm:$0xff]  ;;  %v1242_v29 = vsel %vm504_vm0, %v969_v37, 0.0 }
  0xf2   : > { %8122 = vst [vmem:[#allocation191_spill] sm:$0xff] %v5310_v38  ;;  %v5319_v43 = vpop.xlane.xlu1 %678  ;;  %1253 = vadd.xlane.f32.xlu1 %v1252_v15  ;;  %v1273_v38 = vadd.f32 %v992_v57, %v991_v28  ;;  %v1240_v46 = vadd.f32 %v1239_v51, %v967_v9  ;;  %v999_v35 = vmul.f32 %v8127_v14, %v8127_v14  ;;  %v8128_v15 = vld [vmem:[#allocation119_spill] sm:$0xff]  ;;  %v8130_v51 = vld [vmem:[#allocation125_spill] sm:$0xff]  ;;  %v5552_v25 = vmul.f32 0.0012755102, %v5296_v23 }
  0xf3   : > { %8123 = vst [vmem:[#allocation192_spill] sm:$0xff] %v5315_v22  ;;  %v998_v22 = vmul.f32 %v8126_v55, %v8126_v55  ;;  %v1261_v60 = vadd.f32 %v1260_v18, %v1259_v39  ;;  %v995_v28 = vmul.f32 %v8128_v15, %v8128_v15  ;;  %v5343_v57 = vld [vmem:[%s3964_s21 + $0x688] sm:$0xff]  ;;  %v1001_v14 = vmul.f32 %v4680_v48, %v4680_v48 }
  0xf4   : > { %8124 = vst [vmem:[#allocation193_spill] sm:$0xff] %v5322_v49  ;;  %v1000_v49 = vmul.f32 %v4670_v24, %v4670_v24  ;;  %v5337_v47 = vpop.xlane.xlu0 %669  ;;  %v997_v18 = vmul.f32 %v5343_v57, %v5343_v57  ;;  %v1274_v39 = vadd.f32 %v1273_v38, %v993_v30  ;;  %v1241_v9 = vadd.f32 %v1240_v46, %v968_v41  ;;  %v5359_v30 = vld [vmem:[%s3964_s21 + $0x628] sm:$0xff] }
  0xf5   : > { %8125 = vst [vmem:[#allocation194_spill] sm:$0xff] %v5327_v19  ;;  %1262 = vadd.xlane.f32.xlu2 %v1261_v60  ;;  %v996_v24 = vmul.f32 %v8130_v51, %v8130_v51  ;;  %v1282_v55 = vadd.f32 %v999_v35, %v998_v22  ;;  %v1002_v15 = vmul.f32 %v4694_v3, %v4694_v3  ;;  %v5354_v19 = vld [vmem:[%s3964_s21 + $0x620] sm:$0xff]  ;;  %v5368_v35 = vld [vmem:[%s3964_s21 + $0x630] sm:$0xff]  ;;  %v5567_v17 = vmul.f32 0.0012755102, %v5319_v43 }
  0xf6   : > { %8129 = vst [vmem:[#allocation195_spill] sm:$0xff] %v5343_v57  ;;  %v1275_v37 = vadd.f32 %v1274_v39, %v994_v54  ;;  %v984_v38 = vmul.f32 %v5354_v19, %v5354_v19  ;;  %v985_v46 = vmul.f32 %v5359_v30, %v5359_v30  ;;  %v1243_v41 = vadd.f32 %v1242_v29, %v1241_v9 }
  0xf7   : > { %8131 = vst [vmem:[#allocation196_spill] sm:$0xff] %v5354_v19  ;;  %v1004_v54 = vmul.f32 %v4697_v13, %v4697_v13  ;;  %v1283_v22 = vadd.f32 %v1282_v55, %v1000_v49  ;;  %v986_v39 = vmul.f32 %v5368_v35, %v5368_v35  ;;  %v1278_v48 = vsel %vm504_vm0, %v997_v18, 0.0  ;;  %v5378_v13 = vld [vmem:[%s3964_s21 + $0x638] sm:$0xff] }
  0xf8   : > { %8132 = vst [vmem:[#allocation197_spill] sm:$0xff] %v5359_v30  ;;  %v5363_v60 = vpop.xlane.xlu2 %714  ;;  %v1276_v3 = vadd.f32 %v1275_v37, %v995_v28  ;;  %1244 = vadd.xlane.f32.xlu0 %v1243_v41  ;;  %v1003_v29 = vmul.f32 %v4715_v53, %v4715_v53  ;;  %v987_v55 = vmul.f32 %v5378_v13, %v5378_v13  ;;  %v5383_v28 = vld [vmem:[%s3964_s21 + $0x6c8] sm:$0xff]  ;;  %v5389_v53 = vld [vmem:[%s3964_s21 + $0x640] sm:$0xff]  ;;  %v5570_v23 = vmul.f32 0.0012755102, %v5337_v47 }
  0xf9   : > { %8133 = vst [vmem:[#allocation198_spill] sm:$0xff] %v5368_v35  ;;  %v1284_v9 = vadd.f32 %v1283_v22, %v1001_v14  ;;  %v1264_v49 = vadd.f32 %v985_v46, %v984_v38  ;;  %v1005_v18 = vmul.f32 %v5383_v28, %v5383_v28  ;;  %v1287_v41 = vsel %vm504_vm0, %v1004_v54, 0.0  ;;  %v5396_v38 = vld [vmem:[%s3964_s21 + $0x650] sm:$0xff]  ;;  %v5406_v46 = vld [vmem:[%s3964_s21 + $0x6d8] sm:$0xff] }
  0xfa   : > { %v5373_v19 = vpop.xlane.xlu1 %705  ;;  %8134 = vst [vmem:[#allocation199_spill] sm:$0xff] %v5378_v13  ;;  %v1277_v35 = vadd.f32 %v1276_v3, %v996_v24  ;;  %v988_v14 = vmul.f32 %v5389_v53, %v5389_v53  ;;  %v990_v24 = vmul.f32 %v5396_v38, %v5396_v38  ;;  %v5401_v3 = vld [vmem:[%s3964_s21 + $0x6d0] sm:$0xff]  ;;  %v1007_v54 = vmul.f32 %v5406_v46, %v5406_v46 }
  0xfb   : > { %8135 = vst [vmem:[#allocation200_spill] sm:$0xff] %v5383_v28  ;;  %v1285_v37 = vadd.f32 %v1284_v9, %v1002_v15  ;;  %v1265_v22 = vadd.f32 %v1264_v49, %v986_v39  ;;  %v1006_v15 = vmul.f32 %v5401_v3, %v5401_v3  ;;  %v989_v39 = vmul.f32 %v4666_v21, %v4666_v21 }
  0xfc   : > { %8136 = vst [vmem:[#allocation201_spill] sm:$0xff] %v5389_v53  ;;  %v5393_v30 = vpop.xlane.xlu0 %696  ;;  %v1279_v13 = vadd.f32 %v1278_v48, %v1277_v35  ;;  %v5413_v35 = vld [vmem:[%s3964_s21 + $0x6e0] sm:$0xff]  ;;  %v1269_v57 = vsel %vm504_vm0, %v990_v24, 0.0  ;;  %v5583_v43 = vmul.f32 %v5552_v25, %v5552_v25  ;;  %v5586_v47 = vmul.f32 0.0012755102, %v5363_v60 }
  0xfd   : > { %8137 = vst [vmem:[#allocation202_spill] sm:$0xff] %v5396_v38  ;;  %v1286_v9 = vadd.f32 %v1285_v37, %v1003_v29  ;;  %v1266_v48 = vadd.f32 %v1265_v22, %v987_v55  ;;  %v1008_v49 = vmul.f32 %v5413_v35, %v5413_v35  ;;  %v1291_v28 = vadd.f32 %v1006_v15, %v1005_v18  ;;  %v5427_v22 = vld [vmem:[%s3964_s21 + $0x6f8] sm:$0xff] }
  0xfe   : > { %8138 = vst [vmem:[#allocation203_spill] sm:$0xff] %v5401_v3  ;;  %1280 = vadd.xlane.f32.xlu1 %v1279_v13  ;;  %v1009_v29 = vmul.f32 %v4676_v1, %v4676_v1  ;;  %v1010_v55 = vmul.f32 %v4708_v6, %v4708_v6  ;;  %v1011_v18 = vmul.f32 %v5427_v22, %v5427_v22  ;;  %v5590_v50 = vmul.f32 0.0012755102, %v5373_v19 }
  0xff   : > { %8139 = vst [vmem:[#allocation204_spill] sm:$0xff] %v5406_v46  ;;  %v1288_v3 = vadd.f32 %v1287_v41, %v1286_v9  ;;  %v1267_v53 = vadd.f32 %v1266_v48, %v988_v14  ;;  %v1292_v37 = vadd.f32 %v1291_v28, %v1007_v54  ;;  %v5600_v60 = vmul.f32 %v5570_v23, %v5570_v23 }
 0x100   : > { %8140 = vst [vmem:[#allocation205_spill] sm:$0xff] %v5413_v35  ;;  %v5417_v38 = vpop.xlane.xlu2 %741  ;;  %v1296_v28 = vsel %vm504_vm0, %v1011_v18, 0.0  ;;  %v5454_v18 = vmul.f32 0.0012755102, %v5013_v34  ;;  %v5472_v34 = vmul.f32 0.0012755102, %v5078_v5 }
 0x101   : > { %1289 = vadd.xlane.f32.xlu2 %v1288_v3  ;;  %v1268_v13 = vadd.f32 %v1267_v53, %v989_v39  ;;  %8141 = vst [vmem:[#allocation206_spill] sm:$0xff] %v5427_v22  ;;  %v1293_v41 = vadd.f32 %v1292_v37, %v1008_v49  ;;  %v5439_v39 = vmul.f32 0.0012755102, %v4997_v0  ;;  %v5446_v37 = vmul.f32 0.0012755102, %v4974_v42 }
 0x102   : > { %v5422_v46 = vpop.xlane.xlu1 %732  ;;  %8142 = vst [vmem:[#allocation207_spill] sm:$0xff] %v5454_v18  ;;  %v5491_v5 = vmul.f32 0.0012755102, %v5136_v56  ;;  %v5508_v56 = vmul.f32 %v5472_v34, %v5472_v34  ;;  %v5514_v22 = vmul.f32 0.0012755102, %v5214_v44 }
 0x103   : > { %v1270_v14 = vadd.f32 %v1269_v57, %v1268_v13  ;;  %v1294_v24 = vadd.f32 %v1293_v41, %v1009_v29  ;;  %v1364_v57 = vmul.f32 %v5439_v39, %v5439_v39  ;;  %v5457_v41 = vmul.f32 0.0012755102, %v5032_v7  ;;  %8144 = vst [vmem:[#allocation209_spill] sm:$0xff] %v5472_v34 }
 0x104   : > { %v5466_v42 = vmul.f32 %v5446_v37, %v5446_v37  ;;  %8147 = vst [vmem:[#allocation212_spill] sm:$0xff] %v5491_v5  ;;  %v5549_v10 = vmul.f32 %v5514_v22, %v5514_v22  ;;  %v5605_v19 = vmul.f32 0.0012755102, %v5393_v30 }
 0x105   : > { %1271 = vadd.xlane.f32.xlu0 %v1270_v14  ;;  %v1295_v9 = vadd.f32 %v1294_v24, %v1010_v55  ;;  %v5451_v55 = vmul.f32 0.0012755102, %v4984_v36  ;;  %v5460_v14 = vmul.f32 0.0012755102, %v5048_v12  ;;  %v5469_v36 = vmul.f32 0.0012755102, %v5069_v40 }
 0x106   : > { %v5431_v15 = vpop.xlane.xlu0 %723  ;;  %v5478_v12 = vmul.f32 %v5454_v18, %v5454_v18  ;;  %v5488_v40 = vmul.f32 0.0012755102, %v5121_v16  ;;  %8151 = vst [vmem:[#allocation216_spill] sm:$0xff] %v5514_v22 }
 0x107   : > { %v1297_v3 = vadd.f32 %v1296_v28, %v1295_v9  ;;  %8143 = vst [vmem:[#allocation208_spill] sm:$0xff] %v5469_v36  ;;  %v1366_v7 = vmul.f32 %v5451_v55, %v5451_v55  ;;  %v5481_v28 = vmul.f32 0.0012755102, %v5094_v61  ;;  %v5499_v61 = vmul.f32 0.0012755102, %v5180_v2 }
 0x108   : > { %8146 = vst [vmem:[#allocation211_spill] sm:$0xff] %v5488_v40  ;;  %v5504_v16 = vmul.f32 %v5469_v36, %v5469_v36  ;;  %v5517_v2 = vmul.f32 0.0012755102, %v5239_v27  ;;  %v5526_v51 = vmul.f32 %v5488_v40, %v5488_v40 }
 0x109   : > { %8145 = vst [vmem:[#allocation210_spill] sm:$0xff] %v5481_v28  ;;  %v1370_v21 = vmul.f32 %v5481_v28, %v5481_v28  ;;  %v5538_v44 = vmul.f32 %v5499_v61, %v5499_v61 }
 0x10a   : > { %v5434_v54 = vpop.xlane.xlu2 %768  ;;  %8149 = vst [vmem:[#allocation214_spill] sm:$0xff] %v5499_v61 }
 0x10b   : > { %8152 = vst [vmem:[#allocation217_spill] sm:$0xff] %v5517_v2 }
 0x10c   : > { %v5436_v53 = vpop.xlane.xlu1 %759  ;;  %8155 = vst [vmem:[#allocation220_spill] sm:$0xff] %v5552_v25  ;;  %v3921_v25 = vmov 0  }
 0x10d   : > { %1298 = vadd.xlane.f32.xlu0 %v1297_v3  ;;  %8156 = vst [vmem:[#allocation221_spill] sm:$0xff] %v5567_v17  ;;  %3757 = vset.pattern.permute.xlu1 %v3921_v25 }
 0x10e   : > { %v5441_v48 = vpop.xlane.xlu0 %750  ;;  %8157 = vst [vmem:[#allocation222_spill] sm:$0xff] %v5570_v23  ;;  %3759 = vset.pattern.permute.xlu0 %v3921_v25  ;;  %3758 = vset.pattern.permute.xlu2 %v3921_v25 }
 0x10f   : > { %8158 = vst [vmem:[#allocation223_spill] sm:$0xff] %v5586_v47 }
 0x110   : > { %8159 = vst [vmem:[#allocation224_spill] sm:$0xff] %v5590_v50 }
 0x111   : > { %8160 = vst [vmem:[#allocation225_spill] sm:$0xff] %v5605_v19 }
 0x112   : > { %v1020_v49 = vpop.xlane.xlu2 %1019 }
 0x113   : > { %v1332_v29 = vmul.f32 0.0012755102, %v1020_v49  ;;  %v1367_v49 = vmul.f32 %v5457_v41, %v5457_v41 }
 0x114   : > { %v5448_v13 = vpop.xlane.xlu1 %786 }
 0x115   : > { %v1396_v0 = vsub.f32 %v1332_v29, %v1364_v57  ;;  %v5494_v57 = vmul.f32 0.0012755102, %v5152_v59  ;;  %v5511_v59 = vmul.f32 0.0012755102, %v5192_v52  ;;  %v5530_v52 = vmul.f32 %v5491_v5, %v5491_v5 }
 0x117   : > { %v1428_v24 = vmax.f32 %v1396_v0, 0.0  ;;  %v5462_v9 = vpop.xlane.xlu0 %777  ;;  %8148 = vst [vmem:[#allocation213_spill] sm:$0xff] %v5494_v57  ;;  %v1365_v0 = vmul.f32 %v5460_v14, %v5460_v14  ;;  %v5534_v27 = vmul.f32 %v5494_v57, %v5494_v57  ;;  %v5545_v45 = vmul.f32 %v5511_v59, %v5511_v59 }
 0x118   : > { %8150 = vst [vmem:[#allocation215_spill] sm:$0xff] %v5511_v59 }
 0x119   : > { %v5483_v3 = vadd.f32 1e-05, %v1428_v24 }
 0x11a   : > { %v1047_v29 = vpop.xlane.xlu2 %1046 }
 0x11b   : > { %3760 = vrsqrt.f32 %v5483_v3  ;;  %v1335_v24 = vmul.f32 0.0012755102, %v1047_v29  ;;  %v5520_v29 = vmul.f32 0.0012755102, %v5253_v33  ;;  %vm1498_vm2 = vweird.f32 %v5483_v3 }
 0x11c   : > { %v1038_v6 = vpop.xlane.xlu1 %1037 }
 0x11d   : > { %8153 = vst [vmem:[#allocation218_spill] sm:$0xff] %v5520_v29  ;;  %v1334_v1 = vmul.f32 0.0012755102, %v1038_v6  ;;  %v1399_v35 = vsub.f32 %v1335_v24, %v1367_v49  ;;  %v5541_v6 = vmul.f32 0.0012755102, %v5281_v63  ;;  %v5558_v63 = vmul.f32 %v5517_v2, %v5517_v2 }
 0x11f   : > { %8154 = vst [vmem:[#allocation219_spill] sm:$0xff] %v5541_v6  ;;  %v1398_v33 = vsub.f32 %v1334_v1, %v1366_v7  ;;  %v1431_v49 = vmax.f32 %v1399_v35, 0.0  ;;  %v1029_v24 = vpop.xlane.xlu0 %1028  ;;  %v5562_v1 = vmul.f32 %v5520_v29, %v5520_v29  ;;  %v5576_v31 = vmul.f32 %v5541_v6, %v5541_v6 }
 0x120   : > { %v1333_v11 = vmul.f32 0.0012755102, %v1029_v24 }
 0x121   : > { %v5554_v20 = vpop.eup %3760  ;;  %v1430_v35 = vmax.f32 %v1398_v33, 0.0  ;;  %v5564_v7 = vadd.f32 1e-05, %v1431_v49 }
 0x122   : > { %v1493_v24 = vmul.f32 %v5554_v20, %v5483_v3  ;;  %v1397_v4 = vsub.f32 %v1333_v11, %v1365_v0  ;;  %v1074_v8 = vpop.xlane.xlu2 %1073  ;;  %vm1499_vm1 = vweird.f32 %v5554_v20  ;;  %v5650_v3 = vmul.f32 0.0012755102, %v5431_v15 }
 0x123   : > { %v5578_v26 = vadd.f32 1e-05, %v1430_v35  ;;  %3762 = vrsqrt.f32 %v5564_v7  ;;  %v1338_v33 = vmul.f32 0.0012755102, %v1074_v8  ;;  %v5596_v8 = vmul.f32 %v5567_v17, %v5567_v17  ;;  %vm1500_vm3 = vmor %vm1498_vm2, %vm1499_vm1 }
 0x124   : > { %v1494_v49 = vmul.f32 %v5554_v20, %v1493_v24  ;;  %v1429_v11 = vmax.f32 %v1397_v4, 0.0  ;;  %v1065_v0 = vpop.xlane.xlu1 %1064  ;;  %8163 = vst [vmem:[#allocation228_spill] sm:$0xff] %v5650_v3  ;;  %vm1528_vm11 = vweird.f32 %v5564_v7 }
 0x125   : > { %3764 = vrsqrt.f32 %v5578_v26  ;;  %v1337_v35 = vmul.f32 0.0012755102, %v1065_v0  ;;  %v1402_v58 = vsub.f32 %v1338_v33, %v1370_v21  ;;  %vm1518_vm4 = vweird.f32 %v5578_v26 }
 0x126   : > { %v1495_v24 = vmul.f32 0.5, %v1494_v49  ;;  %v5602_v4 = vadd.f32 1e-05, %v1429_v11 }
 0x127   : > { %v1401_v32 = vsub.f32 %v1337_v35, %v5478_v12  ;;  %v1434_v0 = vmax.f32 %v1402_v58, 0.0  ;;  %v1056_v62 = vpop.xlane.xlu0 %1055  ;;  %v5621_v58 = vmul.f32 %v5586_v47, %v5586_v47  ;;  %v5628_v12 = vmul.f32 0.0012755102, %v5417_v38 }
 0x128   : > { %v1496_v21 = vsub.f32 1.5, %v1495_v24  ;;  %3766 = vrsqrt.f32 %v5602_v4  ;;  %v1336_v33 = vmul.f32 0.0012755102, %v1056_v62  ;;  %v5625_v62 = vmul.f32 %v5590_v50, %v5590_v50 }
 0x129   : > { %v5617_v30 = vpop.eup %3762  ;;  %8161 = vst [vmem:[#allocation226_spill] sm:$0xff] %v5628_v12  ;;  %v1433_v49 = vmax.f32 %v1401_v32, 0.0  ;;  %v5631_v11 = vadd.f32 1e-05, %v1434_v0  ;;  %v5639_v50 = vmul.f32 %v5605_v19, %v5605_v19  ;;  %v5642_v38 = vmul.f32 0.0012755102, %v5422_v46 }
 0x12a   : > { %v1400_v35 = vsub.f32 %v1336_v33, %v5466_v42  ;;  %v1101_v24 = vpop.xlane.xlu2 %1100  ;;  %v1497_v47 = vmul.f32 %v5554_v20, %v1496_v21  ;;  %v1523_v32 = vmul.f32 %v5617_v30, %v5564_v7  ;;  %v1812_v42 = vld [vmem:[%s5614_s25] sm:$0xff]  ;;  %v5656_v46 = vmul.f32 0.0012755102, %v5434_v54 }
 0x12b   : > { %v5635_v2 = vpop.eup %3764  ;;  %8162 = vst [vmem:[#allocation227_spill] sm:$0xff] %v5642_v38  ;;  %v1341_v25 = vmul.f32 0.0012755102, %v1101_v24  ;;  %v5658_v23 = vadd.f32 1e-05, %v1433_v49  ;;  %3768 = vrsqrt.f32 %v5631_v11  ;;  %vm1508_vm6 = vweird.f32 %v5602_v4 }
 0x12c   : > { %v1513_v0 = vmul.f32 %v5635_v2, %v5578_v26  ;;  %v1432_v21 = vmax.f32 %v1400_v35, 0.0  ;;  %v1092_v33 = vpop.xlane.xlu1 %1091  ;;  %v1501_v19 = vsel %vm1500_vm3, %v5554_v20, %v1497_v47  ;;  %8164 = vst [vmem:[#allocation229_spill] sm:$0xff] %v5656_v46  ;;  %v1524_v20 = vmul.f32 %v5617_v30, %v1523_v32  ;;  %v1814_v26 = vld [vmem:[%s5614_s25 + $0x10] sm:$0xff] }
 0x12d   : > { %v1340_v24 = vmul.f32 0.0012755102, %v1092_v33  ;;  %v1405_v17 = vsub.f32 %v1341_v25, %v5534_v27  ;;  %v5667_v35 = vmul.f32 %v1812_v42, %v1501_v19  ;;  %v5675_v27 = vmul.f32 %v5628_v12, %v5628_v12 }
 0x12e   : > { %v5661_v61 = vpop.eup %3766  ;;  %v1514_v15 = vmul.f32 %v5635_v2, %v1513_v0  ;;  %v5665_v6 = vadd.f32 1e-05, %v1432_v21  ;;  %v5679_v25 = vmul.f32 %v5642_v38, %v5642_v38  ;;  %v5689_v32 = vmul.f32 %v5650_v3, %v5650_v3 }
 0x12f   : > { %v1503_v54 = vmul.f32 %v5661_v61, %v5602_v4  ;;  %v1404_v47 = vsub.f32 %v1340_v24, %v5504_v16  ;;  %v1437_v49 = vmax.f32 %v1405_v17, 0.0  ;;  %v1083_v33 = vpop.xlane.xlu0 %1082  ;;  %1974 = vperm.xlu1 %3757, %v5667_v35   ;;  %v5693_v42 = vmul.f32 %v5656_v46, %v5656_v46 }
 0x130   : > { %v1515_v0 = vmul.f32 0.5, %v1514_v15  ;;  %3770 = vrsqrt.f32 %v5665_v6  ;;  %v1339_v17 = vmul.f32 0.0012755102, %v1083_v33  ;;  %v5696_v21 = vmul.f32 0.0012755102, %v5436_v53 }
 0x131   : > { %v1504_v19 = vmul.f32 %v5661_v61, %v1503_v54  ;;  %3772 = vrsqrt.f32 %v5658_v23  ;;  %v5685_v16 = vadd.f32 1e-05, %v1437_v49  ;;  %v1436_v24 = vmax.f32 %v1404_v47, 0.0  ;;  %v5701_v49 = vpop.eup %3768 }
 0x132   : > { %v1128_v15 = vpop.xlane.xlu2 %1127  ;;  %v1516_v12 = vsub.f32 1.5, %v1515_v0  ;;  %v5698_v54 = vmul.f32 0.5, %v1524_v20  ;;  %v5704_v33 = vmul.f32 0.0012755102, %v5441_v48  ;;  %v5707_v3 = vmul.f32 0.0012755102, %v5462_v9 }
 0x133   : > { %v1505_v38 = vmul.f32 0.5, %v1504_v19  ;;  %3774 = vrsqrt.f32 %v5685_v16  ;;  %v1403_v46 = vsub.f32 %v1339_v17, %v5508_v56  ;;  %v1344_v29 = vmul.f32 0.0012755102, %v1128_v15 }
 0x134   : > { %8165 = vst [vmem:[#allocation230_spill] sm:$0xff] %v5704_v33  ;;  %v1119_v53 = vpop.xlane.xlu1 %1118  ;;  %vm1519_vm5 = vweird.f32 %v5635_v2  ;;  %v5715_v19 = vadd.f32 1e-05, %v1436_v24  ;;  %v1526_v56 = vsub.f32 1.5, %v5698_v54  ;;  %vm1509_vm8 = vweird.f32 %v5661_v61 }
 0x135   : > { %8166 = vst [vmem:[#allocation231_spill] sm:$0xff] %v5707_v3  ;;  %v1506_v47 = vsub.f32 1.5, %v1505_v38  ;;  %v1343_v20 = vmul.f32 0.0012755102, %v1119_v53  ;;  %v1435_v48 = vmax.f32 %v1403_v46, 0.0  ;;  %v1408_v9 = vsub.f32 %v1344_v29, %v5549_v10  ;;  %vm5729_vm7 = vmor %vm1518_vm4, %vm1519_vm5 }
 0x136   : > { %v5712_v0 = vpop.eup %3770  ;;  %v1517_v53 = vmul.f32 %v5635_v2, %v1516_v12  ;;  %3776 = vrsqrt.f32 %v5715_v19  ;;  %vm5758_vm9 = vmor %vm1508_vm6, %vm1509_vm8  ;;  %v5772_v4 = vmul.f32 %v5704_v33, %v5704_v33  ;;  %vm1529_vm10 = vweird.f32 %v5617_v30 }
 0x137   : > { %v5718_v40 = vpop.eup %3772  ;;  %v1533_v38 = vmul.f32 %v5712_v0, %v5665_v6  ;;  %v1407_v17 = vsub.f32 %v1343_v20, %v5526_v51  ;;  %v1110_v15 = vpop.xlane.xlu0 %1109  ;;  %v5725_v22 = vadd.f32 1e-05, %v1435_v48  ;;  %v1440_v24 = vmax.f32 %v1408_v9, 0.0  ;;  %vm5811_vm14 = vmor %vm1528_vm11, %vm1529_vm10 }
 0x138   : > { %v1507_v29 = vmul.f32 %v5661_v61, %v1506_v47  ;;  %v1342_v20 = vmul.f32 0.0012755102, %v1110_v15  ;;  %v1521_v12 = vsel %vm5729_vm7, %v5635_v2, %v1517_v53  ;;  %v1543_v48 = vmul.f32 %v5718_v40, %v5658_v23 }
 0x139   : > { %v5735_v46 = vpop.eup %3774  ;;  %v1534_v51 = vmul.f32 %v5712_v0, %v1533_v38  ;;  %v1439_v54 = vmax.f32 %v1407_v17, 0.0  ;;  %v1553_v47 = vmul.f32 %v5701_v49, %v5631_v11  ;;  %v5751_v15 = vadd.f32 1e-05, %v1440_v24 }
 0x13a   : > { %v1583_v9 = vmul.f32 %v5735_v46, %v5685_v16  ;;  %v1406_v10 = vsub.f32 %v1342_v20, %v5530_v52  ;;  %3778 = vrsqrt.f32 %v5725_v22  ;;  %v5764_v59 = vmul.f32 %v1814_v26, %v1521_v12 }
 0x13b   : > { %v1535_v38 = vmul.f32 0.5, %v1534_v51  ;;  %v5749_v17 = vadd.f32 1e-05, %v1439_v54  ;;  %v1511_v24 = vsel %vm5758_vm9, %v5661_v61, %v1507_v29  ;;  %v1813_v51 = vld [vmem:[%s5614_s25 + $0x8] sm:$0xff]  ;;  %v5776_v20 = vmul.f32 %v5707_v3, %v5707_v3 }
 0x13c   : > { %v1584_v53 = vmul.f32 %v5735_v46, %v1583_v9  ;;  %8171 = vst [vmem:[#allocation232_spill] sm:$0xff] %v5764_v59  ;;  %v1146_v52 = vpop.xlane.xlu1 %1145  ;;  %v1155_v54 = vpop.xlane.xlu2 %1154  ;;  %v1544_v12 = vmul.f32 %v5718_v40, %v1543_v48  ;;  %v1554_v26 = vmul.f32 %v5701_v49, %v1553_v47  ;;  %v1438_v61 = vmax.f32 %v1406_v10, 0.0  ;;  %1984 = vperm.xlu0 %3759, %v5764_v59  }
 0x13d   : > { %3780 = vrsqrt.f32 %v5749_v17  ;;  %v1536_v29 = vsub.f32 1.5, %v1535_v38  ;;  %v5784_v9 = vmul.f32 %v1813_v51, %v1511_v24  ;;  %v1346_v2 = vmul.f32 0.0012755102, %v1146_v52  ;;  %v5786_v36 = vpop.eup %3776 }
 0x13e   : > { %3782 = vrsqrt.f32 %v5751_v15  ;;  %v1347_v33 = vmul.f32 0.0012755102, %v1155_v54  ;;  %v1585_v57 = vmul.f32 0.5, %v1584_v53  ;;  %v5788_v5 = vadd.f32 1e-05, %v1438_v61 }
 0x13f   : > { %v1137_v3 = vpop.xlane.xlu0 %1136  ;;  %v1527_v48 = vmul.f32 %v5617_v30, %v1526_v56  ;;  %vm1538_vm12 = vweird.f32 %v5665_v6  ;;  %1979 = vperm.xlu2 %3758, %v5784_v9   ;;  %v1410_v47 = vsub.f32 %v1346_v2, %v5538_v44  ;;  %v1545_v24 = vmul.f32 0.5, %v1544_v12 }
 0x140   : > { %v1345_v18 = vmul.f32 0.0012755102, %v1137_v3  ;;  %v1411_v38 = vsub.f32 %v1347_v33, %v5576_v31  ;;  %v5796_v10 = vpop.eup %3778  ;;  %v5798_v53 = vmul.f32 0.5, %v1554_v26  ;;  %3784 = vrsqrt.f32 %v5788_v5  ;;  %v1815_v26 = vld [vmem:[%s5614_s25 + $0x18] sm:$0xff] }
 0x141   : > { %vm1548_vm13 = vweird.f32 %v5658_v23  ;;  %v1573_v51 = vmul.f32 %v5786_v36, %v5715_v19  ;;  %v1442_v44 = vmax.f32 %v1410_v47, 0.0  ;;  %v1537_v33 = vmul.f32 %v5712_v0, %v1536_v29 }
 0x142   : > { %v1409_v3 = vsub.f32 %v1345_v18, %v5545_v45  ;;  %v1443_v52 = vmax.f32 %v1411_v38, 0.0  ;;  %v1586_v18 = vsub.f32 1.5, %v1585_v57  ;;  %v1531_v12 = vsel %vm5811_vm14, %v5617_v30, %v1527_v48 }
 0x143   : > { %v5802_v56 = vpop.eup %3780  ;;  %vm1539_vm15 = vweird.f32 %v5712_v0  ;;  %v1563_v7 = vmul.f32 %v5796_v10, %v5725_v22  ;;  %v5827_v29 = vadd.f32 1e-05, %v1442_v44  ;;  %v1546_v31 = vsub.f32 1.5, %v1545_v24 }
 0x144   : > { %v5816_v45 = vpop.eup %3782  ;;  %v1441_v54 = vmax.f32 %v1409_v3, 0.0  ;;  %v1173_v61 = vpop.xlane.xlu1 %1172  ;;  %v5829_v47 = vadd.f32 1e-05, %v1443_v52  ;;  %vm5833_vm1 = vmor %vm1538_vm12, %vm1539_vm15  ;;  %v1603_v30 = vmul.f32 %v5802_v56, %v5749_v17  ;;  %v1816_v3 = vld [vmem:[%s5614_s25 + $0x20] sm:$0xff]  ;;  %vm1558_vm2 = vweird.f32 %v5631_v11 }
 0x145   : > { %v1613_v2 = vmul.f32 %v5816_v45, %v5751_v15  ;;  %v1541_v38 = vsel %vm5833_vm1, %v5712_v0, %v1537_v33  ;;  %v1349_v44 = vmul.f32 0.0012755102, %v1173_v61  ;;  %3786 = vrsqrt.f32 %v5827_v29 }
 0x146   : > { %v5839_v48 = vadd.f32 1e-05, %v1441_v54  ;;  %v5848_v52 = vmul.f32 %v1815_v26, %v1531_v12  ;;  %v5850_v34 = vpop.eup %3784  ;;  %v1556_v54 = vsub.f32 1.5, %v5798_v53  ;;  %vm1588_vm3 = vweird.f32 %v5685_v16 }
 0x147   : > { %v1614_v6 = vmul.f32 %v5816_v45, %v1613_v2  ;;  %v1182_v28 = vpop.xlane.xlu2 %1181  ;;  %3788 = vrsqrt.f32 %v5829_v47  ;;  %v1587_v0 = vmul.f32 %v5735_v46, %v1586_v18  ;;  %v1574_v24 = vmul.f32 %v5786_v36, %v1573_v51  ;;  %v1821_v2 = vld [vmem:[%s5614_s25 + $0x48] sm:$0xff] }
 0x148   : > { %v1564_v33 = vmul.f32 %v5796_v10, %v1563_v7  ;;  %3790 = vrsqrt.f32 %v5839_v48  ;;  %1989 = vperm.xlu2 %3758, %v5848_v52   ;;  %v5860_v12 = vmul.f32 %v1816_v3, %v1541_v38  ;;  %v1604_v26 = vmul.f32 %v5802_v56, %v1603_v30 }
 0x149   : > { %v1413_v53 = vsub.f32 %v1349_v44, %v5558_v63  ;;  %v1350_v61 = vmul.f32 0.0012755102, %v1182_v28  ;;  %vm1589_vm4 = vweird.f32 %v5735_v46  ;;  %v1615_v18 = vmul.f32 0.5, %v1614_v6  ;;  %v1817_v44 = vld [vmem:[%s5614_s25 + $0x28] sm:$0xff] }
 0x14a   : > { %v1593_v51 = vmul.f32 %v5850_v34, %v5788_v5  ;;  %1994 = vperm.xlu1 %3757, %v5860_v12   ;;  %v1164_v7 = vpop.xlane.xlu0 %1163  ;;  %vm1590_vm5 = vmor %vm1588_vm3, %vm1589_vm4  ;;  %v1547_v57 = vmul.f32 %v5718_v40, %v1546_v31  ;;  %vm1549_vm6 = vweird.f32 %v5718_v40  ;;  %v1575_v16 = vmul.f32 0.5, %v1574_v24 }
 0x14b   : > { %v1445_v63 = vmax.f32 %v1413_v53, 0.0  ;;  %v1414_v28 = vsub.f32 %v1350_v61, %v5600_v60  ;;  %v1348_v30 = vmul.f32 0.0012755102, %v1164_v7  ;;  %v1591_v38 = vsel %vm1590_vm5, %v5735_v46, %v1587_v0  ;;  %vm5877_vm7 = vmor %vm1548_vm13, %vm1549_vm6  ;;  %v5882_v6 = vpop.eup %3786 }
 0x14c   : > { %v5884_v31 = vmul.f32 %v1821_v2, %v1591_v38  ;;  %v1551_v60 = vsel %vm5877_vm7, %v5718_v40, %v1547_v57  ;;  %v1557_v53 = vmul.f32 %v5701_v49, %v1556_v54  ;;  %v1565_v23 = vmul.f32 0.5, %v1564_v33  ;;  %v1818_v54 = vld [vmem:[%s5614_s25 + $0x30] sm:$0xff] }
 0x14d   : > { %v5890_v46 = vpop.eup %3788  ;;  %v5892_v0 = vadd.f32 1e-05, %v1445_v63  ;;  %v1446_v61 = vmax.f32 %v1414_v28, 0.0  ;;  %v1412_v7 = vsub.f32 %v1348_v30, %v5562_v1  ;;  %vm1578_vm8 = vweird.f32 %v5715_v19 }
 0x14e   : > { %8178 = vst [vmem:[#allocation233_spill] sm:$0xff] %v5884_v31  ;;  %v5895_v59 = vpop.eup %3790  ;;  %v5898_v24 = vmul.f32 0.5, %v1604_v26  ;;  %v1643_v2 = vmul.f32 %v5890_v46, %v5829_v47  ;;  %2019 = vperm.xlu0 %3759, %v5884_v31   ;;  %v5903_v40 = vmul.f32 %v1817_v44, %v1551_v60  ;;  %vm1559_vm9 = vweird.f32 %v5701_v49  ;;  %v1200_v33 = vpop.xlane.xlu1 %1199 }
 0x14f   : > { %v1616_v57 = vsub.f32 1.5, %v1615_v18  ;;  %v1594_v1 = vmul.f32 %v5850_v34, %v1593_v51  ;;  %v1633_v63 = vmul.f32 %v5882_v6, %v5827_v29  ;;  %3792 = vrsqrt.f32 %v5892_v0  ;;  %vm1560_vm10 = vmor %vm1558_vm2, %vm1559_vm9 }
 0x150   : > { %vm1568_vm11 = vweird.f32 %v5725_v22  ;;  %v1623_v26 = vmul.f32 %v5895_v59, %v5839_v48  ;;  %v5916_v28 = vadd.f32 1e-05, %v1446_v61  ;;  %v1444_v30 = vmax.f32 %v1412_v7, 0.0  ;;  %1999 = vperm.xlu2 %3758, %v5903_v40  }
 0x151   : > { %v1561_v18 = vsel %vm1560_vm10, %v5701_v49, %v1557_v53  ;;  %vm1618_vm12 = vweird.f32 %v5751_v15  ;;  %v1644_v51 = vmul.f32 %v5890_v46, %v1643_v2  ;;  %v1352_v11 = vmul.f32 0.0012755102, %v1200_v33 }
 0x152   : > { %v5922_v38 = vmul.f32 %v1818_v54, %v1561_v18  ;;  %v1576_v3 = vsub.f32 1.5, %v1575_v16  ;;  %v1566_v44 = vsub.f32 1.5, %v1565_v23  ;;  %3794 = vrsqrt.f32 %v5916_v28  ;;  %v1209_v61 = vpop.xlane.xlu2 %1208 }
 0x153   : > { %v5925_v60 = vadd.f32 1e-05, %v1444_v30  ;;  %v1606_v7 = vsub.f32 1.5, %v5898_v24  ;;  %v5928_v31 = vmul.f32 0.5, %v1594_v1  ;;  %v1416_v49 = vsub.f32 %v1352_v11, %v5583_v43  ;;  %v1824_v43 = vld [vmem:[%s5614_s25 + $0x60] sm:$0xff] }
 0x154   : > { %2004 = vperm.xlu1 %3757, %v5922_v38   ;;  %v1353_v53 = vmul.f32 0.0012755102, %v1209_v61  ;;  %v1634_v2 = vmul.f32 %v5882_v6, %v1633_v63  ;;  %v1624_v16 = vmul.f32 %v5895_v59, %v1623_v26  ;;  %v1617_v23 = vmul.f32 %v5816_v45, %v1616_v57 }
 0x155   : > { %3796 = vrsqrt.f32 %v5925_v60  ;;  %v5936_v54 = vpop.eup %3792  ;;  %v1645_v33 = vmul.f32 0.5, %v1644_v51  ;;  %vm1648_vm13 = vweird.f32 %v5829_v47  ;;  %v1448_v1 = vmax.f32 %v1416_v49, 0.0  ;;  %v1191_v51 = vpop.xlane.xlu0 %1190 }
 0x156   : > { %v1417_v30 = vsub.f32 %v1353_v53, %v5639_v50  ;;  %vm1619_vm14 = vweird.f32 %v5816_v45  ;;  %v1663_v63 = vmul.f32 %v5936_v54, %v5892_v0  ;;  %v1577_v57 = vmul.f32 %v5786_v36, %v1576_v3  ;;  %v1820_v3 = vld [vmem:[%s5614_s25 + $0x40] sm:$0xff] }
 0x157   : > { %vm1620_vm15 = vmor %vm1618_vm12, %vm1619_vm14  ;;  %vm1579_vm1 = vweird.f32 %v5786_v36  ;;  %v1567_v26 = vmul.f32 %v5796_v10, %v1566_v44  ;;  %vm1608_vm2 = vweird.f32 %v5749_v17  ;;  %v5950_v18 = vadd.f32 1e-05, %v1448_v1 }
 0x158   : > { %v1449_v50 = vmax.f32 %v1417_v30, 0.0  ;;  %v1621_v11 = vsel %vm1620_vm15, %v5816_v45, %v1617_v23  ;;  %vm5955_vm3 = vmor %vm1578_vm8, %vm1579_vm1  ;;  %vm1569_vm4 = vweird.f32 %v5796_v10  ;;  %v5961_v61 = vpop.eup %3794  ;;  %v5963_v44 = vmul.f32 0.5, %v1634_v2  ;;  %v1819_v30 = vld [vmem:[%s5614_s25 + $0x38] sm:$0xff] }
 0x159   : > { %v1351_v49 = vmul.f32 0.0012755102, %v1191_v51  ;;  %v5965_v53 = vmul.f32 %v1824_v43, %v1621_v11  ;;  %v1581_v45 = vsel %vm5955_vm3, %v5786_v36, %v1577_v57  ;;  %v1646_v23 = vsub.f32 1.5, %v1645_v33  ;;  %vm5977_vm5 = vmor %vm1568_vm11, %vm1569_vm4  ;;  %v1827_v2 = vld [vmem:[%s5614_s25 + $0x78] sm:$0xff] }
 0x15a   : > { %v1673_v19 = vmul.f32 %v5961_v61, %v5916_v28  ;;  %3798 = vrsqrt.f32 %v5950_v18  ;;  %v5973_v1 = vadd.f32 1e-05, %v1449_v50  ;;  %v1596_v51 = vsub.f32 1.5, %v5928_v31 }
 0x15b   : > { %v5982_v43 = vpop.eup %3796  ;;  %v1415_v36 = vsub.f32 %v1351_v49, %v5596_v8  ;;  %2034 = vperm.xlu0 %3759, %v5965_v53   ;;  %v5987_v33 = vmul.f32 %v1820_v3, %v1581_v45  ;;  %v1571_v57 = vsel %vm5977_vm5, %v5796_v10, %v1567_v26  ;;  %vm1598_vm6 = vweird.f32 %v5788_v5  ;;  %v1227_v8 = vpop.xlane.xlu1 %1226 }
 0x15c   : > { %v5993_v22 = vmul.f32 0.5, %v1624_v16  ;;  %v1664_v50 = vmul.f32 %v5936_v54, %v1663_v63  ;;  %v1674_v11 = vmul.f32 %v5961_v61, %v1673_v19  ;;  %3800 = vrsqrt.f32 %v5973_v1 }
 0x15d   : > { %vm1678_vm7 = vweird.f32 %v5916_v28  ;;  %v1653_v31 = vmul.f32 %v5982_v43, %v5925_v60  ;;  %v1447_v15 = vmax.f32 %v1415_v36, 0.0  ;;  %2014 = vperm.xlu1 %3757, %v5987_v33   ;;  %v6002_v10 = vmul.f32 %v1819_v30, %v1571_v57  ;;  %v1236_v57 = vpop.xlane.xlu2 %1235 }
 0x15e   : > { %v1355_v16 = vmul.f32 0.0012755102, %v1227_v8  ;;  %v1636_v26 = vsub.f32 1.5, %v5963_v44  ;;  %v1675_v63 = vmul.f32 0.5, %v1674_v11  ;;  %v1647_v3 = vmul.f32 %v5890_v46, %v1646_v23  ;;  %v1823_v11 = vld [vmem:[%s5614_s25 + $0x58] sm:$0xff] }
 0x15f   : > { %vm1649_vm8 = vweird.f32 %v5890_v46  ;;  %v6007_v49 = vadd.f32 1e-05, %v1447_v15  ;;  %2009 = vperm.xlu2 %3758, %v6002_v10   ;;  %v1607_v44 = vmul.f32 %v5802_v56, %v1606_v7  ;;  %vm1609_vm10 = vweird.f32 %v5802_v56 }
 0x160   : > { %v1419_v45 = vsub.f32 %v1355_v16, %v5621_v58  ;;  %vm6013_vm9 = vmor %vm1648_vm13, %vm1649_vm8  ;;  %v6022_v23 = vpop.eup %3798  ;;  %v1626_v30 = vsub.f32 1.5, %v5993_v22  ;;  %v6025_v36 = vmul.f32 0.5, %v1664_v50  ;;  %v1676_v58 = vsub.f32 1.5, %v1675_v63 }
 0x161   : > { %v1651_v47 = vsel %vm6013_vm9, %v5890_v46, %v1647_v3  ;;  %vm1638_vm11 = vweird.f32 %v5827_v29  ;;  %v1654_v24 = vmul.f32 %v5982_v43, %v1653_v31  ;;  %3802 = vrsqrt.f32 %v6007_v49  ;;  %vm1610_vm12 = vmor %vm1608_vm2, %vm1609_vm10  ;;  %v1218_v3 = vpop.xlane.xlu0 %1217 }
 0x162   : > { %v1451_v7 = vmax.f32 %v1419_v45, 0.0  ;;  %v1597_v22 = vmul.f32 %v5850_v34, %v1596_v51  ;;  %v6037_v50 = vpop.eup %3800  ;;  %vm1628_vm13 = vweird.f32 %v5839_v48  ;;  %v1693_v46 = vmul.f32 %v6022_v23, %v5950_v18  ;;  %v1822_v45 = vld [vmem:[%s5614_s25 + $0x50] sm:$0xff] }
 0x163   : > { %v1356_v8 = vmul.f32 0.0012755102, %v1236_v57  ;;  %v6042_v15 = vmul.f32 %v1827_v2, %v1651_v47  ;;  %v1611_v31 = vsel %vm1610_vm12, %v5802_v56, %v1607_v44  ;;  %v1703_v16 = vmul.f32 %v6037_v50, %v5973_v1 }
 0x164   : > { %vm1708_vm14 = vweird.f32 %v5973_v1  ;;  %v6048_v17 = vadd.f32 1e-05, %v1451_v7  ;;  %v6050_v51 = vmul.f32 %v1823_v11, %v1611_v31  ;;  %vm1599_vm15 = vweird.f32 %v5850_v34 }
 0x165   : > { %v1420_v63 = vsub.f32 %v1356_v8, %v5689_v32  ;;  %2049 = vperm.xlu0 %3759, %v6042_v15   ;;  %v1677_v56 = vmul.f32 %v5961_v61, %v1676_v58  ;;  %vm1679_vm1 = vweird.f32 %v5961_v61  ;;  %v1666_v19 = vsub.f32 1.5, %v6025_v36  ;;  %vm1600_vm2 = vmor %vm1598_vm6, %vm1599_vm15  ;;  %v1830_v32 = vld [vmem:[%s5614_s25 + $0x90] sm:$0xff]  ;;  %v1829_v36 = vld [vmem:[%s5614_s25 + $0x88] sm:$0xff] }
 0x166   : > { %v6059_v2 = vmul.f32 0.5, %v1654_v24  ;;  %v1704_v44 = vmul.f32 %v6037_v50, %v1703_v16  ;;  %3804 = vrsqrt.f32 %v6048_v17  ;;  %2029 = vperm.xlu1 %3757, %v6050_v51   ;;  %v1694_v57 = vmul.f32 %v6022_v23, %v1693_v46  ;;  %vm1680_vm3 = vmor %vm1678_vm7, %vm1679_vm1 }
 0x167   : > { %v1452_v47 = vmax.f32 %v1420_v63, 0.0  ;;  %v1354_v58 = vmul.f32 0.0012755102, %v1218_v3  ;;  %v1601_v11 = vsel %vm1600_vm2, %v5850_v34, %v1597_v22  ;;  %v6071_v24 = vpop.eup %3802  ;;  %v1681_v31 = vsel %vm1680_vm3, %v5961_v61, %v1677_v56  ;;  %v1254_v63 = vpop.xlane.xlu1 %1253  ;;  %v1826_v61 = vld [vmem:[%s5614_s25 + $0x70] sm:$0xff] }
 0x168   : > { %v1705_v7 = vmul.f32 0.5, %v1704_v44  ;;  %v6073_v8 = vmul.f32 %v1822_v45, %v1601_v11  ;;  %v1637_v5 = vmul.f32 %v5882_v6, %v1636_v26  ;;  %vm1668_vm4 = vweird.f32 %v5892_v0  ;;  %v1263_v11 = vpop.xlane.xlu2 %1262 }
 0x169   : > { %v1683_v46 = vmul.f32 %v6071_v24, %v6007_v49  ;;  %v6080_v16 = vadd.f32 1e-05, %v1452_v47  ;;  %v1418_v34 = vsub.f32 %v1354_v58, %v5625_v62  ;;  %v6083_v28 = vmul.f32 %v1830_v32, %v1681_v31 }
 0x16a   : > { %v1706_v22 = vsub.f32 1.5, %v1705_v7  ;;  %2024 = vperm.xlu2 %3758, %v6073_v8   ;;  %vm1639_vm5 = vweird.f32 %v5882_v6  ;;  %v1627_v26 = vmul.f32 %v5895_v59, %v1626_v30  ;;  %vm1629_vm6 = vweird.f32 %v5895_v59 }
 0x16b   : > { %vm1658_vm7 = vweird.f32 %v5925_v60  ;;  %v1695_v3 = vmul.f32 0.5, %v1694_v57  ;;  %v1684_v45 = vmul.f32 %v6071_v24, %v1683_v46  ;;  %3806 = vrsqrt.f32 %v6080_v16  ;;  %vm1640_vm8 = vmor %vm1638_vm11, %vm1639_vm5 }
 0x16c   : > { %v1450_v62 = vmax.f32 %v1418_v34, 0.0  ;;  %v6095_v56 = vpop.eup %3804  ;;  %v1358_v44 = vmul.f32 0.0012755102, %v1254_v63  ;;  %v1641_v32 = vsel %vm1640_vm8, %v5882_v6, %v1637_v5  ;;  %vm6100_vm9 = vmor %vm1628_vm13, %vm1629_vm6  ;;  %v1707_v57 = vmul.f32 %v6037_v50, %v1706_v22  ;;  %v1825_v6 = vld [vmem:[%s5614_s25 + $0x68] sm:$0xff] }
 0x16d   : > { %vm1709_vm10 = vweird.f32 %v6037_v50  ;;  %v1656_v47 = vsub.f32 1.5, %v6059_v2  ;;  %v1723_v29 = vmul.f32 %v6095_v56, %v6048_v17  ;;  %2064 = vperm.xlu0 %3759, %v6083_v28   ;;  %v6112_v48 = vmul.f32 %v1826_v61, %v1641_v32  ;;  %v1833_v34 = vld [vmem:[%s5614_s25 + $0xa8] sm:$0xff] }
 0x16e   : > { %v6109_v58 = vadd.f32 1e-05, %v1450_v62  ;;  %vm6117_vm11 = vmor %vm1708_vm14, %vm1709_vm10  ;;  %v1422_v31 = vsub.f32 %v1358_v44, %v5675_v27  ;;  %v1359_v2 = vmul.f32 0.0012755102, %v1263_v11  ;;  %v1631_v5 = vsel %vm6100_vm9, %v5895_v59, %v1627_v26 }
 0x16f   : > { %v1711_v46 = vsel %vm6117_vm11, %v6037_v50, %v1707_v57  ;;  %v1696_v22 = vsub.f32 1.5, %v1695_v3  ;;  %vm1698_vm12 = vweird.f32 %v5950_v18  ;;  %v1685_v1 = vmul.f32 0.5, %v1684_v45  ;;  %2044 = vperm.xlu1 %3757, %v6112_v48   ;;  %v1245_v50 = vpop.xlane.xlu0 %1244 }
 0x170   : > { %3808 = vrsqrt.f32 %v6109_v58  ;;  %v1724_v27 = vmul.f32 %v6095_v56, %v1723_v29  ;;  %v1454_v63 = vmax.f32 %v1422_v31, 0.0  ;;  %v1423_v61 = vsub.f32 %v1359_v2, %v5772_v4 }
 0x171   : > { %v6134_v59 = vmul.f32 %v1825_v6, %v1631_v5  ;;  %v6136_v26 = vpop.eup %3806  ;;  %v6138_v62 = vmul.f32 %v1833_v34, %v1711_v46  ;;  %v1667_v3 = vmul.f32 %v5936_v54, %v1666_v19  ;;  %vm1669_vm13 = vweird.f32 %v5936_v54  ;;  %v1828_v6 = vld [vmem:[%s5614_s25 + $0x80] sm:$0xff]  ;;  %v1281_v34 = vpop.xlane.xlu1 %1280 }
 0x172   : > { %v1657_v45 = vmul.f32 %v5982_v43, %v1656_v47  ;;  %v1733_v44 = vmul.f32 %v6136_v26, %v6080_v16  ;;  %v6147_v4 = vadd.f32 1e-05, %v1454_v63  ;;  %v1455_v32 = vmax.f32 %v1423_v61, 0.0  ;;  %vm1670_vm14 = vmor %vm1668_vm4, %vm1669_vm13  ;;  %v1832_v61 = vld [vmem:[%s5614_s25 + $0xa0] sm:$0xff] }
 0x173   : > { %v1357_v30 = vmul.f32 0.0012755102, %v1245_v50  ;;  %2039 = vperm.xlu2 %3758, %v6134_v59   ;;  %v1686_v57 = vsub.f32 1.5, %v1685_v1  ;;  %vm1688_vm15 = vweird.f32 %v6007_v49  ;;  %v1671_v19 = vsel %vm1670_vm14, %v5936_v54, %v1667_v3 }
 0x174   : > { %vm1659_vm1 = vweird.f32 %v5982_v43  ;;  %v6156_v47 = vmul.f32 0.5, %v1724_v27  ;;  %v1734_v29 = vmul.f32 %v6136_v26, %v1733_v44  ;;  %3810 = vrsqrt.f32 %v6147_v4  ;;  %v1290_v44 = vpop.xlane.xlu2 %1289 }
 0x175   : > { %v6160_v11 = vadd.f32 1e-05, %v1455_v32  ;;  %vm6164_vm2 = vmor %vm1658_vm7, %vm1659_vm1  ;;  %v1421_v54 = vsub.f32 %v1357_v30, %v5679_v25  ;;  %2079 = vperm.xlu0 %3759, %v6138_v62   ;;  %v6173_v31 = vmul.f32 %v1829_v36, %v1671_v19  ;;  %v1697_v60 = vmul.f32 %v6022_v23, %v1696_v22 }
 0x176   : > { %v6169_v7 = vpop.eup %3808  ;;  %v1661_v2 = vsel %vm6164_vm2, %v5982_v43, %v1657_v45  ;;  %v1735_v5 = vmul.f32 0.5, %v1734_v29  ;;  %vm1739_vm3 = vweird.f32 %v6136_v26  ;;  %v1361_v1 = vmul.f32 0.0012755102, %v1281_v34 }
 0x177   : > { %v1713_v46 = vmul.f32 %v6169_v7, %v6109_v58  ;;  %3812 = vrsqrt.f32 %v6160_v11  ;;  %v1453_v25 = vmax.f32 %v1421_v54, 0.0  ;;  %2059 = vperm.xlu1 %3757, %v6173_v31   ;;  %v6184_v27 = vmul.f32 %v1828_v6, %v1661_v2 }
 0x178   : > { %vm1699_vm4 = vweird.f32 %v6022_v23  ;;  %v1736_v43 = vsub.f32 1.5, %v1735_v5  ;;  %v1687_v50 = vmul.f32 %v6071_v24, %v1686_v57  ;;  %vm1689_vm6 = vweird.f32 %v6071_v24 }
 0x179   : > { %v1714_v22 = vmul.f32 %v6169_v7, %v1713_v46  ;;  %vm6190_vm5 = vmor %vm1698_vm12, %vm1699_vm4  ;;  %vm1738_vm7 = vweird.f32 %v6080_v16  ;;  %v6198_v3 = vadd.f32 1e-05, %v1453_v25  ;;  %v1425_v45 = vsub.f32 %v1361_v1, %v5693_v42  ;;  %v1836_v42 = vld [vmem:[%s5614_s25 + $0xc0] sm:$0xff]  ;;  %v1272_v25 = vpop.xlane.xlu0 %1271 }
 0x17a   : > { %v1701_v18 = vsel %vm6190_vm5, %v6022_v23, %v1697_v60  ;;  %v6204_v32 = vpop.eup %3810  ;;  %v1726_v30 = vsub.f32 1.5, %v6156_v47  ;;  %v1362_v19 = vmul.f32 0.0012755102, %v1290_v44  ;;  %v1737_v57 = vmul.f32 %v6136_v26, %v1736_v43  ;;  %vm6211_vm8 = vmor %vm1738_vm7, %vm1739_vm3  ;;  %v1831_v43 = vld [vmem:[%s5614_s25 + $0x98] sm:$0xff] }
 0x17b   : > { %v1715_v36 = vmul.f32 0.5, %v1714_v22  ;;  %2054 = vperm.xlu2 %3758, %v6184_v27   ;;  %v1753_v23 = vmul.f32 %v6204_v32, %v6147_v4  ;;  %3814 = vrsqrt.f32 %v6198_v3  ;;  %v1457_v47 = vmax.f32 %v1425_v45, 0.0  ;;  %vm6225_vm9 = vmor %vm1688_vm15, %vm1689_vm6 }
 0x17c   : > { %v6219_v29 = vmul.f32 %v1832_v61, %v1701_v18  ;;  %v1426_v2 = vsub.f32 %v1362_v19, %v5776_v20  ;;  %v1741_v60 = vsel %vm6211_vm8, %v6136_v26, %v1737_v57  ;;  %v1691_v5 = vsel %vm6225_vm9, %v6071_v24, %v1687_v50 }
 0x17d   : > { %v6229_v6 = vpop.eup %3812  ;;  %v1716_v54 = vsub.f32 1.5, %v1715_v36  ;;  %v1754_v46 = vmul.f32 %v6204_v32, %v1753_v23  ;;  %v6241_v34 = vadd.f32 1e-05, %v1457_v47  ;;  %v6243_v1 = vmul.f32 %v1836_v42, %v1741_v60  ;;  %v1835_v23 = vld [vmem:[%s5614_s25 + $0xb8] sm:$0xff] }
 0x17e   : > { %v1763_v49 = vmul.f32 %v6229_v6, %v6160_v11  ;;  %v1392_v20 = vmul.f32 %v5696_v21, %v5696_v21  ;;  %vm1728_vm10 = vweird.f32 %v6048_v17  ;;  %v1458_v26 = vmax.f32 %v1426_v2, 0.0 }
 0x17f   : > { %v1360_v22 = vmul.f32 0.0012755102, %v1272_v25  ;;  %v1755_v63 = vmul.f32 0.5, %v1754_v46  ;;  %3816 = vrsqrt.f32 %v6241_v34  ;;  %2094 = vperm.xlu0 %3759, %v6243_v1   ;;  %2074 = vperm.xlu1 %3757, %v6219_v29   ;;  %v1727_v61 = vmul.f32 %v6095_v56, %v1726_v30 }
 0x180   : > { %v1764_v24 = vmul.f32 %v6229_v6, %v1763_v49  ;;  %v6254_v50 = vadd.f32 1e-05, %v1458_v26  ;;  %v6256_v44 = vmul.f32 %v1831_v43, %v1691_v5  ;;  %vm1729_vm11 = vweird.f32 %v6095_v56  ;;  %v1834_v49 = vld [vmem:[%s5614_s25 + $0xb0] sm:$0xff] }
 0x181   : > { %v1424_v45 = vsub.f32 %v1360_v22, %v1392_v20  ;;  %v6259_v18 = vpop.eup %3814  ;;  %v1756_v36 = vsub.f32 1.5, %v1755_v63  ;;  %v1717_v57 = vmul.f32 %v6169_v7, %v1716_v54  ;;  %vm1719_vm12 = vweird.f32 %v6169_v7  ;;  %vm1730_vm13 = vmor %vm1728_vm10, %vm1729_vm11  ;;  %v1299_v2 = vpop.xlane.xlu0 %1298 }
 0x182   : > { %v1765_v19 = vmul.f32 0.5, %v1764_v24  ;;  %v6264_v16 = vmul.f32 0.0012755102, %v5448_v13  ;;  %v1743_v30 = vmul.f32 %v6259_v18, %v6198_v3  ;;  %3818 = vrsqrt.f32 %v6254_v50 }
 0x183   : > { %v1456_v42 = vmax.f32 %v1424_v45, 0.0  ;;  %2069 = vperm.xlu2 %3758, %v6256_v44   ;;  %vm1718_vm14 = vweird.f32 %v6109_v58  ;;  %vm1769_vm15 = vweird.f32 %v6229_v6  ;;  %v1731_v13 = vsel %vm1730_vm13, %v6095_v56, %v1727_v61  ;;  %v1839_v56 = vld [vmem:[%s5614_s25 + $0xd8] sm:$0xff] }
 0x184   : > { %v1766_v47 = vsub.f32 1.5, %v1765_v19  ;;  %vm1768_vm1 = vweird.f32 %v6160_v11  ;;  %v1744_v0 = vmul.f32 %v6259_v18, %v1743_v30  ;;  %vm6282_vm2 = vmor %vm1718_vm14, %vm1719_vm12  ;;  %vm1759_vm3 = vweird.f32 %v6204_v32 }
 0x185   : > { %v6278_v54 = vadd.f32 1e-05, %v1456_v42  ;;  %v6287_v58 = vpop.eup %3816  ;;  %v6291_v5 = vmul.f32 %v1835_v23, %v1731_v13  ;;  %v1721_v46 = vsel %vm6282_vm2, %v6169_v7, %v1717_v57  ;;  %v1757_v25 = vmul.f32 %v6204_v32, %v1756_v36  ;;  %vm1770_vm4 = vmor %vm1768_vm1, %vm1769_vm15  ;;  %v1838_v57 = vld [vmem:[%s5614_s25 + $0xd0] sm:$0xff] }
 0x186   : > { %v1767_v60 = vmul.f32 %v6229_v6, %v1766_v47  ;;  %v1745_v43 = vmul.f32 0.5, %v1744_v0  ;;  %v1783_v20 = vmul.f32 %v6287_v58, %v6241_v34  ;;  %v1395_v26 = vmul.f32 %v6264_v16, %v6264_v16 }
 0x187   : > { %3820 = vrsqrt.f32 %v6278_v54  ;;  %vm1758_vm5 = vweird.f32 %v6147_v4  ;;  %v1363_v7 = vmul.f32 0.0012755102, %v1299_v2  ;;  %2089 = vperm.xlu1 %3757, %v6291_v5   ;;  %v6313_v36 = vmul.f32 %v1834_v49, %v1721_v46 }
 0x188   : > { %v1771_v22 = vsel %vm1770_vm4, %v6229_v6, %v1767_v60  ;;  %v3819_v63 = vpop.eup %3818  ;;  %v1746_v24 = vsub.f32 1.5, %v1745_v43  ;;  %v1784_v61 = vmul.f32 %v6287_v58, %v1783_v20  ;;  %vm1760_vm6 = vmor %vm1758_vm5, %vm1759_vm3  ;;  %vm1749_vm7 = vweird.f32 %v6259_v18  ;;  %v1842_v20 = vld [vmem:[%s5614_s25 + $0xf0] sm:$0xff] }
 0x189   : > { %v6311_v45 = vmul.f32 %v1839_v56, %v1771_v22  ;;  %v1793_v11 = vmul.f32 %v3819_v63, %v6254_v50  ;;  %v1427_v19 = vsub.f32 %v1363_v7, %v1395_v26  ;;  %v1761_v4 = vsel %vm1760_vm6, %v6204_v32, %v1757_v25  ;;  %v1837_v56 = vld [vmem:[%s5614_s25 + $0xc8] sm:$0xff] }
 0x18a   : > { %v1785_v6 = vmul.f32 0.5, %v1784_v61  ;;  %v1747_v30 = vmul.f32 %v6259_v18, %v1746_v24  ;;  %vm1748_vm8 = vweird.f32 %v6198_v3  ;;  %v6325_v0 = vmul.f32 %v1838_v57, %v1761_v4  ;;  %v1841_v7 = vld [vmem:[%s5614_s25 + $0xe8] sm:$0xff] }
 0x18b   : > { %2109 = vperm.xlu0 %3759, %v6311_v45   ;;  %2084 = vperm.xlu2 %3758, %v6313_v36   ;;  %v1794_v42 = vmul.f32 %v3819_v63, %v1793_v11  ;;  %v1459_v23 = vmax.f32 %v1427_v19, 0.0  ;;  %vm1750_vm9 = vmor %vm1748_vm8, %vm1749_vm7  ;;  %vm1789_vm10 = vweird.f32 %v6287_v58  ;;  %vm1799_vm11 = vweird.f32 %v3819_v63  ;;  %v1840_v19 = vld [vmem:[%s5614_s25 + $0xe0] sm:$0xff] }
 0x18c   : > { %v1786_v13 = vsub.f32 1.5, %v1785_v6  ;;  %v1751_v60 = vsel %vm1750_vm9, %v6259_v18, %v1747_v30  ;;  %vm1788_vm12 = vweird.f32 %v6241_v34  ;;  %vm1798_vm13 = vweird.f32 %v6254_v50  ;;  %v1877_v6 = vld [vmem:[%s6353_s28 + $0x8] sm:$0xff] }
 0x18d   : > { %v3821_v47 = vpop.eup %3820  ;;  %v1795_v32 = vmul.f32 0.5, %v1794_v42  ;;  %v1491_v2 = vadd.f32 1e-05, %v1459_v23  ;;  %v6334_v25 = vmul.f32 %v1837_v56, %v1751_v60  ;;  %vm1790_vm14 = vmor %vm1788_vm12, %vm1789_vm10  ;;  %vm1778_vm2 = vweird.f32 %v6278_v54  ;;  %v1876_v23 = vld [vmem:[%s6353_s28] sm:$0xff] }
 0x18e   : > { %v1773_v17 = vmul.f32 %v3821_v47, %v6278_v54  ;;  %v1787_v46 = vmul.f32 %v6287_v58, %v1786_v13  ;;  %vm1800_vm15 = vmor %vm1798_vm13, %vm1799_vm11  ;;  %vm1779_vm1 = vweird.f32 %v3821_v47  ;;  %v1908_v30 = vmul.f32 %v5667_v35, %v5439_v39  ;;  %v1880_v60 = vld [vmem:[%s6353_s28 + $0x20] sm:$0xff] }
 0x18f   : > { %v1796_v3 = vsub.f32 1.5, %v1795_v32  ;;  %3822 = vrsqrt.f32 %v1491_v2  ;;  %2104 = vperm.xlu1 %3757, %v6325_v0   ;;  %vm1780_vm3 = vmor %vm1778_vm2, %vm1779_vm1  ;;  %vm1808_vm5 = vweird.f32 %v1491_v2  ;;  %v1912_v39 = vmul.f32 %v5860_v12, %v5446_v37  ;;  %v8200_v12 = vld [vmem:[#allocation209_spill] sm:$0xff] }
 0x190   : > { %v1774_v49 = vmul.f32 %v3821_v47, %v1773_v17  ;;  %v1791_v26 = vsel %vm1790_vm14, %v6287_v58, %v1787_v46  ;;  %v1940_v17 = vsub.f32 %v1876_v23, %v1908_v30  ;;  %v1911_v46 = vmul.f32 %v5848_v52, %v5457_v41  ;;  %v8201_v52 = vld [vmem:[#allocation210_spill] sm:$0xff]  ;;  %v8205_v30 = vld [vmem:[#allocation233_spill] sm:$0xff]  ;;  %v1885_v23 = vld [vmem:[%s6353_s28 + $0x48] sm:$0xff] }
 0x191   : > { %v1797_v18 = vmul.f32 %v3819_v63, %v1796_v3  ;;  %v6344_v50 = vmul.f32 %v1841_v7, %v1791_v26  ;;  %v1879_v3 = vld [vmem:[%s6353_s28 + $0x18] sm:$0xff]  ;;  %v1915_v26 = vmul.f32 %v6002_v10, %v8200_v12 }
 0x192   : > { %v1775_v43 = vmul.f32 0.5, %v1774_v49  ;;  %v1943_v49 = vsub.f32 %v1879_v3, %v1911_v46  ;;  %v1883_v7 = vld [vmem:[%s6353_s28 + $0x38] sm:$0xff]  ;;  %v8208_v46 = vld [vmem:[#allocation216_spill] sm:$0xff] }
 0x193   : > { %2099 = vperm.xlu2 %3758, %v6334_v25   ;;  %v1801_v24 = vsel %vm1800_vm15, %v3819_v63, %v1797_v18  ;;  %v1909_v63 = vmul.f32 %v5784_v9, %v5460_v14  ;;  %v1843_v9 = vld [vmem:[%s5614_s25 + $0xf8] sm:$0xff]  ;;  %v1920_v3 = vmul.f32 %v5965_v53, %v8208_v46 }
 0x194   : > { %v1776_v22 = vsub.f32 1.5, %v1775_v43  ;;  %v6341_v34 = vmul.f32 %v1842_v20, %v1801_v24  ;;  %v8199_v43 = vld [vmem:[#allocation232_spill] sm:$0xff]  ;;  %v8217_v46 = vld [vmem:[#allocation225_spill] sm:$0xff] }
 0x195   : > { %v3823_v61 = vpop.eup %3822  ;;  %v1941_v32 = vsub.f32 %v1877_v6, %v1909_v63  ;;  %v1910_v18 = vmul.f32 %v8199_v43, %v5451_v55  ;;  %v1878_v20 = vld [vmem:[%s6353_s28 + $0x10] sm:$0xff]  ;;  %v8202_v55 = vld [vmem:[#allocation207_spill] sm:$0xff] }
 0x196   : > { %v1777_v11 = vmul.f32 %v3821_v47, %v1776_v22  ;;  %v1803_v4 = vmul.f32 %v3823_v61, %v1491_v2  ;;  %2124 = vperm.xlu0 %3759, %v6341_v34   ;;  %vm1809_vm4 = vweird.f32 %v3823_v61  ;;  %v1944_v2 = vsub.f32 %v1880_v60, %v1912_v39  ;;  %v1882_v24 = vld [vmem:[%s6353_s28 + $0x30] sm:$0xff] }
 0x197   : > { %2119 = vperm.xlu1 %3757, %v6344_v50   ;;  %vm1810_vm6 = vmor %vm1808_vm5, %vm1809_vm4  ;;  %v1942_v41 = vsub.f32 %v1878_v20, %v1910_v18  ;;  %v1914_v22 = vmul.f32 %v5922_v38, %v8201_v52  ;;  %v1886_v63 = vld [vmem:[%s6353_s28 + $0x50] sm:$0xff]  ;;  %v8204_v38 = vld [vmem:[#allocation213_spill] sm:$0xff] }
 0x198   : > { %v1781_v58 = vsel %vm1780_vm3, %v3821_v47, %v1777_v11  ;;  %v1804_v54 = vmul.f32 %v3823_v61, %v1803_v4  ;;  %v1881_v4 = vld [vmem:[%s6353_s28 + $0x28] sm:$0xff] }
 0x199   : > { %v6358_v57 = vmul.f32 %v1840_v19, %v1781_v58  ;;  %v6365_v47 = vpop.permute.xlu2 %1979  ;;  %v1946_v11 = vsub.f32 %v1882_v24, %v1914_v22  ;;  %v1913_v19 = vmul.f32 %v5903_v40, %v8202_v55  ;;  %v8203_v58 = vld [vmem:[#allocation212_spill] sm:$0xff]  ;;  %v8209_v20 = vld [vmem:[#allocation211_spill] sm:$0xff] }
 0x19a   : > { %v1805_v42 = vmul.f32 0.5, %v1804_v54  ;;  %v1918_v10 = vmul.f32 %v6073_v8, %v8203_v58  ;;  %v1884_v8 = vld [vmem:[%s6353_s28 + $0x40] sm:$0xff]  ;;  %v1919_v12 = vmul.f32 %v6050_v51, %v8209_v20  ;;  %v8211_v22 = vld [vmem:[#allocation219_spill] sm:$0xff]  ;;  %v8218_v20 = vld [vmem:[#allocation220_spill] sm:$0xff] }
 0x19b   : > { %2114 = vperm.xlu2 %3758, %v6358_v57   ;;  %v1945_v6 = vsub.f32 %v1881_v4, %v1913_v19  ;;  %v1923_v24 = vmul.f32 %v6042_v15, %v8211_v22  ;;  %v8212_v4 = vld [vmem:[#allocation214_spill] sm:$0xff]  ;;  %v8220_v22 = vld [vmem:[#allocation228_spill] sm:$0xff] }
 0x19c   : > { %v1806_v13 = vsub.f32 1.5, %v1805_v42  ;;  %v1917_v42 = vmul.f32 %v8205_v30, %v8204_v38  ;;  %v1922_v58 = vmul.f32 %v6112_v48, %v8212_v4  ;;  %v8214_v30 = vld [vmem:[#allocation222_spill] sm:$0xff]  ;;  %v8221_v4 = vld [vmem:[#allocation223_spill] sm:$0xff] }
 0x19e   : > { %2363 = vperm.xlu0 %3759, %v1941_v32   ;;  %v1807_v14 = vmul.f32 %v3823_v61, %v1806_v13  ;;  %v1950_v13 = vsub.f32 %v1886_v63, %v1918_v10  ;;  %v1949_v40 = vsub.f32 %v1885_v23, %v1917_v42  ;;  %v8206_v32 = vld [vmem:[#allocation208_spill] sm:$0xff]  ;;  %v8213_v63 = vld [vmem:[#allocation221_spill] sm:$0xff]  ;;  %v1926_v42 = vmul.f32 %v6083_v28, %v8214_v30 }
 0x19f   : > { %2358 = vperm.xlu1 %3757, %v1940_v17   ;;  %v1916_v17 = vmul.f32 %v5987_v33, %v8206_v32  ;;  %v1927_v15 = vmul.f32 %v6256_v44, %v8213_v63  ;;  %v1894_v23 = vld [vmem:[%s6353_s28 + $0x90] sm:$0xff]  ;;  %v8215_v32 = vld [vmem:[#allocation217_spill] sm:$0xff] }
 0x1a0   : > { %v1811_v35 = vsel %vm1810_vm6, %v3823_v61, %v1807_v14  ;;  %v1947_v61 = vsub.f32 %v1883_v7, %v1915_v26  ;;  %v8210_v7 = vld [vmem:[#allocation218_spill] sm:$0xff] }
 0x1a1   : > { %v6371_v56 = vmul.f32 %v1843_v9, %v1811_v35  ;;  %v6401_v14 = vpop.permute.xlu1 %1974  ;;  %v8207_v9 = vld [vmem:[#allocation215_spill] sm:$0xff]  ;;  %v1948_v60 = vsub.f32 %v1884_v8, %v1916_v17  ;;  %v1924_v53 = vmul.f32 %v6184_v27, %v8210_v7  ;;  %v1890_v27 = vld [vmem:[%s6353_s28 + $0x70] sm:$0xff]  ;;  %v1925_v17 = vmul.f32 %v6173_v31, %v8215_v32 }
 0x1a2   : > { %v6380_v37 = vpop.permute.xlu2 %1989  ;;  %v1921_v39 = vmul.f32 %v6134_v59, %v8207_v9  ;;  %v1889_v35 = vld [vmem:[%s6353_s28 + $0x68] sm:$0xff]  ;;  %v1887_v59 = vld [vmem:[%s6353_s28 + $0x58] sm:$0xff]  ;;  %v1954_v38 = vsub.f32 %v1890_v27, %v1922_v58  ;;  %v8216_v9 = vld [vmem:[#allocation224_spill] sm:$0xff]  ;;  %v1931_v58 = vmul.f32 %v6291_v5, %v8221_v4  ;;  %v1936_v27 = vmul.f32 %v6358_v57, %v5696_v21 }
 0x1a3   : > { %2129 = vperm.xlu2 %3758, %v6371_v56   ;;  %v1951_v52 = vsub.f32 %v1887_v59, %v1919_v12  ;;  %v1893_v8 = vld [vmem:[%s6353_s28 + $0x88] sm:$0xff]  ;;  %v1928_v12 = vmul.f32 %v6219_v29, %v8218_v20  ;;  %v1902_v57 = vld [vmem:[%s6353_s28 + $0xd0] sm:$0xff]  ;;  %v1939_v32 = vmul.f32 %v6371_v56, %v6264_v16  ;;  %v3898_v4 = vld [vmem:[%s3964_s21 + $0x80] sm:$0xff] }
 0x1a4   : > { %v1953_v33 = vsub.f32 %v1889_v35, %v1921_v39  ;;  %v1930_v39 = vmul.f32 %v6313_v36, %v8216_v9  ;;  %v1898_v35 = vld [vmem:[%s6353_s28 + $0xb0] sm:$0xff]  ;;  %v1896_v36 = vld [vmem:[%s6353_s28 + $0xa0] sm:$0xff]  ;;  %v8219_v7 = vld [vmem:[#allocation227_spill] sm:$0xff] }
 0x1a5   : > { %v8224_v9 = vld [vmem:[#allocation231_spill] sm:$0xff] }
 0x1a6   : > { %2378 = vperm.xlu0 %3759, %v1944_v2   ;;  %v1962_v31 = vsub.f32 %v1898_v35, %v1930_v39  ;;  %v1938_v39 = vmul.f32 %v6341_v34, %v8224_v9  ;;  %v1905_v56 = vld [vmem:[%s6353_s28 + $0xe8] sm:$0xff]  ;;  %v2758_v9 = vld [vmem:[%s6523_s5 + $0x90] sm:$0xff] }
 0x1a7   : > { %2373 = vperm.xlu1 %3757, %v1943_v49   ;;  %v1888_v49 = vld [vmem:[%s6353_s28 + $0x60] sm:$0xff] }
 0x1a8   : > { %v1952_v18 = vsub.f32 %v1888_v49, %v1920_v3  ;;  %v1929_v3 = vmul.f32 %v6138_v62, %v8217_v46  ;;  %v1897_v49 = vld [vmem:[%s6353_s28 + $0xa8] sm:$0xff] }
 0x1aa   : > { %v6393_v54 = vpop.permute.xlu2 %1999 }
 0x1ab   : > { %2368 = vperm.xlu2 %3758, %v1942_v41   ;;  %v1892_v41 = vld [vmem:[%s6353_s28 + $0x80] sm:$0xff] }
 0x1ae   : > { %2393 = vperm.xlu0 %3759, %v1947_v61   ;;  %v6412_v43 = vpop.permute.xlu0 %1984  ;;  %v1891_v61 = vld [vmem:[%s6353_s28 + $0x78] sm:$0xff] }
 0x1af   : > { %2388 = vperm.xlu1 %3757, %v1946_v11   ;;  %v1956_v11 = vsub.f32 %v1892_v41, %v1924_v53  ;;  %v1955_v19 = vsub.f32 %v1891_v61, %v1923_v24  ;;  %v1933_v53 = vmul.f32 %v6334_v25, %v8219_v7  ;;  %v1901_v41 = vld [vmem:[%s6353_s28 + $0xc8] sm:$0xff]  ;;  %v1932_v24 = vmul.f32 %v6243_v1, %v8220_v22  ;;  %v1900_v61 = vld [vmem:[%s6353_s28 + $0xc0] sm:$0xff]  ;;  %v1899_v25 = vld [vmem:[%s6353_s28 + $0xb8] sm:$0xff] }
 0x1b0   : > { %v1904_v1 = vld [vmem:[%s6353_s28 + $0xe0] sm:$0xff] }
 0x1b1   : > { %v1965_v29 = vsub.f32 %v1901_v41, %v1933_v53  ;;  %v1968_v5 = vsub.f32 %v1904_v1, %v1936_v27  ;;  %v3894_v53 = vld [vmem:[%s3964_s21 + $0x38] sm:$0xff]  ;;  %v2754_v1 = vld [vmem:[%s6523_s5 + $0x70] sm:$0xff] }
 0x1b2   : > { %v6527_v41 = vmul.f32 %v3894_v53, %v6365_v47 }
 0x1b3   : > { %2383 = vperm.xlu2 %3758, %v1945_v6   ;;  %v1895_v6 = vld [vmem:[%s6353_s28 + $0x98] sm:$0xff] }
 0x1b6   : > { %2408 = vperm.xlu0 %3759, %v1950_v13   ;;  %v1959_v13 = vsub.f32 %v1895_v6, %v1927_v15  ;;  %v1963_v15 = vsub.f32 %v1899_v25, %v1931_v58  ;;  %v2148_v58 = vmul.f32 %v3898_v4, %v6412_v43  ;;  %v3899_v25 = vld [vmem:[%s3964_s21 + $0x88] sm:$0xff] }
 0x1b7   : > { %2403 = vperm.xlu1 %3757, %v1949_v40   ;;  %v1958_v40 = vsub.f32 %v1894_v23, %v1926_v42  ;;  %v1903_v42 = vld [vmem:[%s6353_s28 + $0xd8] sm:$0xff]  ;;  %v2149_v27 = vmul.f32 %v3899_v25, %v6412_v43 }
 0x1b9   : > { %v6409_v2 = vpop.permute.xlu2 %2009 }
 0x1bb   : > { %2398 = vperm.xlu2 %3758, %v1948_v60   ;;  %v1957_v60 = vsub.f32 %v1893_v8, %v1925_v17  ;;  %v1907_v8 = vld [vmem:[%s6353_s28 + $0xf8] sm:$0xff] }
 0x1bc   : > { %v6417_v26 = vpop.permute.xlu1 %1994  ;;  %v1971_v46 = vsub.f32 %v1907_v8, %v1939_v32  ;;  %v2756_v32 = vld [vmem:[%s6523_s5 + $0x80] sm:$0xff] }
 0x1be   : > { %2423 = vperm.xlu0 %3759, %v1953_v33  }
 0x1bf   : > { %2418 = vperm.xlu1 %3757, %v1952_v18   ;;  %v1961_v18 = vsub.f32 %v1897_v49, %v1929_v3  ;;  %v8225_v49 = vld [vmem:[#allocation229_spill] sm:$0xff] }
 0x1c0   : > { %v6427_v55 = vpop.permute.xlu0 %2019  ;;  %v1937_v16 = vmul.f32 %v6344_v50, %v8225_v49 }
 0x1c3   : > { %2413 = vperm.xlu2 %3758, %v1951_v52   ;;  %v1960_v52 = vsub.f32 %v1896_v36, %v1928_v12 }
 0x1c4   : > { %v6425_v51 = vpop.permute.xlu2 %2024 }
 0x1c6   : > { %2438 = vperm.xlu0 %3759, %v1956_v11   ;;  %v6432_v10 = vpop.permute.xlu1 %2004 }
 0x1c7   : > { %2433 = vperm.xlu1 %3757, %v1955_v19   ;;  %v1964_v19 = vsub.f32 %v1900_v61, %v1932_v24  ;;  %v3896_v24 = vld [vmem:[%s3964_s21 + $0x70] sm:$0xff] }
 0x1c8   : > { %v2146_v61 = vmul.f32 %v3896_v24, %v6412_v43 }
 0x1cb   : > { %2428 = vperm.xlu2 %3758, %v1954_v38   ;;  %v8222_v38 = vld [vmem:[#allocation230_spill] sm:$0xff] }
 0x1cc   : > { %v1935_v30 = vmul.f32 %v6311_v45, %v8222_v38 }
 0x1cd   : > { %v6440_v48 = vpop.permute.xlu2 %2039  ;;  %v6445_v44 = vpop.permute.xlu0 %2034 }
 0x1ce   : > { %2453 = vperm.xlu0 %3759, %v1959_v13   ;;  %v1967_v13 = vsub.f32 %v1903_v42, %v1935_v30  ;;  %v3901_v30 = vld [vmem:[%s3964_s21 + $0x90] sm:$0xff] }
 0x1cf   : > { %2448 = vperm.xlu1 %3757, %v1958_v40   ;;  %v6449_v28 = vpop.permute.xlu1 %2014  ;;  %v8223_v40 = vld [vmem:[#allocation226_spill] sm:$0xff]  ;;  %v2150_v42 = vmul.f32 %v3901_v30, %v6412_v43 }
 0x1d0   : > { %v1934_v21 = vmul.f32 %v6325_v0, %v8223_v40  ;;  %v3903_v40 = vld [vmem:[%s3964_s21 + $0xa0] sm:$0xff] }
 0x1d2   : > { %v1966_v17 = vsub.f32 %v1902_v57, %v1934_v21  ;;  %v2152_v21 = vmul.f32 %v3903_v40, %v6412_v43  ;;  %v2755_v57 = vld [vmem:[%s6523_s5 + $0x78] sm:$0xff] }
 0x1d3   : > { %2443 = vperm.xlu2 %3758, %v1957_v60   ;;  %v1906_v60 = vld [vmem:[%s6353_s28 + $0xf0] sm:$0xff] }
 0x1d4   : > { %v1970_v3 = vsub.f32 %v1906_v60, %v1938_v39  ;;  %v2759_v39 = vld [vmem:[%s6523_s5 + $0x98] sm:$0xff]  ;;  %v2760_v60 = vld [vmem:[%s6523_s5 + $0xa0] sm:$0xff] }
 0x1d5   : > { %v6455_v33 = vpop.permute.xlu2 %2054 }
 0x1d6   : > { %2468 = vperm.xlu0 %3759, %v1962_v31   ;;  %v1969_v31 = vsub.f32 %v1905_v56, %v1937_v16  ;;  %v3904_v56 = vld [vmem:[%s3964_s21 + $0x50] sm:$0xff] }
 0x1d7   : > { %2463 = vperm.xlu1 %3757, %v1961_v18   ;;  %v6460_v59 = vpop.permute.xlu0 %2049 }
 0x1d8   : > { %v6464_v62 = vpop.permute.xlu1 %2029 }
 0x1db   : > { %2458 = vperm.xlu2 %3758, %v1960_v52   ;;  %v3895_v52 = vld [vmem:[%s3964_s21 + $0x40] sm:$0xff] }
 0x1dc   : > { %v6531_v22 = vmul.f32 %v3895_v52, %v6365_v47 }
 0x1dd   : > { %v6470_v11 = vpop.permute.xlu2 %2069 }
 0x1de   : > { %2483 = vperm.xlu0 %3759, %v1965_v29   ;;  %v3897_v29 = vld [vmem:[%s3964_s21 + $0x78] sm:$0xff] }
 0x1df   : > { %2478 = vperm.xlu1 %3757, %v1964_v19   ;;  %v6477_v63 = vpop.permute.xlu0 %2064  ;;  %v2147_v19 = vmul.f32 %v3897_v29, %v6412_v43 }
 0x1e1   : > { %v6480_v6 = vpop.permute.xlu1 %2044 }
 0x1e3   : > { %2473 = vperm.xlu2 %3758, %v1963_v15   ;;  %v3900_v15 = vld [vmem:[%s3964_s21 + $0x48] sm:$0xff] }
 0x1e4   : > { %v6544_v38 = vmul.f32 %v3900_v15, %v6365_v47 }
 0x1e5   : > { %v6485_v23 = vpop.permute.xlu2 %2084 }
 0x1e6   : > { %2498 = vperm.xlu0 %3759, %v1968_v5   ;;  %v3902_v5 = vld [vmem:[%s3964_s21 + $0x98] sm:$0xff] }
 0x1e7   : > { %2493 = vperm.xlu1 %3757, %v1967_v13   ;;  %v6497_v35 = vpop.permute.xlu0 %2079  ;;  %v2151_v13 = vmul.f32 %v3902_v5, %v6412_v43 }
 0x1e9   : > { %v6493_v45 = vpop.permute.xlu1 %2059 }
 0x1eb   : > { %2488 = vperm.xlu2 %3758, %v1966_v17   ;;  %v2757_v17 = vld [vmem:[%s6523_s5 + $0x88] sm:$0xff] }
 0x1ed   : > { %v6500_v0 = vpop.permute.xlu2 %2099 }
 0x1ee   : > { %2513 = vperm.xlu0 %3759, %v1971_v46  }
 0x1ef   : > { %2508 = vperm.xlu1 %3757, %v1970_v3  }
 0x1f1   : > { %v6505_v34 = vpop.permute.xlu1 %2074  ;;  %v6509_v20 = vpop.permute.xlu0 %2094 }
 0x1f3   : > { %2503 = vperm.xlu2 %3758, %v1969_v31   ;;  %v6560_v31 = vmul.f32 %v3904_v56, %v6365_v47 }
 0x1f5   : > { %v6507_v18 = vpop.permute.xlu2 %2114 }
 0x1f6   : > { %8226 = vst [vmem:[#allocation232_spill] sm:$0xff] %v6507_v18  ;;  %v8233_v18 = vld [vmem:[#allocation3_spill] sm:$0xff] }
 0x1f9   : > { %v6511_v12 = vpop.permute.xlu1 %2089 }
 0x1fd   : > { %v6513_v36 = vpop.permute.xlu2 %2129  ;;  %v6515_v50 = vpop.permute.xlu0 %2109 }
 0x1fe   : > { %8227 = vst [vmem:[#allocation209_spill] sm:$0xff] %v6513_v36 }
 0x1ff   : > { %8228 = vst [vmem:[#allocation210_spill] sm:$0xff] %v6515_v50 }
 0x201   : > { %v6517_v7 = vpop.permute.xlu1 %2104 }
 0x205   : > { %v2369_v8 = vpop.permute.xlu2 %2368 }
 0x206   : > { %v2530_v46 = vadd.f32 %v2369_v8, %v2146_v61  ;;  %v2531_v3 = vadd.f32 %v2369_v8, %v2147_v19  ;;  %v2532_v49 = vadd.f32 %v2369_v8, %v2148_v58  ;;  %v2533_v16 = vadd.f32 %v2369_v8, %v2149_v27  ;;  %v3905_v61 = vld [vmem:[%s3964_s21 + $0x58] sm:$0xff] }
 0x207   : > { %v2534_v53 = vadd.f32 %v2369_v8, %v2150_v42  ;;  %v2535_v43 = vadd.f32 %v2369_v8, %v2151_v13  ;;  %v2536_v52 = vadd.f32 %v2369_v8, %v2152_v21  ;;  %v6572_v19 = vmul.f32 %v3905_v61, %v6365_v47  ;;  %v3906_v42 = vld [vmem:[%s3964_s21 + $0x60] sm:$0xff] }
 0x208   : > { %v2978_v24 = vadd.f32 %v2754_v1, %v2530_v46  ;;  %v2979_v29 = vadd.f32 %v2755_v57, %v2531_v3  ;;  %v2980_v4 = vadd.f32 %v2756_v32, %v2532_v49  ;;  %v2981_v25 = vadd.f32 %v2757_v17, %v2533_v16  ;;  %v6562_v15 = vpop.permute.xlu0 %2124  ;;  %v3907_v57 = vld [vmem:[%s3964_s21 + $0x68] sm:$0xff]  ;;  %v3908_v17 = vld [vmem:[%s3964_s21 + $0x118] sm:$0xff]  ;;  %v3911_v49 = vld [vmem:[%s3964_s21 + $0x130] sm:$0xff] }
 0x209   : > { %8229 = vst [vmem:[#allocation207_spill] sm:$0xff] %v6562_v15  ;;  %v2982_v58 = vadd.f32 %v2758_v9, %v2534_v53  ;;  %v2983_v27 = vadd.f32 %v2759_v39, %v2535_v43  ;;  %v2984_v1 = vadd.f32 %v2760_v60, %v2536_v52  ;;  %v6574_v30 = vpop.permute.xlu1 %2119  ;;  %v6578_v5 = vmul.f32 %v3906_v42, %v6365_v47  ;;  %v3909_v9 = vld [vmem:[%s3964_s21 + $0x120] sm:$0xff]  ;;  %v3910_v46 = vld [vmem:[%s3964_s21 + $0x128] sm:$0xff]  ;;  %v2775_v43 = vld [vmem:[%s6523_s5 + $0x118] sm:$0xff] }
 0x20a   : > { %v3202_v13 = vmax.f32 %v2978_v24, 0.0  ;;  %v3203_v40 = vmax.f32 %v2979_v29, 0.0  ;;  %v3204_v21 = vmax.f32 %v2980_v4, 0.0  ;;  %v6582_v32 = vmul.f32 %v3907_v57, %v6365_v47  ;;  %v3912_v47 = vld [vmem:[%s3964_s21 + $0x138] sm:$0xff]  ;;  %v8231_v29 = vld [vmem:[#allocation15_spill] sm:$0xff]  ;;  %v2776_v42 = vld [vmem:[%s6523_s5 + $0x120] sm:$0xff] }
 0x20b   : > { %v2167_v8 = vmul.f32 %v3908_v17, %v6393_v54  ;;  %v2168_v39 = vmul.f32 %v3909_v9, %v6393_v54  ;;  %v3205_v60 = vmax.f32 %v2981_v25, 0.0  ;;  %v2169_v3 = vmul.f32 %v3910_v46, %v6393_v54  ;;  %v8230_v52 = vld [vmem:[#allocation13_spill] sm:$0xff]  ;;  %v2777_v57 = vld [vmem:[%s6523_s5 + $0x128] sm:$0xff]  ;;  %v2778_v17 = vld [vmem:[%s6523_s5 + $0x130] sm:$0xff] }
 0x20c   : > { %v2170_v16 = vmul.f32 %v3911_v49, %v6393_v54  ;;  %v2171_v56 = vmul.f32 %v3912_v47, %v6393_v54  ;;  %v3206_v53 = vmax.f32 %v2982_v58, 0.0  ;;  %3426 = vst [vmem:[%s6568_s8 + $0x70] sm:$0xff] %v3202_v13  ;;  %v2172_v24 = vmul.f32 %v6393_v54, %v8230_v52  ;;  %v2779_v58 = vld [vmem:[%s6523_s5 + $0x138] sm:$0xff]  ;;  %v2780_v13 = vld [vmem:[%s6523_s5 + $0x140] sm:$0xff] }
 0x20d   : > { %v2173_v4 = vmul.f32 %v6393_v54, %v8231_v29  ;;  %v3207_v25 = vmax.f32 %v2983_v27, 0.0  ;;  %v3208_v61 = vmax.f32 %v2984_v1, 0.0  ;;  %3427 = vst [vmem:[%s6568_s8 + $0x78] sm:$0xff] %v3203_v40  ;;  %v2384_v9 = vpop.permute.xlu2 %2383  ;;  %v8232_v15 = vld [vmem:[#allocation2_spill] sm:$0xff]  ;;  %v2781_v27 = vld [vmem:[%s6523_s5 + $0x148] sm:$0xff] }
 0x20e   : > { %3428 = vst [vmem:[%s6568_s8 + $0x80] sm:$0xff] %v3204_v21  ;;  %v2551_v46 = vadd.f32 %v2384_v9, %v2167_v8  ;;  %v2552_v49 = vadd.f32 %v2384_v9, %v2168_v39  ;;  %v2553_v47 = vadd.f32 %v2384_v9, %v2169_v3  ;;  %v2554_v52 = vadd.f32 %v2384_v9, %v2170_v16 }
 0x20f   : > { %v2132_v54 = vmul.f32 %v6401_v14, %v8232_v15  ;;  %3429 = vst [vmem:[%s6568_s8 + $0x88] sm:$0xff] %v3205_v60  ;;  %v2555_v1 = vadd.f32 %v2384_v9, %v2171_v56  ;;  %v2556_v40 = vadd.f32 %v2384_v9, %v2172_v24  ;;  %v2557_v29 = vadd.f32 %v2384_v9, %v2173_v4  ;;  %v2747_v4 = vld [vmem:[%s6523_s5 + $0x38] sm:$0xff]  ;;  %v2749_v9 = vld [vmem:[%s6523_s5 + $0x48] sm:$0xff] }
 0x210   : > { %3430 = vst [vmem:[%s6568_s8 + $0x90] sm:$0xff] %v3206_v53  ;;  %v2999_v36 = vadd.f32 %v2775_v43, %v2551_v46  ;;  %v3000_v21 = vadd.f32 %v2776_v42, %v2552_v49  ;;  %v3001_v50 = vadd.f32 %v2777_v57, %v2553_v47  ;;  %v3002_v8 = vadd.f32 %v2778_v17, %v2554_v52  ;;  %v2364_v39 = vpop.permute.xlu0 %2363  ;;  %v2748_v42 = vld [vmem:[%s6523_s5 + $0x40] sm:$0xff]  ;;  %v8234_v57 = vld [vmem:[#allocation4_spill] sm:$0xff] }
 0x211   : > { %v2133_v3 = vmul.f32 %v6401_v14, %v8233_v18  ;;  %3431 = vst [vmem:[%s6568_s8 + $0x98] sm:$0xff] %v3207_v25  ;;  %v3003_v15 = vadd.f32 %v2779_v58, %v2555_v1  ;;  %v3004_v60 = vadd.f32 %v2780_v13, %v2556_v40  ;;  %v2523_v16 = vadd.f32 %v2364_v39, %v6527_v41  ;;  %v2750_v58 = vld [vmem:[%s6523_s5 + $0x50] sm:$0xff]  ;;  %v2752_v52 = vld [vmem:[%s6523_s5 + $0x60] sm:$0xff] }
 0x212   : > { %3432 = vst.msk [vmem:[%s6568_s8 + $0xa0] sm:$0xff] %vm504_vm0, %v3208_v61  ;;  %v3005_v56 = vadd.f32 %v2781_v27, %v2557_v29  ;;  %v3223_v53 = vmax.f32 %v2999_v36, 0.0  ;;  %v3224_v43 = vmax.f32 %v3000_v21, 0.0  ;;  %v3225_v24 = vmax.f32 %v3001_v50, 0.0  ;;  %v2359_v61 = vpop.permute.xlu1 %2358  ;;  %v2751_v36 = vld [vmem:[%s6523_s5 + $0x58] sm:$0xff] }
 0x213   : > { %v2134_v18 = vmul.f32 %v6401_v14, %v8234_v57  ;;  %v3226_v25 = vmax.f32 %v3002_v8, 0.0  ;;  %v3227_v17 = vmax.f32 %v3003_v15, 0.0  ;;  %v2524_v41 = vadd.f32 %v2364_v39, %v6531_v22  ;;  %v2742_v57 = vld [vmem:[%s6523_s5 + $0x10] sm:$0xff] }
 0x214   : > { %3447 = vst [vmem:[%s6568_s8 + $0x118] sm:$0xff] %v3223_v53  ;;  %v2525_v50 = vadd.f32 %v2364_v39, %v6544_v38  ;;  %v2526_v13 = vadd.f32 %v2364_v39, %v6560_v31  ;;  %v2527_v46 = vadd.f32 %v2364_v39, %v6572_v19  ;;  %v2528_v49 = vadd.f32 %v2364_v39, %v6578_v5  ;;  %v2753_v38 = vld [vmem:[%s6523_s5 + $0x68] sm:$0xff]  ;;  %v8235_v19 = vld [vmem:[#allocation5_spill] sm:$0xff] }
 0x215   : > { %v3228_v47 = vmax.f32 %v3004_v60, 0.0  ;;  %3448 = vst [vmem:[%s6568_s8 + $0x120] sm:$0xff] %v3224_v43  ;;  %v2529_v27 = vadd.f32 %v2364_v39, %v6582_v32  ;;  %v2971_v22 = vadd.f32 %v2747_v4, %v2523_v16  ;;  %v2972_v1 = vadd.f32 %v2748_v42, %v2524_v41  ;;  %v2740_v32 = vld [vmem:[%s6523_s5] sm:$0xff] }
 0x216   : > { %v3229_v40 = vmax.f32 %v3005_v56, 0.0  ;;  %3449 = vst [vmem:[%s6568_s8 + $0x128] sm:$0xff] %v3225_v24  ;;  %v2973_v31 = vadd.f32 %v2749_v9, %v2525_v50  ;;  %v2974_v29 = vadd.f32 %v2750_v58, %v2526_v13  ;;  %v2516_v21 = vadd.f32 %v2359_v61, %v2132_v54  ;;  %v8236_v60 = vld [vmem:[#allocation6_spill] sm:$0xff]  ;;  %v8237_v56 = vld [vmem:[#allocation7_spill] sm:$0xff]  ;;  %v2399_v13 = vpop.permute.xlu2 %2398 }
 0x217   : > { %v2135_v5 = vmul.f32 %v6401_v14, %v8235_v19  ;;  %3450 = vst [vmem:[%s6568_s8 + $0x130] sm:$0xff] %v3226_v25  ;;  %v2975_v8 = vadd.f32 %v2751_v36, %v2527_v46  ;;  %v3195_v15 = vmax.f32 %v2971_v22, 0.0  ;;  %v2517_v39 = vadd.f32 %v2359_v61, %v2133_v3  ;;  %v2741_v24 = vld [vmem:[%s6523_s5 + $0x8] sm:$0xff]  ;;  %v8238_v3 = vld [vmem:[#allocation10_spill] sm:$0xff] }
 0x218   : > { %v2136_v16 = vmul.f32 %v6401_v14, %v8236_v60  ;;  %v2137_v53 = vmul.f32 %v6401_v14, %v8237_v56  ;;  %3451 = vst [vmem:[%s6568_s8 + $0x138] sm:$0xff] %v3227_v17  ;;  %v2976_v43 = vadd.f32 %v2752_v52, %v2528_v49  ;;  %v3196_v54 = vmax.f32 %v2972_v1, 0.0  ;;  %v2743_v17 = vld [vmem:[%s6523_s5 + $0x18] sm:$0xff]  ;;  %v8239_v46 = vld [vmem:[#allocation18_spill] sm:$0xff] }
 0x219   : > { %3452 = vst [vmem:[%s6568_s8 + $0x140] sm:$0xff] %v3228_v47  ;;  %v2977_v4 = vadd.f32 %v2753_v38, %v2529_v27  ;;  %v3197_v42 = vmax.f32 %v2973_v31, 0.0  ;;  %v2518_v25 = vadd.f32 %v2359_v61, %v2134_v18  ;;  %v2519_v9 = vadd.f32 %v2359_v61, %v2135_v5  ;;  %v2744_v18 = vld [vmem:[%s6523_s5 + $0x20] sm:$0xff]  ;;  %v2746_v5 = vld [vmem:[%s6523_s5 + $0x30] sm:$0xff] }
 0x21a   : > { %v2138_v58 = vmul.f32 %v6401_v14, %v8238_v3  ;;  %3453 = vst.msk [vmem:[%s6568_s8 + $0x148] sm:$0xff] %vm504_vm0, %v3229_v40  ;;  %v3198_v41 = vmax.f32 %v2974_v29, 0.0  ;;  %v2520_v36 = vadd.f32 %v2359_v61, %v2136_v16  ;;  %v2964_v50 = vadd.f32 %v2740_v32, %v2516_v21  ;;  %v8240_v14 = vld [vmem:[#allocation19_spill] sm:$0xff]  ;;  %v8241_v29 = vld [vmem:[#allocation20_spill] sm:$0xff]  ;;  %v8242_v32 = vld [vmem:[#allocation22_spill] sm:$0xff] }
 0x21b   : > { %v2188_v49 = vmul.f32 %v6449_v28, %v8239_v46  ;;  %v3199_v47 = vmax.f32 %v2975_v8, 0.0  ;;  %3419 = vst [vmem:[%s6568_s8 + $0x38] sm:$0xff] %v3195_v15  ;;  %v2521_v52 = vadd.f32 %v2359_v61, %v2137_v53  ;;  %v2965_v27 = vadd.f32 %v2741_v24, %v2517_v39  ;;  %v2745_v40 = vld [vmem:[%s6523_s5 + $0x28] sm:$0xff]  ;;  %v8243_v53 = vld [vmem:[#allocation25_spill] sm:$0xff] }
 0x21c   : > { %v2189_v22 = vmul.f32 %v6449_v28, %v8240_v14  ;;  %v3200_v1 = vmax.f32 %v2976_v43, 0.0  ;;  %3420 = vst [vmem:[%s6568_s8 + $0x40] sm:$0xff] %v3196_v54  ;;  %v2522_v38 = vadd.f32 %v2359_v61, %v2138_v58  ;;  %v2966_v31 = vadd.f32 %v2742_v57, %v2518_v25  ;;  %v2796_v61 = vld [vmem:[%s6523_s5 + $0x1c0] sm:$0xff]  ;;  %v8244_v57 = vld [vmem:[#allocation27_spill] sm:$0xff]  ;;  %v2798_v58 = vld [vmem:[%s6523_s5 + $0x1d0] sm:$0xff] }
 0x21d   : > { %v2190_v21 = vmul.f32 %v6449_v28, %v8241_v29  ;;  %v3201_v19 = vmax.f32 %v2977_v4, 0.0  ;;  %3421 = vst [vmem:[%s6568_s8 + $0x48] sm:$0xff] %v3197_v42  ;;  %v2967_v8 = vadd.f32 %v2743_v17, %v2519_v9  ;;  %v2572_v15 = vadd.f32 %v2399_v13, %v2188_v49  ;;  %v2797_v4 = vld [vmem:[%s6523_s5 + $0x1c8] sm:$0xff]  ;;  %v8245_v17 = vld [vmem:[#allocation30_spill] sm:$0xff]  ;;  %v2799_v46 = vld [vmem:[%s6523_s5 + $0x1d8] sm:$0xff] }
 0x21e   : > { %v2191_v39 = vmul.f32 %v6449_v28, %v8242_v32  ;;  %3422 = vst [vmem:[%s6568_s8 + $0x50] sm:$0xff] %v3198_v41  ;;  %v2968_v60 = vadd.f32 %v2744_v18, %v2520_v36  ;;  %v3188_v16 = vmax.f32 %v2964_v50, 0.0  ;;  %v2573_v56 = vadd.f32 %v2399_v13, %v2189_v22  ;;  %v2379_v18 = vpop.permute.xlu0 %2378  ;;  %v2800_v22 = vld [vmem:[%s6523_s5 + $0x1e0] sm:$0xff]  ;;  %v2801_v29 = vld [vmem:[%s6523_s5 + $0x1e8] sm:$0xff]  ;;  %v2802_v32 = vld [vmem:[%s6523_s5 + $0x1f0] sm:$0xff] }
 0x21f   : > { %v2192_v43 = vmul.f32 %v6449_v28, %v8243_v53  ;;  %3423 = vst [vmem:[%s6568_s8 + $0x58] sm:$0xff] %v3199_v47  ;;  %v2969_v54 = vadd.f32 %v2745_v40, %v2521_v52  ;;  %v3189_v24 = vmax.f32 %v2965_v27, 0.0  ;;  %v2574_v42 = vadd.f32 %v2399_v13, %v2190_v21  ;;  %v8246_v52 = vld [vmem:[#allocation11_spill] sm:$0xff] }
 0x220   : > { %v2193_v25 = vmul.f32 %v6449_v28, %v8244_v57  ;;  %3424 = vst [vmem:[%s6568_s8 + $0x60] sm:$0xff] %v3200_v1  ;;  %v2970_v9 = vadd.f32 %v2746_v5, %v2522_v38  ;;  %v3190_v3 = vmax.f32 %v2966_v31, 0.0  ;;  %v2575_v41 = vadd.f32 %v2399_v13, %v2191_v39  ;;  %v8248_v5 = vld [vmem:[#allocation139_spill] sm:$0xff] }
 0x221   : > { %v2194_v36 = vmul.f32 %v6449_v28, %v8245_v17  ;;  %3425 = vst.msk [vmem:[%s6568_s8 + $0x68] sm:$0xff] %vm504_vm0, %v3201_v19  ;;  %v3191_v50 = vmax.f32 %v2967_v8, 0.0  ;;  %v2576_v49 = vadd.f32 %v2399_v13, %v2192_v43  ;;  %v3020_v47 = vadd.f32 %v2796_v61, %v2572_v15  ;;  %v8247_v28 = vld [vmem:[#allocation138_spill] sm:$0xff]  ;;  %v2769_v57 = vld [vmem:[%s6523_s5 + $0xe8] sm:$0xff]  ;;  %v2770_v17 = vld [vmem:[%s6523_s5 + $0xf0] sm:$0xff] }
 0x222   : > { %v2160_v27 = vmul.f32 %v8246_v52, %v6417_v26  ;;  %v3192_v14 = vmax.f32 %v2968_v60, 0.0  ;;  %3412 = vst [vmem:[%s6568_s8] sm:$0xff] %v3188_v16  ;;  %v2577_v1 = vadd.f32 %v2399_v13, %v2193_v25  ;;  %v3021_v40 = vadd.f32 %v2797_v4, %v2573_v56  ;;  %v8249_v16 = vld [vmem:[#allocation140_spill] sm:$0xff] }
 0x223   : > { %v2161_v38 = vmul.f32 %v8247_v28, %v6417_v26  ;;  %v3193_v31 = vmax.f32 %v2969_v54, 0.0  ;;  %3413 = vst [vmem:[%s6568_s8 + $0x8] sm:$0xff] %v3189_v24  ;;  %v2578_v21 = vadd.f32 %v2399_v13, %v2194_v36  ;;  %v3022_v19 = vadd.f32 %v2798_v58, %v2574_v42  ;;  %v2768_v13 = vld [vmem:[%s6523_s5 + $0xe0] sm:$0xff]  ;;  %v8250_v54 = vld [vmem:[#allocation141_spill] sm:$0xff] }
 0x224   : > { %v2162_v8 = vmul.f32 %v8248_v5, %v6417_v26  ;;  %v3194_v15 = vmax.f32 %v2970_v9, 0.0  ;;  %3414 = vst [vmem:[%s6568_s8 + $0x10] sm:$0xff] %v3190_v3  ;;  %v3023_v39 = vadd.f32 %v2799_v46, %v2575_v41  ;;  %v2544_v60 = vadd.f32 %v2379_v18, %v2160_v27  ;;  %v8251_v9 = vld [vmem:[#allocation143_spill] sm:$0xff]  ;;  %v2772_v28 = vld [vmem:[%s6523_s5 + $0x100] sm:$0xff] }
 0x225   : > { %v2163_v61 = vmul.f32 %v8249_v16, %v6417_v26  ;;  %3415 = vst [vmem:[%s6568_s8 + $0x18] sm:$0xff] %v3191_v50  ;;  %v3024_v56 = vadd.f32 %v2800_v22, %v2576_v49  ;;  %v3244_v53 = vmax.f32 %v3020_v47, 0.0  ;;  %v2545_v43 = vadd.f32 %v2379_v18, %v2161_v38  ;;  %v8252_v50 = vld [vmem:[#allocation142_spill] sm:$0xff]  ;;  %v2771_v47 = vld [vmem:[%s6523_s5 + $0xf8] sm:$0xff]  ;;  %v8253_v22 = vld [vmem:[#allocation8_spill] sm:$0xff] }
 0x226   : > { %v2164_v24 = vmul.f32 %v8250_v54, %v6417_v26  ;;  %3416 = vst [vmem:[%s6568_s8 + $0x20] sm:$0xff] %v3192_v14  ;;  %v3025_v4 = vadd.f32 %v2801_v29, %v2577_v1  ;;  %v3245_v42 = vmax.f32 %v3021_v40, 0.0  ;;  %v2546_v25 = vadd.f32 %v2379_v18, %v2162_v8  ;;  %v2374_v14 = vpop.permute.xlu1 %2373 }
 0x227   : > { %v2165_v3 = vmul.f32 %v8251_v9, %v6417_v26  ;;  %3417 = vst [vmem:[%s6568_s8 + $0x28] sm:$0xff] %v3193_v31  ;;  %v3026_v58 = vadd.f32 %v2802_v32, %v2578_v21  ;;  %v3246_v41 = vmax.f32 %v3022_v19, 0.0  ;;  %v2547_v36 = vadd.f32 %v2379_v18, %v2163_v61  ;;  %v2773_v19 = vld [vmem:[%s6523_s5 + $0x108] sm:$0xff] }
 0x228   : > { %v2166_v46 = vmul.f32 %v8252_v50, %v6417_v26  ;;  %3418 = vst.msk [vmem:[%s6568_s8 + $0x30] sm:$0xff] %vm504_vm0, %v3194_v15  ;;  %v3247_v49 = vmax.f32 %v3023_v39, 0.0  ;;  %v2548_v52 = vadd.f32 %v2379_v18, %v2164_v24  ;;  %v2992_v27 = vadd.f32 %v2768_v13, %v2544_v60  ;;  %v8254_v26 = vld [vmem:[#allocation9_spill] sm:$0xff]  ;;  %v8255_v15 = vld [vmem:[#allocation12_spill] sm:$0xff] }
 0x229   : > { %v2153_v1 = vmul.f32 %v6380_v37, %v8253_v22  ;;  %v3248_v40 = vmax.f32 %v3024_v56, 0.0  ;;  %3468 = vst [vmem:[%s6568_s8 + $0x1c0] sm:$0xff] %v3244_v53  ;;  %v2549_v38 = vadd.f32 %v2379_v18, %v2165_v3  ;;  %v2993_v31 = vadd.f32 %v2769_v57, %v2545_v43  ;;  %v2774_v60 = vld [vmem:[%s6523_s5 + $0x110] sm:$0xff]  ;;  %v8256_v56 = vld [vmem:[#allocation14_spill] sm:$0xff]  ;;  %v8258_v3 = vld [vmem:[#allocation21_spill] sm:$0xff] }
 0x22a   : > { %v2154_v29 = vmul.f32 %v6380_v37, %v8254_v26  ;;  %v3249_v21 = vmax.f32 %v3025_v4, 0.0  ;;  %3469 = vst [vmem:[%s6568_s8 + $0x1c8] sm:$0xff] %v3245_v42  ;;  %v2550_v5 = vadd.f32 %v2379_v18, %v2166_v46  ;;  %v2994_v8 = vadd.f32 %v2770_v17, %v2546_v25  ;;  %v2761_v18 = vld [vmem:[%s6523_s5 + $0xa8] sm:$0xff]  ;;  %v8257_v24 = vld [vmem:[#allocation16_spill] sm:$0xff]  ;;  %v8259_v46 = vld [vmem:[#allocation17_spill] sm:$0xff] }
 0x22b   : > { %v2155_v32 = vmul.f32 %v6380_v37, %v8255_v15  ;;  %v3250_v39 = vmax.f32 %v3026_v58, 0.0  ;;  %3470 = vst [vmem:[%s6568_s8 + $0x1d0] sm:$0xff] %v3246_v41  ;;  %v2995_v16 = vadd.f32 %v2771_v47, %v2547_v36  ;;  %v2537_v61 = vadd.f32 %v2374_v14, %v2153_v1  ;;  %v2762_v25 = vld [vmem:[%s6523_s5 + $0xb0] sm:$0xff]  ;;  %v2763_v36 = vld [vmem:[%s6523_s5 + $0xb8] sm:$0xff]  ;;  %v2414_v1 = vpop.permute.xlu2 %2413 }
 0x22c   : > { %v2156_v53 = vmul.f32 %v6380_v37, %v8256_v56  ;;  %3471 = vst [vmem:[%s6568_s8 + $0x1d8] sm:$0xff] %v3247_v49  ;;  %v2996_v13 = vadd.f32 %v2772_v28, %v2548_v52  ;;  %v3216_v43 = vmax.f32 %v2992_v27, 0.0  ;;  %v2538_v54 = vadd.f32 %v2374_v14, %v2154_v29  ;;  %v2764_v52 = vld [vmem:[%s6523_s5 + $0xc0] sm:$0xff] }
 0x22d   : > { %v2157_v4 = vmul.f32 %v6380_v37, %v8257_v24  ;;  %3472 = vst [vmem:[%s6568_s8 + $0x1e0] sm:$0xff] %v3248_v40  ;;  %v2997_v42 = vadd.f32 %v2773_v19, %v2549_v38  ;;  %v3217_v57 = vmax.f32 %v2993_v31, 0.0  ;;  %v2539_v9 = vadd.f32 %v2374_v14, %v2155_v32  ;;  %v8260_v40 = vld [vmem:[#allocation36_spill] sm:$0xff]  ;;  %v2765_v31 = vld [vmem:[%s6523_s5 + $0xc8] sm:$0xff]  ;;  %v8262_v32 = vld [vmem:[#allocation38_spill] sm:$0xff] }
 0x22e   : > { %v2158_v58 = vmul.f32 %v6380_v37, %v8258_v3  ;;  %3473 = vst [vmem:[%s6568_s8 + $0x1e8] sm:$0xff] %v3249_v21  ;;  %v2998_v41 = vadd.f32 %v2774_v60, %v2550_v5  ;;  %v3218_v17 = vmax.f32 %v2994_v8, 0.0  ;;  %v2540_v50 = vadd.f32 %v2374_v14, %v2156_v53  ;;  %v2766_v5 = vld [vmem:[%s6523_s5 + $0xd0] sm:$0xff]  ;;  %v8263_v53 = vld [vmem:[#allocation41_spill] sm:$0xff]  ;;  %v8265_v3 = vld [vmem:[#allocation47_spill] sm:$0xff] }
 0x22f   : > { %v2159_v49 = vmul.f32 %v6380_v37, %v8259_v46  ;;  %3474 = vst.msk [vmem:[%s6568_s8 + $0x1f0] sm:$0xff] %vm504_vm0, %v3250_v39  ;;  %v3219_v47 = vmax.f32 %v2995_v16, 0.0  ;;  %v2541_v27 = vadd.f32 %v2374_v14, %v2157_v4  ;;  %v2985_v22 = vadd.f32 %v2761_v18, %v2537_v61  ;;  %v8261_v37 = vld [vmem:[#allocation37_spill] sm:$0xff]  ;;  %v8266_v46 = vld [vmem:[#allocation50_spill] sm:$0xff] }
 0x230   : > { %v2209_v28 = vmul.f32 %v6464_v62, %v8260_v40  ;;  %v3220_v38 = vmax.f32 %v2996_v13, 0.0  ;;  %3440 = vst [vmem:[%s6568_s8 + $0xe0] sm:$0xff] %v3216_v43  ;;  %v2542_v26 = vadd.f32 %v2374_v14, %v2158_v58  ;;  %v2986_v29 = vadd.f32 %v2762_v25, %v2538_v54  ;;  %v2767_v16 = vld [vmem:[%s6523_s5 + $0xd8] sm:$0xff]  ;;  %v2818_v25 = vld [vmem:[%s6523_s5 + $0x270] sm:$0xff]  ;;  %v2394_v40 = vpop.permute.xlu0 %2393 }
 0x231   : > { %v2210_v21 = vmul.f32 %v6464_v62, %v8261_v37  ;;  %v3221_v19 = vmax.f32 %v2997_v42, 0.0  ;;  %3441 = vst [vmem:[%s6568_s8 + $0xe8] sm:$0xff] %v3217_v57  ;;  %v2543_v8 = vadd.f32 %v2374_v14, %v2159_v49  ;;  %v2987_v15 = vadd.f32 %v2763_v36, %v2539_v9  ;;  %v2817_v14 = vld [vmem:[%s6523_s5 + $0x268] sm:$0xff]  ;;  %v8264_v24 = vld [vmem:[#allocation45_spill] sm:$0xff] }
 0x232   : > { %v2211_v39 = vmul.f32 %v6464_v62, %v8262_v32  ;;  %v3222_v60 = vmax.f32 %v2998_v41, 0.0  ;;  %3442 = vst [vmem:[%s6568_s8 + $0xf0] sm:$0xff] %v3218_v17  ;;  %v2988_v61 = vadd.f32 %v2764_v52, %v2540_v50  ;;  %v2593_v56 = vadd.f32 %v2414_v1, %v2209_v28  ;;  %v2819_v36 = vld [vmem:[%s6523_s5 + $0x278] sm:$0xff]  ;;  %v2820_v52 = vld [vmem:[%s6523_s5 + $0x280] sm:$0xff]  ;;  %v8267_v28 = vld [vmem:[#allocation23_spill] sm:$0xff] }
 0x233   : > { %v2212_v13 = vmul.f32 %v6464_v62, %v8263_v53  ;;  %3443 = vst [vmem:[%s6568_s8 + $0xf8] sm:$0xff] %v3219_v47  ;;  %v2989_v43 = vadd.f32 %v2765_v31, %v2541_v27  ;;  %v3209_v18 = vmax.f32 %v2985_v22, 0.0  ;;  %v2594_v54 = vadd.f32 %v2414_v1, %v2210_v21  ;;  %v8269_v32 = vld [vmem:[#allocation26_spill] sm:$0xff]  ;;  %v8270_v53 = vld [vmem:[#allocation28_spill] sm:$0xff] }
 0x234   : > { %v2213_v4 = vmul.f32 %v6464_v62, %v8264_v24  ;;  %3444 = vst [vmem:[%s6568_s8 + $0x100] sm:$0xff] %v3220_v38  ;;  %v2990_v42 = vadd.f32 %v2766_v5, %v2542_v26  ;;  %v3210_v57 = vmax.f32 %v2986_v29, 0.0  ;;  %v2595_v9 = vadd.f32 %v2414_v1, %v2211_v39  ;;  %v2821_v26 = vld [vmem:[%s6523_s5 + $0x288] sm:$0xff]  ;;  %v2822_v5 = vld [vmem:[%s6523_s5 + $0x290] sm:$0xff] }
 0x235   : > { %v2214_v58 = vmul.f32 %v6464_v62, %v8265_v3  ;;  %3445 = vst [vmem:[%s6568_s8 + $0x108] sm:$0xff] %v3221_v19  ;;  %v2991_v41 = vadd.f32 %v2767_v16, %v2543_v8  ;;  %v3211_v17 = vmax.f32 %v2987_v15, 0.0  ;;  %v2596_v50 = vadd.f32 %v2414_v1, %v2212_v13  ;;  %v2823_v16 = vld [vmem:[%s6523_s5 + $0x298] sm:$0xff] }
 0x236   : > { %v2215_v49 = vmul.f32 %v6464_v62, %v8266_v46  ;;  %3446 = vst.msk [vmem:[%s6568_s8 + $0x110] sm:$0xff] %vm504_vm0, %v3222_v60  ;;  %v3212_v47 = vmax.f32 %v2988_v61, 0.0  ;;  %v2597_v27 = vadd.f32 %v2414_v1, %v2213_v4  ;;  %v3041_v22 = vadd.f32 %v2817_v14, %v2593_v56  ;;  %v8268_v62 = vld [vmem:[#allocation24_spill] sm:$0xff] }
 0x237   : > { %v2181_v38 = vmul.f32 %v6409_v2, %v8267_v28  ;;  %v3213_v31 = vmax.f32 %v2989_v43, 0.0  ;;  %3433 = vst [vmem:[%s6568_s8 + $0xa8] sm:$0xff] %v3209_v18  ;;  %v2598_v29 = vadd.f32 %v2414_v1, %v2214_v58  ;;  %v3042_v37 = vadd.f32 %v2818_v25, %v2594_v54  ;;  %v8271_v54 = vld [vmem:[#allocation33_spill] sm:$0xff] }
 0x238   : > { %v2182_v21 = vmul.f32 %v6409_v2, %v8268_v62  ;;  %v3214_v19 = vmax.f32 %v2990_v42, 0.0  ;;  %3434 = vst [vmem:[%s6568_s8 + $0xb0] sm:$0xff] %v3210_v57  ;;  %v2599_v8 = vadd.f32 %v2414_v1, %v2215_v49  ;;  %v3043_v15 = vadd.f32 %v2819_v36, %v2595_v9  ;;  %v2789_v1 = vld [vmem:[%s6523_s5 + $0x188] sm:$0xff]  ;;  %v2790_v57 = vld [vmem:[%s6523_s5 + $0x190] sm:$0xff]  ;;  %v8274_v28 = vld [vmem:[#allocation29_spill] sm:$0xff] }
 0x239   : > { %v2183_v39 = vmul.f32 %v6409_v2, %v8269_v32  ;;  %v3215_v60 = vmax.f32 %v2991_v41, 0.0  ;;  %3435 = vst [vmem:[%s6568_s8 + $0xb8] sm:$0xff] %v3211_v17  ;;  %v3044_v61 = vadd.f32 %v2820_v52, %v2596_v50  ;;  %v2565_v56 = vadd.f32 %v2394_v40, %v2181_v38  ;;  %v8272_v9 = vld [vmem:[#allocation39_spill] sm:$0xff]  ;;  %v2791_v17 = vld [vmem:[%s6523_s5 + $0x198] sm:$0xff]  ;;  %v8273_v50 = vld [vmem:[#allocation34_spill] sm:$0xff] }
 0x23a   : > { %v2184_v13 = vmul.f32 %v6409_v2, %v8270_v53  ;;  %3436 = vst [vmem:[%s6568_s8 + $0xc0] sm:$0xff] %v3212_v47  ;;  %v3045_v43 = vadd.f32 %v2821_v26, %v2597_v27  ;;  %v3265_v18 = vmax.f32 %v3041_v22, 0.0  ;;  %v2566_v14 = vadd.f32 %v2394_v40, %v2182_v21  ;;  %v2792_v47 = vld [vmem:[%s6523_s5 + $0x1a0] sm:$0xff]  ;;  %v2389_v22 = vpop.permute.xlu1 %2388  ;;  %v2793_v26 = vld [vmem:[%s6523_s5 + $0x1a8] sm:$0xff] }
 0x23b   : > { %v2185_v24 = vmul.f32 %v6409_v2, %v8271_v54  ;;  %3437 = vst [vmem:[%s6568_s8 + $0xc8] sm:$0xff] %v3213_v31  ;;  %v3046_v4 = vadd.f32 %v2822_v5, %v2598_v29  ;;  %v3266_v42 = vmax.f32 %v3042_v37, 0.0  ;;  %v2567_v25 = vadd.f32 %v2394_v40, %v2183_v39 }
 0x23c   : > { %v2186_v3 = vmul.f32 %v6409_v2, %v8272_v9  ;;  %3438 = vst [vmem:[%s6568_s8 + $0xd0] sm:$0xff] %v3214_v19  ;;  %v3047_v58 = vadd.f32 %v2823_v16, %v2599_v8  ;;  %v3267_v41 = vmax.f32 %v3043_v15, 0.0  ;;  %v2568_v36 = vadd.f32 %v2394_v40, %v2184_v13  ;;  %v2794_v19 = vld [vmem:[%s6523_s5 + $0x1b0] sm:$0xff] }
 0x23d   : > { %v2187_v46 = vmul.f32 %v6409_v2, %v8273_v50  ;;  %3439 = vst.msk [vmem:[%s6568_s8 + $0xd8] sm:$0xff] %vm504_vm0, %v3215_v60  ;;  %v3268_v49 = vmax.f32 %v3044_v61, 0.0  ;;  %v2569_v52 = vadd.f32 %v2394_v40, %v2185_v24  ;;  %v3013_v27 = vadd.f32 %v2789_v1, %v2565_v56  ;;  %v8275_v2 = vld [vmem:[#allocation31_spill] sm:$0xff]  ;;  %v8276_v15 = vld [vmem:[#allocation32_spill] sm:$0xff]  ;;  %v2795_v60 = vld [vmem:[%s6523_s5 + $0x1b8] sm:$0xff] }
 0x23e   : > { %v2174_v38 = vmul.f32 %v6432_v10, %v8274_v28  ;;  %v3269_v31 = vmax.f32 %v3045_v43, 0.0  ;;  %3489 = vst [vmem:[%s6568_s8 + $0x268] sm:$0xff] %v3265_v18  ;;  %v2570_v29 = vadd.f32 %v2394_v40, %v2186_v3  ;;  %v3014_v37 = vadd.f32 %v2790_v57, %v2566_v14  ;;  %v8277_v56 = vld [vmem:[#allocation35_spill] sm:$0xff]  ;;  %v8278_v1 = vld [vmem:[#allocation40_spill] sm:$0xff] }
 0x23f   : > { %v2175_v62 = vmul.f32 %v6432_v10, %v8275_v2  ;;  %v3270_v21 = vmax.f32 %v3046_v4, 0.0  ;;  %3490 = vst [vmem:[%s6568_s8 + $0x270] sm:$0xff] %v3266_v42  ;;  %v2571_v5 = vadd.f32 %v2394_v40, %v2187_v46  ;;  %v3015_v8 = vadd.f32 %v2791_v17, %v2567_v25  ;;  %v2782_v40 = vld [vmem:[%s6523_s5 + $0x150] sm:$0xff]  ;;  %v2783_v4 = vld [vmem:[%s6523_s5 + $0x158] sm:$0xff]  ;;  %v8279_v57 = vld [vmem:[#allocation43_spill] sm:$0xff] }
 0x240   : > { %v2176_v32 = vmul.f32 %v6432_v10, %v8276_v15  ;;  %v3271_v39 = vmax.f32 %v3047_v58, 0.0  ;;  %3491 = vst [vmem:[%s6568_s8 + $0x278] sm:$0xff] %v3267_v41  ;;  %v3016_v16 = vadd.f32 %v2792_v47, %v2568_v36  ;;  %v2558_v61 = vadd.f32 %v2389_v22, %v2174_v38  ;;  %v2784_v58 = vld [vmem:[%s6523_s5 + $0x160] sm:$0xff]  ;;  %v8280_v17 = vld [vmem:[#allocation44_spill] sm:$0xff]  ;;  %v2785_v46 = vld [vmem:[%s6523_s5 + $0x168] sm:$0xff] }
 0x241   : > { %v2177_v53 = vmul.f32 %v6432_v10, %v8277_v56  ;;  %3492 = vst [vmem:[%s6568_s8 + $0x280] sm:$0xff] %v3268_v49  ;;  %v3017_v13 = vadd.f32 %v2793_v26, %v2569_v52  ;;  %v3237_v43 = vmax.f32 %v3013_v27, 0.0  ;;  %v2559_v18 = vadd.f32 %v2389_v22, %v2175_v62  ;;  %v2429_v52 = vpop.permute.xlu2 %2428  ;;  %v8281_v27 = vld [vmem:[#allocation52_spill] sm:$0xff]  ;;  %v2787_v62 = vld [vmem:[%s6523_s5 + $0x178] sm:$0xff] }
 0x242   : > { %v2178_v14 = vmul.f32 %v6432_v10, %v8278_v1  ;;  %3493 = vst [vmem:[%s6568_s8 + $0x288] sm:$0xff] %v3269_v31  ;;  %v3018_v54 = vadd.f32 %v2794_v19, %v2570_v29  ;;  %v3238_v24 = vmax.f32 %v3014_v37, 0.0  ;;  %v2560_v42 = vadd.f32 %v2389_v22, %v2176_v32  ;;  %v2786_v31 = vld [vmem:[%s6523_s5 + $0x170] sm:$0xff]  ;;  %v2788_v32 = vld [vmem:[%s6523_s5 + $0x180] sm:$0xff] }
 0x243   : > { %v2179_v25 = vmul.f32 %v6432_v10, %v8279_v57  ;;  %3494 = vst [vmem:[%s6568_s8 + $0x290] sm:$0xff] %v3270_v21  ;;  %v3019_v9 = vadd.f32 %v2795_v60, %v2571_v5  ;;  %v3239_v3 = vmax.f32 %v3015_v8, 0.0  ;;  %v2561_v41 = vadd.f32 %v2389_v22, %v2177_v53  ;;  %v8283_v5 = vld [vmem:[#allocation54_spill] sm:$0xff] }
 0x244   : > { %v2180_v36 = vmul.f32 %v6432_v10, %v8280_v17  ;;  %3495 = vst.msk [vmem:[%s6568_s8 + $0x298] sm:$0xff] %vm504_vm0, %v3271_v39  ;;  %v3240_v50 = vmax.f32 %v3016_v16, 0.0  ;;  %v2562_v49 = vadd.f32 %v2389_v22, %v2178_v14  ;;  %v3006_v47 = vadd.f32 %v2782_v40, %v2558_v61  ;;  %v8282_v10 = vld [vmem:[#allocation53_spill] sm:$0xff]  ;;  %v8284_v16 = vld [vmem:[#allocation58_spill] sm:$0xff]  ;;  %v2841_v17 = vld [vmem:[%s6523_s5 + $0x328] sm:$0xff] }
 0x245   : > { %v2230_v28 = vmul.f32 %v6480_v6, %v8281_v27  ;;  %v3241_v38 = vmax.f32 %v3017_v13, 0.0  ;;  %3461 = vst [vmem:[%s6568_s8 + $0x188] sm:$0xff] %v3237_v43  ;;  %v2563_v26 = vadd.f32 %v2389_v22, %v2179_v25  ;;  %v3007_v29 = vadd.f32 %v2783_v4, %v2559_v18  ;;  %v8285_v43 = vld [vmem:[#allocation61_spill] sm:$0xff]  ;;  %v2840_v25 = vld [vmem:[%s6523_s5 + $0x320] sm:$0xff] }
 0x246   : > { %v2231_v37 = vmul.f32 %v6480_v6, %v8282_v10  ;;  %v3242_v2 = vmax.f32 %v3018_v54, 0.0  ;;  %3462 = vst [vmem:[%s6568_s8 + $0x190] sm:$0xff] %v3238_v24  ;;  %v2564_v21 = vadd.f32 %v2389_v22, %v2180_v36  ;;  %v3008_v19 = vadd.f32 %v2784_v58, %v2560_v42  ;;  %v2838_v22 = vld [vmem:[%s6523_s5 + $0x310] sm:$0xff]  ;;  %v2839_v14 = vld [vmem:[%s6523_s5 + $0x318] sm:$0xff]  ;;  %v8286_v24 = vld [vmem:[#allocation63_spill] sm:$0xff] }
 0x247   : > { %v2232_v8 = vmul.f32 %v6480_v6, %v8283_v5  ;;  %v3243_v15 = vmax.f32 %v3019_v9, 0.0  ;;  %3463 = vst [vmem:[%s6568_s8 + $0x198] sm:$0xff] %v3239_v3  ;;  %v3009_v39 = vadd.f32 %v2785_v46, %v2561_v41  ;;  %v2614_v60 = vadd.f32 %v2429_v52, %v2230_v28  ;;  %v8287_v3 = vld [vmem:[#allocation66_spill] sm:$0xff]  ;;  %v2409_v46 = vpop.permute.xlu0 %2408  ;;  %v2842_v28 = vld [vmem:[%s6523_s5 + $0x330] sm:$0xff]  ;;  %v2843_v10 = vld [vmem:[%s6523_s5 + $0x338] sm:$0xff] }
 0x248   : > { %v2233_v61 = vmul.f32 %v6480_v6, %v8284_v16  ;;  %3464 = vst [vmem:[%s6568_s8 + $0x1a0] sm:$0xff] %v3240_v50  ;;  %v3010_v56 = vadd.f32 %v2786_v31, %v2562_v49  ;;  %v3230_v53 = vmax.f32 %v3006_v47, 0.0  ;;  %v2615_v13 = vadd.f32 %v2429_v52, %v2231_v37  ;;  %v8288_v49 = vld [vmem:[#allocation42_spill] sm:$0xff] }
 0x249   : > { %v2234_v40 = vmul.f32 %v6480_v6, %v8285_v43  ;;  %3465 = vst [vmem:[%s6568_s8 + $0x1a8] sm:$0xff] %v3241_v38  ;;  %v3011_v18 = vadd.f32 %v2787_v62, %v2563_v26  ;;  %v3231_v1 = vmax.f32 %v3007_v29, 0.0  ;;  %v2616_v54 = vadd.f32 %v2429_v52, %v2232_v8  ;;  %v8290_v62 = vld [vmem:[#allocation145_spill] sm:$0xff]  ;;  %v2844_v5 = vld [vmem:[%s6523_s5 + $0x340] sm:$0xff] }
 0x24a   : > { %v2235_v4 = vmul.f32 %v6480_v6, %v8286_v24  ;;  %3466 = vst [vmem:[%s6568_s8 + $0x1b0] sm:$0xff] %v3242_v2  ;;  %v3012_v42 = vadd.f32 %v2788_v32, %v2564_v21  ;;  %v3232_v57 = vmax.f32 %v3008_v19, 0.0  ;;  %v2617_v9 = vadd.f32 %v2429_v52, %v2233_v61  ;;  %v8291_v32 = vld [vmem:[#allocation146_spill] sm:$0xff]  ;;  %v2811_v43 = vld [vmem:[%s6523_s5 + $0x238] sm:$0xff] }
 0x24b   : > { %v2236_v58 = vmul.f32 %v6480_v6, %v8287_v3  ;;  %3467 = vst.msk [vmem:[%s6568_s8 + $0x1b8] sm:$0xff] %vm504_vm0, %v3243_v15  ;;  %v3233_v41 = vmax.f32 %v3009_v39, 0.0  ;;  %v2618_v36 = vadd.f32 %v2429_v52, %v2234_v40  ;;  %v3062_v50 = vadd.f32 %v2838_v22, %v2614_v60  ;;  %v8289_v6 = vld [vmem:[#allocation144_spill] sm:$0xff]  ;;  %v2812_v24 = vld [vmem:[%s6523_s5 + $0x240] sm:$0xff] }
 0x24c   : > { %v2202_v47 = vmul.f32 %v6425_v51, %v8288_v49  ;;  %v3234_v27 = vmax.f32 %v3010_v56, 0.0  ;;  %3454 = vst [vmem:[%s6568_s8 + $0x150] sm:$0xff] %v3230_v53  ;;  %v2619_v38 = vadd.f32 %v2429_v52, %v2235_v4  ;;  %v3063_v31 = vadd.f32 %v2839_v14, %v2615_v13  ;;  %v8292_v56 = vld [vmem:[#allocation147_spill] sm:$0xff]  ;;  %v2814_v49 = vld [vmem:[%s6523_s5 + $0x250] sm:$0xff] }
 0x24d   : > { %v2203_v26 = vmul.f32 %v8289_v6, %v6425_v51  ;;  %v3235_v29 = vmax.f32 %v3011_v18, 0.0  ;;  %3455 = vst [vmem:[%s6568_s8 + $0x158] sm:$0xff] %v3231_v1  ;;  %v2620_v37 = vadd.f32 %v2429_v52, %v2236_v58  ;;  %v3064_v2 = vadd.f32 %v2840_v25, %v2616_v54  ;;  %v2810_v52 = vld [vmem:[%s6523_s5 + $0x230] sm:$0xff]  ;;  %v8293_v18 = vld [vmem:[#allocation55_spill] sm:$0xff] }
 0x24e   : > { %v2204_v21 = vmul.f32 %v8290_v62, %v6425_v51  ;;  %v3236_v19 = vmax.f32 %v3012_v42, 0.0  ;;  %3456 = vst [vmem:[%s6568_s8 + $0x160] sm:$0xff] %v3232_v57  ;;  %v3065_v8 = vadd.f32 %v2841_v17, %v2617_v9  ;;  %v2586_v15 = vadd.f32 %v2409_v46, %v2202_v47  ;;  %v8294_v42 = vld [vmem:[#allocation56_spill] sm:$0xff]  ;;  %v2813_v9 = vld [vmem:[%s6523_s5 + $0x248] sm:$0xff]  ;;  %v8295_v17 = vld [vmem:[#allocation46_spill] sm:$0xff] }
 0x24f   : > { %v2205_v39 = vmul.f32 %v8291_v32, %v6425_v51  ;;  %3457 = vst [vmem:[%s6568_s8 + $0x168] sm:$0xff] %v3233_v41  ;;  %v3066_v60 = vadd.f32 %v2842_v28, %v2618_v36  ;;  %v3286_v16 = vmax.f32 %v3062_v50, 0.0  ;;  %v2587_v61 = vadd.f32 %v2409_v46, %v2203_v26  ;;  %v2404_v41 = vpop.permute.xlu1 %2403 }
 0x250   : > { %v2206_v53 = vmul.f32 %v8292_v56, %v6425_v51  ;;  %3458 = vst [vmem:[%s6568_s8 + $0x170] sm:$0xff] %v3234_v27  ;;  %v3067_v22 = vadd.f32 %v2843_v10, %v2619_v38  ;;  %v3287_v13 = vmax.f32 %v3063_v31, 0.0  ;;  %v2588_v40 = vadd.f32 %v2409_v46, %v2204_v21  ;;  %v2815_v31 = vld [vmem:[%s6523_s5 + $0x258] sm:$0xff] }
 0x251   : > { %v2207_v1 = vmul.f32 %v6425_v51, %v8293_v18  ;;  %3459 = vst [vmem:[%s6568_s8 + $0x178] sm:$0xff] %v3235_v29  ;;  %v3068_v14 = vadd.f32 %v2844_v5, %v2620_v37  ;;  %v3288_v54 = vmax.f32 %v3064_v2, 0.0  ;;  %v2589_v4 = vadd.f32 %v2409_v46, %v2205_v39  ;;  %v8297_v29 = vld [vmem:[#allocation49_spill] sm:$0xff]  ;;  %v2816_v2 = vld [vmem:[%s6523_s5 + $0x260] sm:$0xff] }
 0x252   : > { %v2208_v57 = vmul.f32 %v6425_v51, %v8294_v42  ;;  %3460 = vst.msk [vmem:[%s6568_s8 + $0x180] sm:$0xff] %vm504_vm0, %v3236_v19  ;;  %v3289_v25 = vmax.f32 %v3065_v8, 0.0  ;;  %v2590_v3 = vadd.f32 %v2409_v46, %v2206_v53  ;;  %v3034_v58 = vadd.f32 %v2810_v52, %v2586_v15  ;;  %v8296_v51 = vld [vmem:[#allocation48_spill] sm:$0xff]  ;;  %v8298_v19 = vld [vmem:[#allocation51_spill] sm:$0xff]  ;;  %v8299_v39 = vld [vmem:[#allocation57_spill] sm:$0xff] }
 0x253   : > { %v2195_v36 = vmul.f32 %v6427_v55, %v8295_v17  ;;  %v3290_v50 = vmax.f32 %v3066_v60, 0.0  ;;  %3510 = vst [vmem:[%s6568_s8 + $0x310] sm:$0xff] %v3286_v16  ;;  %v2591_v47 = vadd.f32 %v2409_v46, %v2207_v1  ;;  %v3035_v27 = vadd.f32 %v2811_v43, %v2587_v61  ;;  %v2804_v61 = vld [vmem:[%s6523_s5 + $0x200] sm:$0xff]  ;;  %v8300_v53 = vld [vmem:[#allocation59_spill] sm:$0xff]  ;;  %v8301_v1 = vld [vmem:[#allocation60_spill] sm:$0xff] }
 0x254   : > { %v2196_v28 = vmul.f32 %v6427_v55, %v8296_v51  ;;  %v3291_v38 = vmax.f32 %v3067_v22, 0.0  ;;  %3511 = vst [vmem:[%s6568_s8 + $0x318] sm:$0xff] %v3287_v13  ;;  %v2592_v6 = vadd.f32 %v2409_v46, %v2208_v57  ;;  %v3036_v26 = vadd.f32 %v2812_v24, %v2588_v40  ;;  %v2803_v46 = vld [vmem:[%s6523_s5 + $0x1f8] sm:$0xff]  ;;  %v2805_v40 = vld [vmem:[%s6523_s5 + $0x208] sm:$0xff]  ;;  %v2806_v24 = vld [vmem:[%s6523_s5 + $0x210] sm:$0xff]  ;;  %v2444_v57 = vpop.permute.xlu2 %2443 }
 0x255   : > { %v2197_v10 = vmul.f32 %v6427_v55, %v8297_v29  ;;  %v3292_v37 = vmax.f32 %v3068_v14, 0.0  ;;  %3512 = vst [vmem:[%s6568_s8 + $0x320] sm:$0xff] %v3288_v54  ;;  %v3037_v62 = vadd.f32 %v2813_v9, %v2589_v4  ;;  %v2579_v21 = vadd.f32 %v2404_v41, %v2195_v36 }
 0x256   : > { %v2198_v5 = vmul.f32 %v6427_v55, %v8298_v19  ;;  %3513 = vst [vmem:[%s6568_s8 + $0x328] sm:$0xff] %v3289_v25  ;;  %v3038_v8 = vadd.f32 %v2814_v49, %v2590_v3  ;;  %v3258_v15 = vmax.f32 %v3034_v58, 0.0  ;;  %v2580_v32 = vadd.f32 %v2404_v41, %v2196_v28  ;;  %v8302_v25 = vld [vmem:[#allocation69_spill] sm:$0xff]  ;;  %v8304_v28 = vld [vmem:[#allocation71_spill] sm:$0xff] }
 0x257   : > { %v2199_v60 = vmul.f32 %v6427_v55, %v8299_v39  ;;  %3514 = vst [vmem:[%s6568_s8 + $0x330] sm:$0xff] %v3290_v50  ;;  %v3039_v16 = vadd.f32 %v2815_v31, %v2591_v47  ;;  %v3259_v52 = vmax.f32 %v3035_v27, 0.0  ;;  %v2581_v56 = vadd.f32 %v2404_v41, %v2197_v10  ;;  %v2807_v58 = vld [vmem:[%s6523_s5 + $0x218] sm:$0xff]  ;;  %v2808_v47 = vld [vmem:[%s6523_s5 + $0x220] sm:$0xff]  ;;  %v8305_v10 = vld [vmem:[#allocation75_spill] sm:$0xff] }
 0x258   : > { %v2200_v22 = vmul.f32 %v6427_v55, %v8300_v53  ;;  %3515 = vst [vmem:[%s6568_s8 + $0x338] sm:$0xff] %v3291_v38  ;;  %v3040_v13 = vadd.f32 %v2816_v2, %v2592_v6  ;;  %v3260_v43 = vmax.f32 %v3036_v26, 0.0  ;;  %v2582_v18 = vadd.f32 %v2404_v41, %v2198_v5  ;;  %v2809_v6 = vld [vmem:[%s6523_s5 + $0x228] sm:$0xff]  ;;  %v8306_v19 = vld [vmem:[#allocation77_spill] sm:$0xff]  ;;  %v8307_v39 = vld [vmem:[#allocation82_spill] sm:$0xff] }
 0x259   : > { %v2201_v14 = vmul.f32 %v6427_v55, %v8301_v1  ;;  %3516 = vst.msk [vmem:[%s6568_s8 + $0x340] sm:$0xff] %vm504_vm0, %v3292_v37  ;;  %v3261_v54 = vmax.f32 %v3037_v62, 0.0  ;;  %v2583_v4 = vadd.f32 %v2404_v41, %v2199_v60  ;;  %v3027_v42 = vadd.f32 %v2803_v46, %v2579_v21  ;;  %v8303_v55 = vld [vmem:[#allocation70_spill] sm:$0xff]  ;;  %v2424_v1 = vpop.permute.xlu0 %2423 }
 0x25a   : > { %v2251_v9 = vmul.f32 %v6493_v45, %v8302_v25  ;;  %v3262_v3 = vmax.f32 %v3038_v8, 0.0  ;;  %3482 = vst [vmem:[%s6568_s8 + $0x230] sm:$0xff] %v3258_v15  ;;  %v2584_v17 = vadd.f32 %v2404_v41, %v2200_v22  ;;  %v3028_v36 = vadd.f32 %v2804_v61, %v2580_v32  ;;  %v2860_v46 = vld [vmem:[%s6523_s5 + $0x3c0] sm:$0xff]  ;;  %v2861_v61 = vld [vmem:[%s6523_s5 + $0x3c8] sm:$0xff] }
 0x25b   : > { %v2252_v50 = vmul.f32 %v6493_v45, %v8303_v55  ;;  %v3263_v49 = vmax.f32 %v3039_v16, 0.0  ;;  %3483 = vst [vmem:[%s6568_s8 + $0x238] sm:$0xff] %v3259_v52  ;;  %v2585_v27 = vadd.f32 %v2404_v41, %v2201_v14  ;;  %v3029_v51 = vadd.f32 %v2805_v40, %v2581_v56  ;;  %v2859_v41 = vld [vmem:[%s6523_s5 + $0x3b8] sm:$0xff]  ;;  %v8308_v53 = vld [vmem:[#allocation86_spill] sm:$0xff]  ;;  %v8309_v14 = vld [vmem:[#allocation148_spill] sm:$0xff] }
 0x25c   : > { %v2253_v38 = vmul.f32 %v6493_v45, %v8304_v28  ;;  %v3264_v31 = vmax.f32 %v3040_v13, 0.0  ;;  %3484 = vst [vmem:[%s6568_s8 + $0x240] sm:$0xff] %v3260_v43  ;;  %v3030_v26 = vadd.f32 %v2806_v24, %v2582_v18  ;;  %v2635_v29 = vadd.f32 %v2444_v57, %v2251_v9  ;;  %v2862_v43 = vld [vmem:[%s6523_s5 + $0x3d0] sm:$0xff]  ;;  %v8311_v55 = vld [vmem:[#allocation150_spill] sm:$0xff]  ;;  %v8312_v28 = vld [vmem:[#allocation151_spill] sm:$0xff] }
 0x25d   : > { %v2254_v37 = vmul.f32 %v6493_v45, %v8305_v10  ;;  %3485 = vst [vmem:[%s6568_s8 + $0x248] sm:$0xff] %v3261_v54  ;;  %v3031_v2 = vadd.f32 %v2807_v58, %v2583_v4  ;;  %v3251_v62 = vmax.f32 %v3027_v42, 0.0  ;;  %v2636_v21 = vadd.f32 %v2444_v57, %v2252_v50  ;;  %v2863_v4 = vld [vmem:[%s6523_s5 + $0x3d8] sm:$0xff]  ;;  %v2864_v58 = vld [vmem:[%s6523_s5 + $0x3e0] sm:$0xff] }
 0x25e   : > { %v2255_v5 = vmul.f32 %v6493_v45, %v8306_v19  ;;  %3486 = vst [vmem:[%s6568_s8 + $0x250] sm:$0xff] %v3262_v3  ;;  %v3032_v8 = vadd.f32 %v2808_v47, %v2584_v17  ;;  %v3252_v15 = vmax.f32 %v3028_v36, 0.0  ;;  %v2637_v32 = vadd.f32 %v2444_v57, %v2253_v38  ;;  %v2865_v47 = vld [vmem:[%s6523_s5 + $0x3e8] sm:$0xff] }
 0x25f   : > { %v2256_v60 = vmul.f32 %v6493_v45, %v8307_v39  ;;  %3487 = vst [vmem:[%s6568_s8 + $0x258] sm:$0xff] %v3263_v49  ;;  %v3033_v16 = vadd.f32 %v2809_v6, %v2585_v27  ;;  %v3253_v52 = vmax.f32 %v3029_v51, 0.0  ;;  %v2638_v56 = vadd.f32 %v2444_v57, %v2254_v37 }
 0x260   : > { %v2257_v22 = vmul.f32 %v6493_v45, %v8308_v53  ;;  %3488 = vst.msk [vmem:[%s6568_s8 + $0x260] sm:$0xff] %vm504_vm0, %v3264_v31  ;;  %v3254_v13 = vmax.f32 %v3030_v26, 0.0  ;;  %v2639_v40 = vadd.f32 %v2444_v57, %v2255_v5  ;;  %v3083_v18 = vadd.f32 %v2859_v41, %v2635_v29  ;;  %v8310_v45 = vld [vmem:[#allocation149_spill] sm:$0xff]  ;;  %v8313_v29 = vld [vmem:[#allocation67_spill] sm:$0xff]  ;;  %v8316_v53 = vld [vmem:[#allocation62_spill] sm:$0xff] }
 0x261   : > { %v2223_v54 = vmul.f32 %v8309_v14, %v6440_v48  ;;  %v3255_v24 = vmax.f32 %v3031_v2, 0.0  ;;  %3475 = vst [vmem:[%s6568_s8 + $0x1f8] sm:$0xff] %v3251_v62  ;;  %v2640_v42 = vadd.f32 %v2444_v57, %v2256_v60  ;;  %v3084_v25 = vadd.f32 %v2860_v46, %v2636_v21  ;;  %v2832_v62 = vld [vmem:[%s6523_s5 + $0x2e0] sm:$0xff]  ;;  %v8314_v21 = vld [vmem:[#allocation72_spill] sm:$0xff] }
 0x262   : > { %v2224_v9 = vmul.f32 %v8310_v45, %v6440_v48  ;;  %v3256_v3 = vmax.f32 %v3032_v8, 0.0  ;;  %3476 = vst [vmem:[%s6568_s8 + $0x200] sm:$0xff] %v3252_v15  ;;  %v2641_v17 = vadd.f32 %v2444_v57, %v2257_v22  ;;  %v3085_v36 = vadd.f32 %v2861_v61, %v2637_v32  ;;  %v2831_v57 = vld [vmem:[%s6523_s5 + $0x2d8] sm:$0xff]  ;;  %v2833_v15 = vld [vmem:[%s6523_s5 + $0x2e8] sm:$0xff] }
 0x263   : > { %v2225_v50 = vmul.f32 %v8311_v55, %v6440_v48  ;;  %v3257_v49 = vmax.f32 %v3033_v16, 0.0  ;;  %3477 = vst [vmem:[%s6568_s8 + $0x208] sm:$0xff] %v3253_v52  ;;  %v3086_v27 = vadd.f32 %v2862_v43, %v2638_v56  ;;  %v2607_v51 = vadd.f32 %v2424_v1, %v2223_v54  ;;  %v8315_v32 = vld [vmem:[#allocation73_spill] sm:$0xff]  ;;  %v2834_v16 = vld [vmem:[%s6523_s5 + $0x2f0] sm:$0xff]  ;;  %v2419_v56 = vpop.permute.xlu1 %2418 }
 0x264   : > { %v2226_v38 = vmul.f32 %v8312_v28, %v6440_v48  ;;  %3478 = vst [vmem:[%s6568_s8 + $0x210] sm:$0xff] %v3254_v13  ;;  %v3087_v31 = vadd.f32 %v2863_v4, %v2639_v40  ;;  %v3307_v6 = vmax.f32 %v3083_v18, 0.0  ;;  %v2608_v26 = vadd.f32 %v2424_v1, %v2224_v9  ;;  %v2835_v43 = vld [vmem:[%s6523_s5 + $0x2f8] sm:$0xff] }
 0x265   : > { %v2227_v10 = vmul.f32 %v6440_v48, %v8313_v29  ;;  %3479 = vst [vmem:[%s6568_s8 + $0x218] sm:$0xff] %v3255_v24  ;;  %v3088_v37 = vadd.f32 %v2864_v58, %v2640_v42  ;;  %v3308_v2 = vmax.f32 %v3084_v25, 0.0  ;;  %v2609_v41 = vadd.f32 %v2424_v1, %v2225_v50  ;;  %v2836_v24 = vld [vmem:[%s6523_s5 + $0x300] sm:$0xff]  ;;  %v8318_v25 = vld [vmem:[#allocation65_spill] sm:$0xff] }
 0x266   : > { %v2228_v19 = vmul.f32 %v6440_v48, %v8314_v21  ;;  %3480 = vst [vmem:[%s6568_s8 + $0x220] sm:$0xff] %v3256_v3  ;;  %v3089_v5 = vadd.f32 %v2865_v47, %v2641_v17  ;;  %v3309_v8 = vmax.f32 %v3085_v36, 0.0  ;;  %v2610_v46 = vadd.f32 %v2424_v1, %v2226_v38  ;;  %v2837_v3 = vld [vmem:[%s6523_s5 + $0x308] sm:$0xff]  ;;  %v8319_v36 = vld [vmem:[#allocation68_spill] sm:$0xff] }
 0x267   : > { %v2229_v39 = vmul.f32 %v6440_v48, %v8315_v32  ;;  %3481 = vst.msk [vmem:[%s6568_s8 + $0x228] sm:$0xff] %vm504_vm0, %v3257_v49  ;;  %v3310_v60 = vmax.f32 %v3086_v27, 0.0  ;;  %v2611_v52 = vadd.f32 %v2424_v1, %v2227_v10  ;;  %v3055_v61 = vadd.f32 %v2831_v57, %v2607_v51  ;;  %v8317_v48 = vld [vmem:[#allocation64_spill] sm:$0xff]  ;;  %v8320_v27 = vld [vmem:[#allocation74_spill] sm:$0xff] }
 0x268   : > { %v2216_v22 = vmul.f32 %v6445_v44, %v8316_v53  ;;  %v3311_v13 = vmax.f32 %v3087_v31, 0.0  ;;  %3531 = vst [vmem:[%s6568_s8 + $0x3b8] sm:$0xff] %v3307_v6  ;;  %v2612_v40 = vadd.f32 %v2424_v1, %v2228_v19  ;;  %v3056_v18 = vadd.f32 %v2832_v62, %v2608_v26  ;;  %v2825_v31 = vld [vmem:[%s6523_s5 + $0x2a8] sm:$0xff]  ;;  %v8321_v57 = vld [vmem:[#allocation76_spill] sm:$0xff]  ;;  %v2827_v19 = vld [vmem:[%s6523_s5 + $0x2b8] sm:$0xff] }
 0x269   : > { %v2217_v14 = vmul.f32 %v6445_v44, %v8317_v48  ;;  %v3312_v54 = vmax.f32 %v3088_v37, 0.0  ;;  %3532 = vst [vmem:[%s6568_s8 + $0x3c0] sm:$0xff] %v3308_v2  ;;  %v2613_v4 = vadd.f32 %v2424_v1, %v2229_v39  ;;  %v3057_v42 = vadd.f32 %v2833_v15, %v2609_v41  ;;  %v2824_v1 = vld [vmem:[%s6523_s5 + $0x2a0] sm:$0xff]  ;;  %v2826_v37 = vld [vmem:[%s6523_s5 + $0x2b0] sm:$0xff]  ;;  %v8322_v62 = vld [vmem:[#allocation79_spill] sm:$0xff]  ;;  %v2459_v15 = vpop.permute.xlu2 %2458 }
 0x26a   : > { %v2218_v45 = vmul.f32 %v6445_v44, %v8318_v25  ;;  %v3313_v9 = vmax.f32 %v3089_v5, 0.0  ;;  %3533 = vst [vmem:[%s6568_s8 + $0x3c8] sm:$0xff] %v3309_v8  ;;  %v3058_v58 = vadd.f32 %v2834_v16, %v2610_v46  ;;  %v2600_v17 = vadd.f32 %v2419_v56, %v2216_v22  ;;  %v8323_v46 = vld [vmem:[#allocation84_spill] sm:$0xff]  ;;  %v2829_v22 = vld [vmem:[%s6523_s5 + $0x2c8] sm:$0xff] }
 0x26b   : > { %v2219_v55 = vmul.f32 %v6445_v44, %v8319_v36  ;;  %3534 = vst [vmem:[%s6568_s8 + $0x3d0] sm:$0xff] %v3310_v60  ;;  %v3059_v50 = vadd.f32 %v2835_v43, %v2611_v52  ;;  %v3279_v49 = vmax.f32 %v3055_v61, 0.0  ;;  %v2601_v47 = vadd.f32 %v2419_v56, %v2217_v14  ;;  %v2828_v60 = vld [vmem:[%s6523_s5 + $0x2c0] sm:$0xff]  ;;  %v2830_v14 = vld [vmem:[%s6523_s5 + $0x2d0] sm:$0xff] }
 0x26c   : > { %v2220_v51 = vmul.f32 %v6445_v44, %v8320_v27  ;;  %3535 = vst [vmem:[%s6568_s8 + $0x3d8] sm:$0xff] %v3311_v13  ;;  %v3060_v28 = vadd.f32 %v2836_v24, %v2612_v40  ;;  %v3280_v38 = vmax.f32 %v3056_v18, 0.0  ;;  %v2602_v6 = vadd.f32 %v2419_v56, %v2218_v45  ;;  %v8325_v40 = vld [vmem:[#allocation157_spill] sm:$0xff] }
 0x26d   : > { %v2221_v26 = vmul.f32 %v6445_v44, %v8321_v57  ;;  %3536 = vst [vmem:[%s6568_s8 + $0x3e0] sm:$0xff] %v3312_v54  ;;  %v3061_v29 = vadd.f32 %v2837_v3, %v2613_v4  ;;  %v3281_v10 = vmax.f32 %v3057_v42, 0.0  ;;  %v2603_v2 = vadd.f32 %v2419_v56, %v2219_v55  ;;  %v8326_v4 = vld [vmem:[#allocation159_spill] sm:$0xff]  ;;  %v8327_v3 = vld [vmem:[#allocation90_spill] sm:$0xff]  ;;  %v2883_v57 = vld [vmem:[%s6523_s5 + $0x478] sm:$0xff] }
 0x26e   : > { %v2222_v41 = vmul.f32 %v6445_v44, %v8322_v62  ;;  %3537 = vst.msk [vmem:[%s6568_s8 + $0x3e8] sm:$0xff] %vm504_vm0, %v3313_v9  ;;  %v3282_v21 = vmax.f32 %v3058_v58, 0.0  ;;  %v2604_v5 = vadd.f32 %v2419_v56, %v2220_v51  ;;  %v3048_v8 = vadd.f32 %v2824_v1, %v2600_v17  ;;  %v8324_v44 = vld [vmem:[#allocation85_spill] sm:$0xff]  ;;  %v2881_v55 = vld [vmem:[%s6523_s5 + $0x468] sm:$0xff]  ;;  %v2882_v51 = vld [vmem:[%s6523_s5 + $0x470] sm:$0xff] }
 0x26f   : > { %v2272_v32 = vmul.f32 %v6505_v34, %v8323_v46  ;;  %v3283_v39 = vmax.f32 %v3059_v50, 0.0  ;;  %3503 = vst [vmem:[%s6568_s8 + $0x2d8] sm:$0xff] %v3279_v49  ;;  %v2605_v16 = vadd.f32 %v2419_v56, %v2221_v26  ;;  %v3049_v52 = vadd.f32 %v2825_v31, %v2601_v47  ;;  %v8328_v49 = vld [vmem:[#allocation95_spill] sm:$0xff] }
 0x270   : > { %v2273_v61 = vmul.f32 %v6505_v34, %v8324_v44  ;;  %v3284_v53 = vmax.f32 %v3060_v28, 0.0  ;;  %3504 = vst [vmem:[%s6568_s8 + $0x2e0] sm:$0xff] %v3280_v38  ;;  %v2606_v13 = vadd.f32 %v2419_v56, %v2222_v41  ;;  %v3050_v43 = vadd.f32 %v2826_v37, %v2602_v6  ;;  %v2880_v56 = vld [vmem:[%s6523_s5 + $0x460] sm:$0xff]  ;;  %v8329_v38 = vld [vmem:[#allocation97_spill] sm:$0xff]  ;;  %v8330_v37 = vld [vmem:[#allocation152_spill] sm:$0xff] }
 0x271   : > { %v2274_v18 = vmul.f32 %v8325_v40, %v6505_v34  ;;  %v3285_v48 = vmax.f32 %v3061_v29, 0.0  ;;  %3505 = vst [vmem:[%s6568_s8 + $0x2e8] sm:$0xff] %v3281_v10  ;;  %v3051_v54 = vadd.f32 %v2827_v19, %v2603_v2  ;;  %v2656_v24 = vadd.f32 %v2459_v15, %v2272_v32  ;;  %v2439_v10 = vpop.permute.xlu0 %2438  ;;  %v2884_v41 = vld [vmem:[%s6523_s5 + $0x480] sm:$0xff]  ;;  %v2885_v46 = vld [vmem:[%s6523_s5 + $0x488] sm:$0xff]  ;;  %v2886_v44 = vld [vmem:[%s6523_s5 + $0x490] sm:$0xff] }
 0x272   : > { %v2275_v42 = vmul.f32 %v8326_v4, %v6505_v34  ;;  %3506 = vst [vmem:[%s6568_s8 + $0x2f0] sm:$0xff] %v3282_v21  ;;  %v3052_v25 = vadd.f32 %v2828_v60, %v2604_v5  ;;  %v3272_v45 = vmax.f32 %v3048_v8, 0.0  ;;  %v2657_v9 = vadd.f32 %v2459_v15, %v2273_v61  ;;  %v8332_v60 = vld [vmem:[#allocation154_spill] sm:$0xff]  ;;  %v2853_v4 = vld [vmem:[%s6523_s5 + $0x388] sm:$0xff] }
 0x273   : > { %v2276_v58 = vmul.f32 %v6505_v34, %v8327_v3  ;;  %3507 = vst [vmem:[%s6568_s8 + $0x2f8] sm:$0xff] %v3283_v39  ;;  %v3053_v17 = vadd.f32 %v2829_v22, %v2605_v16  ;;  %v3273_v36 = vmax.f32 %v3049_v52, 0.0  ;;  %v2658_v50 = vadd.f32 %v2459_v15, %v2274_v18  ;;  %v8333_v22 = vld [vmem:[#allocation155_spill] sm:$0xff]  ;;  %v2854_v3 = vld [vmem:[%s6523_s5 + $0x390] sm:$0xff] }
 0x274   : > { %v2277_v1 = vmul.f32 %v6505_v34, %v8328_v49  ;;  %3508 = vst [vmem:[%s6568_s8 + $0x300] sm:$0xff] %v3284_v53  ;;  %v3054_v47 = vadd.f32 %v2830_v14, %v2606_v13  ;;  %v3274_v27 = vmax.f32 %v3050_v43, 0.0  ;;  %v2659_v28 = vadd.f32 %v2459_v15, %v2275_v42 }
 0x275   : > { %v2278_v31 = vmul.f32 %v6505_v34, %v8329_v38  ;;  %3509 = vst.msk [vmem:[%s6568_s8 + $0x308] sm:$0xff] %vm504_vm0, %v3285_v48  ;;  %v3275_v6 = vmax.f32 %v3051_v54, 0.0  ;;  %v2660_v26 = vadd.f32 %v2459_v15, %v2276_v58  ;;  %v3104_v29 = vadd.f32 %v2880_v56, %v2656_v24  ;;  %v8331_v34 = vld [vmem:[#allocation153_spill] sm:$0xff]  ;;  %v8334_v48 = vld [vmem:[#allocation156_spill] sm:$0xff]  ;;  %v2856_v38 = vld [vmem:[%s6523_s5 + $0x3a0] sm:$0xff] }
 0x276   : > { %v2244_v2 = vmul.f32 %v8330_v37, %v6455_v33  ;;  %v3276_v62 = vmax.f32 %v3052_v25, 0.0  ;;  %3496 = vst [vmem:[%s6568_s8 + $0x2a0] sm:$0xff] %v3272_v45  ;;  %v2661_v21 = vadd.f32 %v2459_v15, %v2277_v1  ;;  %v3105_v19 = vadd.f32 %v2881_v55, %v2657_v9  ;;  %v8335_v25 = vld [vmem:[#allocation158_spill] sm:$0xff] }
 0x277   : > { %v2245_v5 = vmul.f32 %v8331_v34, %v6455_v33  ;;  %v3277_v8 = vmax.f32 %v3053_v17, 0.0  ;;  %3497 = vst [vmem:[%s6568_s8 + $0x2a8] sm:$0xff] %v3273_v36  ;;  %v2662_v32 = vadd.f32 %v2459_v15, %v2278_v31  ;;  %v3106_v39 = vadd.f32 %v2882_v51, %v2658_v50  ;;  %v2852_v15 = vld [vmem:[%s6523_s5 + $0x380] sm:$0xff]  ;;  %v8336_v17 = vld [vmem:[#allocation88_spill] sm:$0xff]  ;;  %v2855_v50 = vld [vmem:[%s6523_s5 + $0x398] sm:$0xff] }
 0x278   : > { %v2246_v16 = vmul.f32 %v8332_v60, %v6455_v33  ;;  %v3278_v52 = vmax.f32 %v3054_v47, 0.0  ;;  %3498 = vst [vmem:[%s6568_s8 + $0x2b0] sm:$0xff] %v3274_v27  ;;  %v3107_v61 = vadd.f32 %v2883_v57, %v2659_v28  ;;  %v2628_v53 = vadd.f32 %v2439_v10, %v2244_v2  ;;  %v2434_v47 = vpop.permute.xlu1 %2433  ;;  %v8337_v27 = vld [vmem:[#allocation78_spill] sm:$0xff] }
 0x279   : > { %v2247_v13 = vmul.f32 %v8333_v22, %v6455_v33  ;;  %3499 = vst [vmem:[%s6568_s8 + $0x2b8] sm:$0xff] %v3275_v6  ;;  %v3108_v43 = vadd.f32 %v2884_v41, %v2660_v26  ;;  %v3328_v40 = vmax.f32 %v3104_v29, 0.0  ;;  %v2629_v18 = vadd.f32 %v2439_v10, %v2245_v5  ;;  %v2857_v29 = vld [vmem:[%s6523_s5 + $0x3a8] sm:$0xff] }
 0x27a   : > { %v2248_v14 = vmul.f32 %v8334_v48, %v6455_v33  ;;  %3500 = vst [vmem:[%s6568_s8 + $0x2c0] sm:$0xff] %v3276_v62  ;;  %v3109_v54 = vadd.f32 %v2885_v46, %v2661_v21  ;;  %v3329_v24 = vmax.f32 %v3105_v19, 0.0  ;;  %v2630_v42 = vadd.f32 %v2439_v10, %v2246_v16  ;;  %v8339_v62 = vld [vmem:[#allocation81_spill] sm:$0xff]  ;;  %v2858_v19 = vld [vmem:[%s6523_s5 + $0x3b0] sm:$0xff]  ;;  %v8341_v16 = vld [vmem:[#allocation87_spill] sm:$0xff] }
 0x27b   : > { %v2249_v45 = vmul.f32 %v8335_v25, %v6455_v33  ;;  %3501 = vst [vmem:[%s6568_s8 + $0x2c8] sm:$0xff] %v3277_v8  ;;  %v3110_v56 = vadd.f32 %v2886_v44, %v2662_v32  ;;  %v3330_v9 = vmax.f32 %v3106_v39, 0.0  ;;  %v2631_v58 = vadd.f32 %v2439_v10, %v2247_v13  ;;  %v8340_v8 = vld [vmem:[#allocation83_spill] sm:$0xff]  ;;  %v8342_v13 = vld [vmem:[#allocation89_spill] sm:$0xff] }
 0x27c   : > { %v2250_v36 = vmul.f32 %v6455_v33, %v8336_v17  ;;  %3502 = vst.msk [vmem:[%s6568_s8 + $0x2d0] sm:$0xff] %vm504_vm0, %v3278_v52  ;;  %v3331_v55 = vmax.f32 %v3107_v61, 0.0  ;;  %v2632_v49 = vadd.f32 %v2439_v10, %v2248_v14  ;;  %v3076_v1 = vadd.f32 %v2852_v15, %v2628_v53  ;;  %v8338_v33 = vld [vmem:[#allocation80_spill] sm:$0xff] }
 0x27d   : > { %v2237_v51 = vmul.f32 %v6460_v59, %v8337_v27  ;;  %v3332_v28 = vmax.f32 %v3108_v43, 0.0  ;;  %3552 = vst [vmem:[%s6568_s8 + $0x460] sm:$0xff] %v3328_v40  ;;  %v2633_v31 = vadd.f32 %v2439_v10, %v2249_v45  ;;  %v3077_v6 = vadd.f32 %v2853_v4, %v2629_v18  ;;  %v2846_v53 = vld [vmem:[%s6523_s5 + $0x350] sm:$0xff]  ;;  %v2847_v18 = vld [vmem:[%s6523_s5 + $0x358] sm:$0xff]  ;;  %v2848_v4 = vld [vmem:[%s6523_s5 + $0x360] sm:$0xff]  ;;  %v2474_v45 = vpop.permute.xlu2 %2473 }
 0x27e   : > { %v2238_v57 = vmul.f32 %v6460_v59, %v8338_v33  ;;  %v3333_v26 = vmax.f32 %v3109_v54, 0.0  ;;  %3553 = vst [vmem:[%s6568_s8 + $0x468] sm:$0xff] %v3329_v24  ;;  %v2634_v37 = vadd.f32 %v2439_v10, %v2250_v36  ;;  %v3078_v2 = vadd.f32 %v2854_v3, %v2630_v42  ;;  %v2845_v10 = vld [vmem:[%s6523_s5 + $0x348] sm:$0xff]  ;;  %v8343_v14 = vld [vmem:[#allocation92_spill] sm:$0xff] }
 0x27f   : > { %v2239_v41 = vmul.f32 %v6460_v59, %v8339_v62  ;;  %v3334_v21 = vmax.f32 %v3110_v56, 0.0  ;;  %3554 = vst [vmem:[%s6568_s8 + $0x470] sm:$0xff] %v3330_v9  ;;  %v3079_v34 = vadd.f32 %v2855_v50, %v2631_v58  ;;  %v2621_v5 = vadd.f32 %v2434_v47, %v2237_v51  ;;  %v8344_v56 = vld [vmem:[#allocation164_spill] sm:$0xff]  ;;  %v2849_v58 = vld [vmem:[%s6523_s5 + $0x368] sm:$0xff]  ;;  %v8348_v62 = vld [vmem:[#allocation170_spill] sm:$0xff] }
 0x280   : > { %v2240_v46 = vmul.f32 %v6460_v59, %v8340_v8  ;;  %3555 = vst [vmem:[%s6568_s8 + $0x478] sm:$0xff] %v3331_v55  ;;  %v3080_v32 = vadd.f32 %v2856_v38, %v2632_v49  ;;  %v3300_v39 = vmax.f32 %v3076_v1, 0.0  ;;  %v2622_v60 = vadd.f32 %v2434_v47, %v2238_v57  ;;  %v2850_v49 = vld [vmem:[%s6523_s5 + $0x370] sm:$0xff]  ;;  %v8346_v51 = vld [vmem:[#allocation167_spill] sm:$0xff]  ;;  %v8347_v57 = vld [vmem:[#allocation169_spill] sm:$0xff] }
 0x281   : > { %v2241_v52 = vmul.f32 %v6460_v59, %v8341_v16  ;;  %3556 = vst [vmem:[%s6568_s8 + $0x480] sm:$0xff] %v3332_v28  ;;  %v3081_v44 = vadd.f32 %v2857_v29, %v2633_v31  ;;  %v3301_v61 = vmax.f32 %v3077_v6, 0.0  ;;  %v2623_v22 = vadd.f32 %v2434_v47, %v2239_v41  ;;  %v2851_v31 = vld [vmem:[%s6523_s5 + $0x378] sm:$0xff]  ;;  %v8349_v8 = vld [vmem:[#allocation107_spill] sm:$0xff] }
 0x282   : > { %v2242_v43 = vmul.f32 %v6460_v59, %v8342_v13  ;;  %3557 = vst [vmem:[%s6568_s8 + $0x488] sm:$0xff] %v3333_v26  ;;  %v3082_v40 = vadd.f32 %v2858_v19, %v2634_v37  ;;  %v3302_v15 = vmax.f32 %v3078_v2, 0.0  ;;  %v2624_v48 = vadd.f32 %v2434_v47, %v2240_v46  ;;  %v8350_v16 = vld [vmem:[#allocation105_spill] sm:$0xff]  ;;  %v2454_v13 = vpop.permute.xlu0 %2453 }
 0x283   : > { %v2243_v54 = vmul.f32 %v6460_v59, %v8343_v14  ;;  %3558 = vst.msk [vmem:[%s6568_s8 + $0x490] sm:$0xff] %vm504_vm0, %v3334_v21  ;;  %v3303_v24 = vmax.f32 %v3079_v34, 0.0  ;;  %v2625_v42 = vadd.f32 %v2434_v47, %v2241_v52  ;;  %v3069_v25 = vadd.f32 %v2845_v10, %v2621_v5  ;;  %v8345_v59 = vld [vmem:[#allocation165_spill] sm:$0xff]  ;;  %v2902_v34 = vld [vmem:[%s6523_s5 + $0x510] sm:$0xff] }
 0x284   : > { %v2293_v9 = vmul.f32 %v8344_v56, %v6511_v12  ;;  %v3304_v3 = vmax.f32 %v3080_v32, 0.0  ;;  %3524 = vst [vmem:[%s6568_s8 + $0x380] sm:$0xff] %v3300_v39  ;;  %v2626_v17 = vadd.f32 %v2434_v47, %v2242_v43  ;;  %v3070_v36 = vadd.f32 %v2846_v53, %v2622_v60  ;;  %v2903_v10 = vld [vmem:[%s6523_s5 + $0x518] sm:$0xff]  ;;  %v8351_v43 = vld [vmem:[#allocation160_spill] sm:$0xff]  ;;  %v8353_v56 = vld [vmem:[#allocation162_spill] sm:$0xff] }
 0x285   : > { %v2294_v55 = vmul.f32 %v8345_v59, %v6511_v12  ;;  %v3305_v50 = vmax.f32 %v3081_v44, 0.0  ;;  %3525 = vst [vmem:[%s6568_s8 + $0x388] sm:$0xff] %v3301_v61  ;;  %v2627_v1 = vadd.f32 %v2434_v47, %v2243_v54  ;;  %v3071_v27 = vadd.f32 %v2847_v18, %v2623_v22  ;;  %v2901_v47 = vld [vmem:[%s6523_s5 + $0x508] sm:$0xff]  ;;  %v2904_v61 = vld [vmem:[%s6523_s5 + $0x520] sm:$0xff] }
 0x286   : > { %v2295_v28 = vmul.f32 %v8346_v51, %v6511_v12  ;;  %v3306_v38 = vmax.f32 %v3082_v40, 0.0  ;;  %3526 = vst [vmem:[%s6568_s8 + $0x390] sm:$0xff] %v3302_v15  ;;  %v3072_v6 = vadd.f32 %v2848_v4, %v2624_v48  ;;  %v2677_v33 = vadd.f32 %v2474_v45, %v2293_v9  ;;  %v2905_v18 = vld [vmem:[%s6523_s5 + $0x528] sm:$0xff]  ;;  %v2906_v4 = vld [vmem:[%s6523_s5 + $0x530] sm:$0xff] }
 0x287   : > { %v2296_v26 = vmul.f32 %v8347_v57, %v6511_v12  ;;  %3527 = vst [vmem:[%s6568_s8 + $0x398] sm:$0xff] %v3303_v24  ;;  %v3073_v29 = vadd.f32 %v2849_v58, %v2625_v42  ;;  %v3293_v37 = vmax.f32 %v3069_v25, 0.0  ;;  %v2678_v2 = vadd.f32 %v2474_v45, %v2294_v55  ;;  %v2907_v58 = vld [vmem:[%s6523_s5 + $0x538] sm:$0xff]  ;;  %v8354_v59 = vld [vmem:[#allocation163_spill] sm:$0xff] }
 0x288   : > { %v2297_v41 = vmul.f32 %v8348_v62, %v6511_v12  ;;  %3528 = vst [vmem:[%s6568_s8 + $0x3a0] sm:$0xff] %v3304_v3  ;;  %v3074_v21 = vadd.f32 %v2850_v49, %v2626_v17  ;;  %v3294_v19 = vmax.f32 %v3070_v36, 0.0  ;;  %v2679_v5 = vadd.f32 %v2474_v45, %v2295_v28 }
 0x289   : > { %v2298_v46 = vmul.f32 %v6511_v12, %v8349_v8  ;;  %3529 = vst [vmem:[%s6568_s8 + $0x3a8] sm:$0xff] %v3305_v50  ;;  %v3075_v32 = vadd.f32 %v2851_v31, %v2627_v1  ;;  %v3295_v39 = vmax.f32 %v3071_v27, 0.0  ;;  %v2680_v60 = vadd.f32 %v2474_v45, %v2296_v26  ;;  %v8355_v27 = vld [vmem:[#allocation166_spill] sm:$0xff]  ;;  %v2874_v31 = vld [vmem:[%s6523_s5 + $0x430] sm:$0xff]  ;;  %v8358_v8 = vld [vmem:[#allocation91_spill] sm:$0xff] }
 0x28a   : > { %v2299_v52 = vmul.f32 %v6511_v12, %v8350_v16  ;;  %3530 = vst.msk [vmem:[%s6568_s8 + $0x3b0] sm:$0xff] %vm504_vm0, %v3306_v38  ;;  %v3296_v44 = vmax.f32 %v3072_v6, 0.0  ;;  %v2681_v53 = vadd.f32 %v2474_v45, %v2297_v41  ;;  %v3125_v22 = vadd.f32 %v2901_v47, %v2677_v33  ;;  %v8352_v12 = vld [vmem:[#allocation161_spill] sm:$0xff]  ;;  %v8356_v33 = vld [vmem:[#allocation168_spill] sm:$0xff] }
 0x28b   : > { %v2265_v40 = vmul.f32 %v8351_v43, %v6470_v11  ;;  %v3297_v15 = vmax.f32 %v3073_v29, 0.0  ;;  %3517 = vst [vmem:[%s6568_s8 + $0x348] sm:$0xff] %v3293_v37  ;;  %v2682_v48 = vadd.f32 %v2474_v45, %v2298_v46  ;;  %v3126_v14 = vadd.f32 %v2902_v34, %v2678_v2  ;;  %v2875_v37 = vld [vmem:[%s6523_s5 + $0x438] sm:$0xff]  ;;  %v8357_v2 = vld [vmem:[#allocation99_spill] sm:$0xff] }
 0x28c   : > { %v2266_v54 = vmul.f32 %v8352_v12, %v6470_v11  ;;  %v3298_v24 = vmax.f32 %v3074_v21, 0.0  ;;  %3518 = vst [vmem:[%s6568_s8 + $0x350] sm:$0xff] %v3294_v19  ;;  %v2683_v42 = vadd.f32 %v2474_v45, %v2299_v52  ;;  %v3127_v25 = vadd.f32 %v2903_v10, %v2679_v5  ;;  %v2873_v45 = vld [vmem:[%s6523_s5 + $0x428] sm:$0xff]  ;;  %v2876_v21 = vld [vmem:[%s6523_s5 + $0x440] sm:$0xff]  ;;  %v2449_v5 = vpop.permute.xlu1 %2448 }
 0x28d   : > { %v2267_v9 = vmul.f32 %v8353_v56, %v6470_v11  ;;  %v3299_v3 = vmax.f32 %v3075_v32, 0.0  ;;  %3519 = vst [vmem:[%s6568_s8 + $0x358] sm:$0xff] %v3295_v39  ;;  %v3128_v17 = vadd.f32 %v2904_v61, %v2680_v60  ;;  %v2649_v36 = vadd.f32 %v2454_v13, %v2265_v40  ;;  %v2877_v39 = vld [vmem:[%s6523_s5 + $0x448] sm:$0xff] }
 0x28e   : > { %v2268_v55 = vmul.f32 %v8354_v59, %v6470_v11  ;;  %3520 = vst [vmem:[%s6568_s8 + $0x360] sm:$0xff] %v3296_v44  ;;  %v3129_v50 = vadd.f32 %v2905_v18, %v2681_v53  ;;  %v3349_v49 = vmax.f32 %v3125_v22, 0.0  ;;  %v2650_v1 = vadd.f32 %v2454_v13, %v2266_v54  ;;  %v2878_v44 = vld [vmem:[%s6523_s5 + $0x450] sm:$0xff]  ;;  %v8360_v22 = vld [vmem:[#allocation94_spill] sm:$0xff] }
 0x28f   : > { %v2269_v51 = vmul.f32 %v8355_v27, %v6470_v11  ;;  %3521 = vst [vmem:[%s6568_s8 + $0x368] sm:$0xff] %v3297_v15  ;;  %v3130_v28 = vadd.f32 %v2906_v4, %v2682_v48  ;;  %v3350_v38 = vmax.f32 %v3126_v14, 0.0  ;;  %v2651_v6 = vadd.f32 %v2454_v13, %v2267_v9  ;;  %v2879_v15 = vld [vmem:[%s6523_s5 + $0x458] sm:$0xff]  ;;  %v8361_v14 = vld [vmem:[#allocation96_spill] sm:$0xff] }
 0x290   : > { %v2270_v57 = vmul.f32 %v8356_v33, %v6470_v11  ;;  %3522 = vst [vmem:[%s6568_s8 + $0x370] sm:$0xff] %v3298_v24  ;;  %v3131_v26 = vadd.f32 %v2907_v58, %v2683_v42  ;;  %v3351_v29 = vmax.f32 %v3127_v25, 0.0  ;;  %v2652_v47 = vadd.f32 %v2454_v13, %v2268_v55  ;;  %v8362_v42 = vld [vmem:[#allocation98_spill] sm:$0xff] }
 0x291   : > { %v2271_v62 = vmul.f32 %v6470_v11, %v8357_v2  ;;  %3523 = vst.msk [vmem:[%s6568_s8 + $0x378] sm:$0xff] %vm504_vm0, %v3299_v3  ;;  %v3352_v41 = vmax.f32 %v3128_v17, 0.0  ;;  %v2653_v19 = vadd.f32 %v2454_v13, %v2269_v51  ;;  %v3097_v34 = vadd.f32 %v2873_v45, %v2649_v36  ;;  %v8359_v11 = vld [vmem:[#allocation93_spill] sm:$0xff]  ;;  %v8363_v17 = vld [vmem:[#allocation100_spill] sm:$0xff]  ;;  %v8364_v45 = vld [vmem:[#allocation102_spill] sm:$0xff] }
 0x292   : > { %v2258_v46 = vmul.f32 %v6477_v63, %v8358_v8  ;;  %v3353_v32 = vmax.f32 %v3129_v50, 0.0  ;;  %3573 = vst [vmem:[%s6568_s8 + $0x508] sm:$0xff] %v3349_v49  ;;  %v2654_v10 = vadd.f32 %v2454_v13, %v2270_v57  ;;  %v3098_v60 = vadd.f32 %v2874_v31, %v2650_v1  ;;  %v2867_v3 = vld [vmem:[%s6523_s5 + $0x3f8] sm:$0xff]  ;;  %v2868_v50 = vld [vmem:[%s6523_s5 + $0x400] sm:$0xff]  ;;  %v2869_v51 = vld [vmem:[%s6523_s5 + $0x408] sm:$0xff]  ;;  %v2489_v31 = vpop.permute.xlu2 %2488 }
 0x293   : > { %v2259_v16 = vmul.f32 %v6477_v63, %v8359_v11  ;;  %v3354_v52 = vmax.f32 %v3130_v28, 0.0  ;;  %3574 = vst [vmem:[%s6568_s8 + $0x510] sm:$0xff] %v3350_v38  ;;  %v2655_v61 = vadd.f32 %v2454_v13, %v2271_v62  ;;  %v3099_v53 = vadd.f32 %v2875_v37, %v2651_v6  ;;  %v2866_v13 = vld [vmem:[%s6523_s5 + $0x3f0] sm:$0xff]  ;;  %v8365_v6 = vld [vmem:[#allocation175_spill] sm:$0xff]  ;;  %v2871_v62 = vld [vmem:[%s6523_s5 + $0x418] sm:$0xff] }
 0x294   : > { %v2260_v43 = vmul.f32 %v6477_v63, %v8360_v22  ;;  %v3355_v40 = vmax.f32 %v3131_v26, 0.0  ;;  %3575 = vst [vmem:[%s6568_s8 + $0x518] sm:$0xff] %v3351_v29  ;;  %v3100_v18 = vadd.f32 %v2876_v21, %v2652_v47  ;;  %v2642_v48 = vadd.f32 %v2449_v5, %v2258_v46  ;;  %v2870_v26 = vld [vmem:[%s6523_s5 + $0x410] sm:$0xff]  ;;  %v2872_v46 = vld [vmem:[%s6523_s5 + $0x420] sm:$0xff] }
 0x295   : > { %v2261_v12 = vmul.f32 %v6477_v63, %v8361_v14  ;;  %3576 = vst [vmem:[%s6568_s8 + $0x520] sm:$0xff] %v3352_v41  ;;  %v3101_v54 = vadd.f32 %v2877_v39, %v2653_v19  ;;  %v3321_v24 = vmax.f32 %v3097_v34, 0.0  ;;  %v2643_v4 = vadd.f32 %v2449_v5, %v2259_v16  ;;  %v8367_v19 = vld [vmem:[#allocation179_spill] sm:$0xff] }
 0x296   : > { %v2262_v25 = vmul.f32 %v6477_v63, %v8362_v42  ;;  %3577 = vst [vmem:[%s6568_s8 + $0x528] sm:$0xff] %v3353_v32  ;;  %v3102_v56 = vadd.f32 %v2878_v44, %v2654_v10  ;;  %v3322_v9 = vmax.f32 %v3098_v60, 0.0  ;;  %v2644_v58 = vadd.f32 %v2449_v5, %v2260_v43  ;;  %v8368_v10 = vld [vmem:[#allocation181_spill] sm:$0xff]  ;;  %v8369_v44 = vld [vmem:[#allocation182_spill] sm:$0xff]  ;;  %v2925_v42 = vld [vmem:[%s6523_s5 + $0x5c8] sm:$0xff] }
 0x297   : > { %v2263_v36 = vmul.f32 %v6477_v63, %v8363_v17  ;;  %3578 = vst [vmem:[%s6568_s8 + $0x530] sm:$0xff] %v3354_v52  ;;  %v3103_v59 = vadd.f32 %v2879_v15, %v2655_v61  ;;  %v3323_v55 = vmax.f32 %v3099_v53, 0.0  ;;  %v2645_v49 = vadd.f32 %v2449_v5, %v2261_v12  ;;  %v2923_v43 = vld [vmem:[%s6523_s5 + $0x5b8] sm:$0xff]  ;;  %v8370_v15 = vld [vmem:[#allocation183_spill] sm:$0xff]  ;;  %v2924_v12 = vld [vmem:[%s6523_s5 + $0x5c0] sm:$0xff] }
 0x298   : > { %v2264_v1 = vmul.f32 %v6477_v63, %v8364_v45  ;;  %3579 = vst.msk [vmem:[%s6568_s8 + $0x538] sm:$0xff] %vm504_vm0, %v3355_v40  ;;  %v3324_v27 = vmax.f32 %v3100_v18, 0.0  ;;  %v2646_v28 = vadd.f32 %v2449_v5, %v2262_v25  ;;  %v3090_v38 = vadd.f32 %v2866_v13, %v2642_v48  ;;  %v8366_v63 = vld [vmem:[#allocation176_spill] sm:$0xff]  ;;  %v2927_v45 = vld [vmem:[%s6523_s5 + $0x5d8] sm:$0xff] }
 0x299   : > { %v2314_v33 = vmul.f32 %v8365_v6, %v6517_v7  ;;  %v3325_v57 = vmax.f32 %v3101_v54, 0.0  ;;  %3545 = vst [vmem:[%s6568_s8 + $0x428] sm:$0xff] %v3321_v24  ;;  %v2647_v29 = vadd.f32 %v2449_v5, %v2263_v36  ;;  %v3091_v37 = vadd.f32 %v2867_v3, %v2643_v4  ;;  %v8371_v24 = vld [vmem:[#allocation112_spill] sm:$0xff]  ;;  %v8372_v3 = vld [vmem:[#allocation171_spill] sm:$0xff]  ;;  %v2928_v6 = vld [vmem:[%s6523_s5 + $0x5e0] sm:$0xff] }
 0x29a   : > { %v2315_v47 = vmul.f32 %v8366_v63, %v6517_v7  ;;  %v3326_v2 = vmax.f32 %v3102_v56, 0.0  ;;  %3546 = vst [vmem:[%s6568_s8 + $0x430] sm:$0xff] %v3322_v9  ;;  %v2648_v41 = vadd.f32 %v2449_v5, %v2264_v1  ;;  %v3092_v21 = vadd.f32 %v2868_v50, %v2644_v58  ;;  %v2922_v5 = vld [vmem:[%s6523_s5 + $0x5b0] sm:$0xff]  ;;  %v2469_v9 = vpop.permute.xlu0 %2468 }
 0x29b   : > { %v2316_v34 = vmul.f32 %v8367_v19, %v6517_v7  ;;  %v3327_v8 = vmax.f32 %v3103_v59, 0.0  ;;  %3547 = vst [vmem:[%s6568_s8 + $0x438] sm:$0xff] %v3323_v55  ;;  %v3093_v32 = vadd.f32 %v2869_v51, %v2645_v49  ;;  %v2698_v39 = vadd.f32 %v2489_v31, %v2314_v33  ;;  %v2926_v36 = vld [vmem:[%s6523_s5 + $0x5d0] sm:$0xff]  ;;  %v8374_v51 = vld [vmem:[#allocation173_spill] sm:$0xff] }
 0x29c   : > { %v2317_v60 = vmul.f32 %v8368_v10, %v6517_v7  ;;  %3548 = vst [vmem:[%s6568_s8 + $0x440] sm:$0xff] %v3324_v27  ;;  %v3094_v11 = vadd.f32 %v2870_v26, %v2646_v28  ;;  %v3314_v16 = vmax.f32 %v3090_v38, 0.0  ;;  %v2699_v52 = vadd.f32 %v2489_v31, %v2315_v47  ;;  %v8375_v26 = vld [vmem:[#allocation174_spill] sm:$0xff]  ;;  %v2895_v19 = vld [vmem:[%s6523_s5 + $0x4d8] sm:$0xff] }
 0x29d   : > { %v2318_v61 = vmul.f32 %v8369_v44, %v6517_v7  ;;  %3549 = vst [vmem:[%s6568_s8 + $0x448] sm:$0xff] %v3325_v57  ;;  %v3095_v53 = vadd.f32 %v2871_v62, %v2647_v29  ;;  %v3315_v22 = vmax.f32 %v3091_v37, 0.0  ;;  %v2700_v40 = vadd.f32 %v2489_v31, %v2316_v34  ;;  %v2896_v10 = vld [vmem:[%s6523_s5 + $0x4e0] sm:$0xff] }
 0x29e   : > { %v2319_v18 = vmul.f32 %v8370_v15, %v6517_v7  ;;  %3550 = vst [vmem:[%s6568_s8 + $0x450] sm:$0xff] %v3326_v2  ;;  %v3096_v48 = vadd.f32 %v2872_v46, %v2648_v41  ;;  %v3316_v14 = vmax.f32 %v3092_v21, 0.0  ;;  %v2701_v54 = vadd.f32 %v2489_v31, %v2317_v60  ;;  %v8376_v2 = vld [vmem:[#allocation177_spill] sm:$0xff]  ;;  %v2898_v15 = vld [vmem:[%s6523_s5 + $0x4f0] sm:$0xff] }
 0x29f   : > { %v2320_v13 = vmul.f32 %v6517_v7, %v8371_v24  ;;  %3551 = vst.msk [vmem:[%s6568_s8 + $0x458] sm:$0xff] %vm504_vm0, %v3327_v8  ;;  %v3317_v4 = vmax.f32 %v3093_v32, 0.0  ;;  %v2702_v25 = vadd.f32 %v2489_v31, %v2318_v61  ;;  %v3146_v56 = vadd.f32 %v2922_v5, %v2698_v39  ;;  %v8373_v7 = vld [vmem:[#allocation172_spill] sm:$0xff] }
 0x2a0   : > { %v2286_v58 = vmul.f32 %v8372_v3, %v6485_v23  ;;  %v3318_v17 = vmax.f32 %v3094_v11, 0.0  ;;  %3538 = vst [vmem:[%s6568_s8 + $0x3f0] sm:$0xff] %v3314_v16  ;;  %v2703_v59 = vadd.f32 %v2489_v31, %v2319_v18  ;;  %v3147_v55 = vadd.f32 %v2923_v43, %v2699_v52  ;;  %v8377_v8 = vld [vmem:[#allocation180_spill] sm:$0xff]  ;;  %v8378_v11 = vld [vmem:[#allocation178_spill] sm:$0xff]  ;;  %v2897_v52 = vld [vmem:[%s6523_s5 + $0x4e8] sm:$0xff] }
 0x2a1   : > { %v2287_v50 = vmul.f32 %v8373_v7, %v6485_v23  ;;  %v3319_v49 = vmax.f32 %v3095_v53, 0.0  ;;  %3539 = vst [vmem:[%s6568_s8 + $0x3f8] sm:$0xff] %v3315_v22  ;;  %v2704_v1 = vadd.f32 %v2489_v31, %v2320_v13  ;;  %v3148_v27 = vadd.f32 %v2924_v12, %v2700_v40  ;;  %v2894_v31 = vld [vmem:[%s6523_s5 + $0x4d0] sm:$0xff]  ;;  %v2464_v53 = vpop.permute.xlu1 %2463  ;;  %v8379_v22 = vld [vmem:[#allocation101_spill] sm:$0xff] }
 0x2a2   : > { %v2288_v28 = vmul.f32 %v8374_v51, %v6485_v23  ;;  %v3320_v38 = vmax.f32 %v3096_v48, 0.0  ;;  %3540 = vst [vmem:[%s6568_s8 + $0x400] sm:$0xff] %v3316_v14  ;;  %v3149_v33 = vadd.f32 %v2925_v42, %v2701_v54  ;;  %v2670_v57 = vadd.f32 %v2469_v9, %v2286_v58  ;;  %v2899_v54 = vld [vmem:[%s6523_s5 + $0x4f8] sm:$0xff] }
 0x2a3   : > { %v2289_v29 = vmul.f32 %v8375_v26, %v6485_v23  ;;  %3541 = vst [vmem:[%s6568_s8 + $0x408] sm:$0xff] %v3317_v4  ;;  %v3150_v37 = vadd.f32 %v2926_v36, %v2702_v25  ;;  %v3370_v63 = vmax.f32 %v3146_v56, 0.0  ;;  %v2671_v47 = vadd.f32 %v2469_v9, %v2287_v50  ;;  %v8381_v4 = vld [vmem:[#allocation104_spill] sm:$0xff]  ;;  %v2900_v56 = vld [vmem:[%s6523_s5 + $0x500] sm:$0xff] }
 0x2a4   : > { %v2290_v62 = vmul.f32 %v8376_v2, %v6485_v23  ;;  %3542 = vst [vmem:[%s6568_s8 + $0x410] sm:$0xff] %v3318_v17  ;;  %v3151_v41 = vadd.f32 %v2927_v45, %v2703_v59  ;;  %v3371_v21 = vmax.f32 %v3147_v55, 0.0  ;;  %v2672_v34 = vadd.f32 %v2469_v9, %v2288_v28  ;;  %v8382_v17 = vld [vmem:[#allocation106_spill] sm:$0xff]  ;;  %v8383_v50 = vld [vmem:[#allocation108_spill] sm:$0xff] }
 0x2a5   : > { %v2291_v46 = vmul.f32 %v8377_v8, %v6485_v23  ;;  %3543 = vst [vmem:[%s6568_s8 + $0x418] sm:$0xff] %v3319_v49  ;;  %v3152_v32 = vadd.f32 %v2928_v6, %v2704_v1  ;;  %v3372_v39 = vmax.f32 %v3148_v27, 0.0  ;;  %v2673_v60 = vadd.f32 %v2469_v9, %v2289_v29  ;;  %v2888_v27 = vld [vmem:[%s6523_s5 + $0x4a0] sm:$0xff]  ;;  %v8385_v29 = vld [vmem:[#allocation109_spill] sm:$0xff]  ;;  %v8386_v8 = vld [vmem:[#allocation188_spill] sm:$0xff] }
 0x2a6   : > { %v2292_v16 = vmul.f32 %v8378_v11, %v6485_v23  ;;  %3544 = vst.msk [vmem:[%s6568_s8 + $0x420] sm:$0xff] %vm504_vm0, %v3320_v38  ;;  %v3373_v5 = vmax.f32 %v3149_v33, 0.0  ;;  %v2674_v44 = vadd.f32 %v2469_v9, %v2290_v62  ;;  %v3118_v61 = vadd.f32 %v2894_v31, %v2670_v57  ;;  %v8380_v23 = vld [vmem:[#allocation103_spill] sm:$0xff]  ;;  %v8384_v28 = vld [vmem:[#allocation110_spill] sm:$0xff]  ;;  %v2890_v31 = vld [vmem:[%s6523_s5 + $0x4b0] sm:$0xff]  ;;  %v2504_v62 = vpop.permute.xlu2 %2503 }
 0x2a7   : > { %v2279_v43 = vmul.f32 %v6497_v35, %v8379_v22  ;;  %v3374_v40 = vmax.f32 %v3150_v37, 0.0  ;;  %3594 = vst [vmem:[%s6568_s8 + $0x5b0] sm:$0xff] %v3370_v63  ;;  %v2675_v18 = vadd.f32 %v2469_v9, %v2291_v46  ;;  %v3119_v48 = vadd.f32 %v2895_v19, %v2671_v47  ;;  %v2889_v57 = vld [vmem:[%s6523_s5 + $0x4a8] sm:$0xff] }
 0x2a8   : > { %v2280_v14 = vmul.f32 %v6497_v35, %v8380_v23  ;;  %v3375_v12 = vmax.f32 %v3151_v41, 0.0  ;;  %3595 = vst [vmem:[%s6568_s8 + $0x5b8] sm:$0xff] %v3371_v21  ;;  %v2676_v24 = vadd.f32 %v2469_v9, %v2292_v16  ;;  %v3120_v13 = vadd.f32 %v2896_v10, %v2672_v34  ;;  %v2887_v9 = vld [vmem:[%s6523_s5 + $0x498] sm:$0xff] }
 0x2a9   : > { %v2281_v42 = vmul.f32 %v6497_v35, %v8381_v4  ;;  %v3376_v25 = vmax.f32 %v3152_v32, 0.0  ;;  %3596 = vst [vmem:[%s6568_s8 + $0x5c0] sm:$0xff] %v3372_v39  ;;  %v3121_v3 = vadd.f32 %v2897_v52, %v2673_v60  ;;  %v2663_v58 = vadd.f32 %v2464_v53, %v2279_v43  ;;  %v2891_v21 = vld [vmem:[%s6523_s5 + $0x4b8] sm:$0xff]  ;;  %v8387_v60 = vld [vmem:[#allocation191_spill] sm:$0xff] }
 0x2aa   : > { %v2282_v36 = vmul.f32 %v6497_v35, %v8382_v17  ;;  %3597 = vst [vmem:[%s6568_s8 + $0x5c8] sm:$0xff] %v3373_v5  ;;  %v3122_v59 = vadd.f32 %v2898_v15, %v2674_v44  ;;  %v3342_v55 = vmax.f32 %v3118_v61, 0.0  ;;  %v2664_v7 = vadd.f32 %v2464_v53, %v2280_v14  ;;  %v2893_v5 = vld [vmem:[%s6523_s5 + $0x4c8] sm:$0xff]  ;;  %v8388_v44 = vld [vmem:[#allocation192_spill] sm:$0xff] }
 0x2ab   : > { %v2283_v49 = vmul.f32 %v6497_v35, %v8383_v50  ;;  %3598 = vst [vmem:[%s6568_s8 + $0x5d0] sm:$0xff] %v3374_v40  ;;  %v3123_v45 = vadd.f32 %v2899_v54, %v2675_v18  ;;  %v3343_v1 = vmax.f32 %v3119_v48, 0.0  ;;  %v2665_v51 = vadd.f32 %v2464_v53, %v2281_v42  ;;  %v2943_v18 = vld [vmem:[%s6523_s5 + $0x658] sm:$0xff]  ;;  %v2484_v50 = vpop.permute.xlu0 %2483 }
 0x2ac   : > { %v2284_v38 = vmul.f32 %v6497_v35, %v8384_v28  ;;  %3599 = vst [vmem:[%s6568_s8 + $0x5d8] sm:$0xff] %v3375_v12  ;;  %v3124_v6 = vadd.f32 %v2900_v56, %v2676_v24  ;;  %v3344_v33 = vmax.f32 %v3120_v13, 0.0  ;;  %v2666_v26 = vadd.f32 %v2464_v53, %v2282_v36  ;;  %v8390_v12 = vld [vmem:[#allocation119_spill] sm:$0xff]  ;;  %v2944_v24 = vld [vmem:[%s6523_s5 + $0x660] sm:$0xff] }
 0x2ad   : > { %v2285_v37 = vmul.f32 %v6497_v35, %v8385_v29  ;;  %3600 = vst.msk [vmem:[%s6568_s8 + $0x5e0] sm:$0xff] %vm504_vm0, %v3376_v25  ;;  %v3345_v63 = vmax.f32 %v3121_v3, 0.0  ;;  %v2667_v47 = vadd.f32 %v2464_v53, %v2283_v49  ;;  %v3111_v2 = vadd.f32 %v2887_v9, %v2663_v58  ;;  %v2892_v35 = vld [vmem:[%s6523_s5 + $0x4c0] sm:$0xff]  ;;  %v8391_v25 = vld [vmem:[#allocation125_spill] sm:$0xff]  ;;  %v2945_v3 = vld [vmem:[%s6523_s5 + $0x668] sm:$0xff] }
 0x2ae   : > { %v3346_v41 = vmax.f32 %v3122_v59, 0.0  ;;  %3566 = vst [vmem:[%s6568_s8 + $0x4d0] sm:$0xff] %v3342_v55  ;;  %v2668_v19 = vadd.f32 %v2464_v53, %v2284_v38  ;;  %v3112_v34 = vadd.f32 %v2888_v27, %v2664_v7  ;;  %v2335_v46 = vmul.f32 %v8386_v8, %v6574_v30  ;;  %v8392_v36 = vld [vmem:[#allocation195_spill] sm:$0xff]  ;;  %v2946_v55 = vld [vmem:[%s6523_s5 + $0x670] sm:$0xff]  ;;  %v2947_v27 = vld [vmem:[%s6523_s5 + $0x678] sm:$0xff] }
 0x2af   : > { %v3347_v32 = vmax.f32 %v3123_v45, 0.0  ;;  %3567 = vst [vmem:[%s6568_s8 + $0x4d8] sm:$0xff] %v3343_v1  ;;  %v2669_v39 = vadd.f32 %v2464_v53, %v2285_v37  ;;  %v3113_v10 = vadd.f32 %v2889_v57, %v2665_v51  ;;  %v2336_v11 = vmul.f32 %v8387_v60, %v6574_v30  ;;  %v8389_v53 = vld [vmem:[#allocation194_spill] sm:$0xff]  ;;  %v8393_v49 = vld [vmem:[#allocation184_spill] sm:$0xff]  ;;  %v8394_v38 = vld [vmem:[#allocation185_spill] sm:$0xff] }
 0x2b0   : > { %v3348_v16 = vmax.f32 %v3124_v6, 0.0  ;;  %3568 = vst [vmem:[%s6568_s8 + $0x4e0] sm:$0xff] %v3344_v33  ;;  %v3114_v52 = vadd.f32 %v2890_v31, %v2666_v26  ;;  %v2337_v61 = vmul.f32 %v8388_v44, %v6574_v30  ;;  %v2719_v22 = vadd.f32 %v2504_v62, %v2335_v46  ;;  %v2948_v33 = vld [vmem:[%s6523_s5 + $0x680] sm:$0xff]  ;;  %v2949_v31 = vld [vmem:[%s6523_s5 + $0x688] sm:$0xff]  ;;  %v8397_v46 = vld [vmem:[#allocation189_spill] sm:$0xff] }
 0x2b1   : > { %3569 = vst [vmem:[%s6568_s8 + $0x4e8] sm:$0xff] %v3345_v63  ;;  %v3115_v43 = vadd.f32 %v2891_v21, %v2667_v47  ;;  %v3335_v40 = vmax.f32 %v3111_v2, 0.0  ;;  %v2338_v15 = vmul.f32 %v8389_v53, %v6574_v30  ;;  %v2720_v48 = vadd.f32 %v2504_v62, %v2336_v11  ;;  %v8395_v29 = vld [vmem:[#allocation186_spill] sm:$0xff]  ;;  %v8398_v11 = vld [vmem:[#allocation193_spill] sm:$0xff]  ;;  %v2917_v44 = vld [vmem:[%s6523_s5 + $0x588] sm:$0xff] }
 0x2b2   : > { %3570 = vst [vmem:[%s6568_s8 + $0x4f0] sm:$0xff] %v3346_v41  ;;  %v3116_v23 = vadd.f32 %v2892_v35, %v2668_v19  ;;  %v3336_v14 = vmax.f32 %v3112_v34, 0.0  ;;  %v2339_v54 = vmul.f32 %v6574_v30, %v8390_v12  ;;  %v2721_v13 = vadd.f32 %v2504_v62, %v2337_v61  ;;  %v8396_v41 = vld [vmem:[#allocation187_spill] sm:$0xff]  ;;  %v2918_v53 = vld [vmem:[%s6523_s5 + $0x590] sm:$0xff] }
 0x2b3   : > { %3571 = vst [vmem:[%s6568_s8 + $0x4f8] sm:$0xff] %v3347_v32  ;;  %v3117_v4 = vadd.f32 %v2893_v5, %v2669_v39  ;;  %v3337_v42 = vmax.f32 %v3113_v10, 0.0  ;;  %v2340_v56 = vmul.f32 %v6574_v30, %v8391_v25  ;;  %v2722_v58 = vadd.f32 %v2504_v62, %v2338_v15  ;;  %v2916_v10 = vld [vmem:[%s6523_s5 + $0x580] sm:$0xff] }
 0x2b4   : > { %3572 = vst.msk [vmem:[%s6568_s8 + $0x500] sm:$0xff] %vm504_vm0, %v3348_v16  ;;  %v3338_v17 = vmax.f32 %v3114_v52, 0.0  ;;  %v2341_v59 = vmul.f32 %v8392_v36, %v6574_v30  ;;  %v2723_v9 = vadd.f32 %v2504_v62, %v2339_v54  ;;  %v3167_v7 = vadd.f32 %v2943_v18, %v2719_v22  ;;  %v8399_v22 = vld [vmem:[#allocation190_spill] sm:$0xff]  ;;  %v2919_v54 = vld [vmem:[%s6523_s5 + $0x598] sm:$0xff] }
 0x2b5   : > { %v2307_v45 = vmul.f32 %v8393_v49, %v6500_v0  ;;  %v3339_v1 = vmax.f32 %v3115_v43, 0.0  ;;  %3559 = vst [vmem:[%s6568_s8 + $0x498] sm:$0xff] %v3335_v40  ;;  %v2724_v51 = vadd.f32 %v2504_v62, %v2340_v56  ;;  %v3168_v28 = vadd.f32 %v2944_v24, %v2720_v48  ;;  %v2479_v48 = vpop.permute.xlu1 %2478  ;;  %v2920_v25 = vld [vmem:[%s6523_s5 + $0x5a0] sm:$0xff] }
 0x2b6   : > { %v2308_v6 = vmul.f32 %v8394_v38, %v6500_v0  ;;  %v3340_v30 = vmax.f32 %v3116_v23, 0.0  ;;  %3560 = vst [vmem:[%s6568_s8 + $0x4a0] sm:$0xff] %v3336_v14  ;;  %v2725_v57 = vadd.f32 %v2504_v62, %v2341_v59  ;;  %v3169_v26 = vadd.f32 %v2945_v3, %v2721_v13  ;;  %v2915_v62 = vld [vmem:[%s6523_s5 + $0x578] sm:$0xff]  ;;  %v8400_v23 = vld [vmem:[#allocation111_spill] sm:$0xff] }
 0x2b7   : > { %v2309_v37 = vmul.f32 %v8395_v29, %v6500_v0  ;;  %v3341_v63 = vmax.f32 %v3117_v4, 0.0  ;;  %3561 = vst [vmem:[%s6568_s8 + $0x4a8] sm:$0xff] %v3337_v42  ;;  %v3170_v47 = vadd.f32 %v2946_v55, %v2722_v58  ;;  %v2691_v2 = vadd.f32 %v2484_v50, %v2307_v45  ;;  %v8402_v58 = vld [vmem:[#allocation114_spill] sm:$0xff]  ;;  %v2921_v59 = vld [vmem:[%s6523_s5 + $0x5a8] sm:$0xff] }
 0x2b8   : > { %v2310_v21 = vmul.f32 %v8396_v41, %v6500_v0  ;;  %3562 = vst [vmem:[%s6568_s8 + $0x4b0] sm:$0xff] %v3338_v17  ;;  %v3171_v19 = vadd.f32 %v2947_v27, %v2723_v9  ;;  %v3391_v34 = vmax.f32 %v3167_v7, 0.0  ;;  %v2692_v8 = vadd.f32 %v2484_v50, %v2308_v6  ;;  %v8403_v7 = vld [vmem:[#allocation115_spill] sm:$0xff] }
 0x2b9   : > { %v2311_v32 = vmul.f32 %v8397_v46, %v6500_v0  ;;  %3563 = vst [vmem:[%s6568_s8 + $0x4b8] sm:$0xff] %v3339_v1  ;;  %v3172_v35 = vadd.f32 %v2948_v33, %v2724_v51  ;;  %v3392_v39 = vmax.f32 %v3168_v28, 0.0  ;;  %v2693_v60 = vadd.f32 %v2484_v50, %v2309_v37  ;;  %v8404_v51 = vld [vmem:[#allocation116_spill] sm:$0xff] }
 0x2ba   : > { %v2312_v16 = vmul.f32 %v8398_v11, %v6500_v0  ;;  %3564 = vst [vmem:[%s6568_s8 + $0x4c0] sm:$0xff] %v3340_v30  ;;  %v3173_v5 = vadd.f32 %v2949_v31, %v2725_v57  ;;  %v3393_v52 = vmax.f32 %v3169_v26, 0.0  ;;  %v2694_v61 = vadd.f32 %v2484_v50, %v2310_v21  ;;  %v2909_v30 = vld [vmem:[%s6523_s5 + $0x548] sm:$0xff]  ;;  %v8405_v57 = vld [vmem:[#allocation118_spill] sm:$0xff]  ;;  %v2911_v21 = vld [vmem:[%s6523_s5 + $0x558] sm:$0xff] }
 0x2bb   : > { %v2313_v43 = vmul.f32 %v8399_v22, %v6500_v0  ;;  %3565 = vst.msk [vmem:[%s6568_s8 + $0x4c8] sm:$0xff] %vm504_vm0, %v3341_v63  ;;  %v3394_v40 = vmax.f32 %v3170_v47, 0.0  ;;  %v2695_v15 = vadd.f32 %v2484_v50, %v2311_v32  ;;  %v3139_v18 = vadd.f32 %v2915_v62, %v2691_v2  ;;  %v8401_v0 = vld [vmem:[#allocation113_spill] sm:$0xff]  ;;  %v2910_v63 = vld [vmem:[%s6523_s5 + $0x550] sm:$0xff]  ;;  %v2499_v62 = vpop.permute.xlu0 %2498 }
 0x2bc   : > { %v2300_v14 = vmul.f32 %v6509_v20, %v8400_v23  ;;  %v3395_v12 = vmax.f32 %v3171_v19, 0.0  ;;  %3615 = vst [vmem:[%s6568_s8 + $0x658] sm:$0xff] %v3391_v34  ;;  %v2696_v24 = vadd.f32 %v2484_v50, %v2312_v16  ;;  %v3140_v13 = vadd.f32 %v2916_v10, %v2692_v8  ;;  %v8406_v47 = vld [vmem:[#allocation117_spill] sm:$0xff]  ;;  %v8407_v8 = vld [vmem:[#allocation232_spill] sm:$0xff] }
 0x2bd   : > { %v2301_v4 = vmul.f32 %v6509_v20, %v8401_v0  ;;  %v3396_v42 = vmax.f32 %v3172_v35, 0.0  ;;  %3616 = vst [vmem:[%s6568_s8 + $0x660] sm:$0xff] %v3392_v39  ;;  %v2697_v56 = vadd.f32 %v2484_v50, %v2313_v43  ;;  %v3141_v3 = vadd.f32 %v2917_v44, %v2693_v60  ;;  %v2908_v50 = vld [vmem:[%s6523_s5 + $0x540] sm:$0xff]  ;;  %v8408_v46 = vld [vmem:[#allocation196_spill] sm:$0xff] }
 0x2be   : > { %v2302_v17 = vmul.f32 %v6509_v20, %v8402_v58  ;;  %v3397_v36 = vmax.f32 %v3173_v5, 0.0  ;;  %3617 = vst [vmem:[%s6568_s8 + $0x668] sm:$0xff] %v3393_v52  ;;  %v3142_v55 = vadd.f32 %v2918_v53, %v2694_v61  ;;  %v2684_v9 = vadd.f32 %v2479_v48, %v2300_v14  ;;  %v2912_v39 = vld [vmem:[%s6523_s5 + $0x560] sm:$0xff]  ;;  %v2913_v5 = vld [vmem:[%s6523_s5 + $0x568] sm:$0xff] }
 0x2bf   : > { %v2303_v49 = vmul.f32 %v6509_v20, %v8403_v7  ;;  %3618 = vst [vmem:[%s6568_s8 + $0x670] sm:$0xff] %v3394_v40  ;;  %v3143_v45 = vadd.f32 %v2919_v54, %v2695_v15  ;;  %v3363_v1 = vmax.f32 %v3139_v18, 0.0  ;;  %v2685_v27 = vadd.f32 %v2479_v48, %v2301_v4  ;;  %v8410_v61 = vld [vmem:[#allocation198_spill] sm:$0xff]  ;;  %v2914_v40 = vld [vmem:[%s6523_s5 + $0x570] sm:$0xff]  ;;  %v8411_v18 = vld [vmem:[#allocation199_spill] sm:$0xff] }
 0x2c0   : > { %v2304_v28 = vmul.f32 %v6509_v20, %v8404_v51  ;;  %3619 = vst [vmem:[%s6568_s8 + $0x678] sm:$0xff] %v3395_v12  ;;  %v3144_v38 = vadd.f32 %v2920_v25, %v2696_v24  ;;  %v3364_v6 = vmax.f32 %v3140_v13, 0.0  ;;  %v2686_v33 = vadd.f32 %v2479_v48, %v2302_v17  ;;  %v8412_v24 = vld [vmem:[#allocation201_spill] sm:$0xff]  ;;  %v8416_v51 = vld [vmem:[#allocation210_spill] sm:$0xff] }
 0x2c1   : > { %v2305_v26 = vmul.f32 %v6509_v20, %v8405_v57  ;;  %3620 = vst [vmem:[%s6568_s8 + $0x680] sm:$0xff] %v3396_v42  ;;  %v3145_v29 = vadd.f32 %v2921_v59, %v2697_v56  ;;  %v3365_v37 = vmax.f32 %v3141_v3, 0.0  ;;  %v2687_v31 = vadd.f32 %v2479_v48, %v2303_v49  ;;  %v2937_v42 = vld [vmem:[%s6523_s5 + $0x628] sm:$0xff]  ;;  %v8413_v56 = vld [vmem:[#allocation129_spill] sm:$0xff] }
 0x2c2   : > { %v2306_v2 = vmul.f32 %v6509_v20, %v8406_v47  ;;  %3621 = vst.msk [vmem:[%s6568_s8 + $0x688] sm:$0xff] %vm504_vm0, %v3397_v36  ;;  %v3366_v41 = vmax.f32 %v3142_v55, 0.0  ;;  %v2688_v19 = vadd.f32 %v2479_v48, %v2304_v28  ;;  %v3132_v34 = vadd.f32 %v2908_v50, %v2684_v9  ;;  %v8409_v20 = vld [vmem:[#allocation197_spill] sm:$0xff]  ;;  %v2938_v36 = vld [vmem:[%s6523_s5 + $0x630] sm:$0xff]  ;;  %v8414_v55 = vld [vmem:[#allocation202_spill] sm:$0xff]  ;;  %v2494_v50 = vpop.permute.xlu1 %2493 }
 0x2c3   : > { %v2328_v32 = vmul.f32 %v8408_v46, %v8407_v8  ;;  %v3367_v35 = vmax.f32 %v3143_v45, 0.0  ;;  %3587 = vst [vmem:[%s6568_s8 + $0x578] sm:$0xff] %v3363_v1  ;;  %v2689_v10 = vadd.f32 %v2479_v48, %v2305_v26  ;;  %v3133_v60 = vadd.f32 %v2909_v30, %v2685_v27  ;;  %v2939_v49 = vld [vmem:[%s6523_s5 + $0x638] sm:$0xff]  ;;  %v8415_v27 = vld [vmem:[#allocation120_spill] sm:$0xff]  ;;  %v8418_v47 = vld [vmem:[#allocation122_spill] sm:$0xff] }
 0x2c4   : > { %v2329_v11 = vmul.f32 %v8409_v20, %v8407_v8  ;;  %v3368_v16 = vmax.f32 %v3144_v38, 0.0  ;;  %3588 = vst [vmem:[%s6568_s8 + $0x580] sm:$0xff] %v3364_v6  ;;  %v2690_v52 = vadd.f32 %v2479_v48, %v2306_v2  ;;  %v3134_v44 = vadd.f32 %v2910_v63, %v2686_v33  ;;  %v2936_v48 = vld [vmem:[%s6523_s5 + $0x620] sm:$0xff]  ;;  %v8417_v57 = vld [vmem:[#allocation121_spill] sm:$0xff] }
 0x2c5   : > { %v2330_v22 = vmul.f32 %v8410_v61, %v8407_v8  ;;  %v3369_v43 = vmax.f32 %v3145_v29, 0.0  ;;  %3589 = vst [vmem:[%s6568_s8 + $0x588] sm:$0xff] %v3365_v37  ;;  %v3135_v53 = vadd.f32 %v2911_v21, %v2687_v31  ;;  %v2712_v15 = vadd.f32 %v2499_v62, %v2328_v32  ;;  %v2940_v6 = vld [vmem:[%s6523_s5 + $0x640] sm:$0xff]  ;;  %v2941_v37 = vld [vmem:[%s6523_s5 + $0x648] sm:$0xff]  ;;  %v2942_v21 = vld [vmem:[%s6523_s5 + $0x650] sm:$0xff] }
 0x2c6   : > { %v2331_v23 = vmul.f32 %v8411_v18, %v8407_v8  ;;  %3590 = vst [vmem:[%s6568_s8 + $0x590] sm:$0xff] %v3366_v41  ;;  %v3136_v14 = vadd.f32 %v2912_v39, %v2688_v19  ;;  %v3356_v12 = vmax.f32 %v3132_v34, 0.0  ;;  %v2713_v54 = vadd.f32 %v2499_v62, %v2329_v11 }
 0x2c7   : > { %v2332_v13 = vmul.f32 %v8412_v24, %v8407_v8  ;;  %3591 = vst [vmem:[%s6568_s8 + $0x598] sm:$0xff] %v3367_v35  ;;  %v3137_v0 = vadd.f32 %v2913_v5, %v2689_v10  ;;  %v3357_v4 = vmax.f32 %v3133_v60, 0.0  ;;  %v2714_v25 = vadd.f32 %v2499_v62, %v2330_v22  ;;  %v8420_v10 = vld [vmem:[#allocation126_spill] sm:$0xff]  ;;  %v2933_v24 = vld [vmem:[%s6523_s5 + $0x608] sm:$0xff] }
 0x2c8   : > { %v2333_v3 = vmul.f32 %v8407_v8, %v8413_v56  ;;  %3592 = vst [vmem:[%s6568_s8 + $0x5a0] sm:$0xff] %v3368_v16  ;;  %v3138_v58 = vadd.f32 %v2914_v40, %v2690_v52  ;;  %v3358_v17 = vmax.f32 %v3134_v44, 0.0  ;;  %v2715_v59 = vadd.f32 %v2499_v62, %v2331_v23  ;;  %v2930_v16 = vld [vmem:[%s6523_s5 + $0x5f0] sm:$0xff]  ;;  %v8421_v52 = vld [vmem:[#allocation133_spill] sm:$0xff]  ;;  %v2932_v23 = vld [vmem:[%s6523_s5 + $0x600] sm:$0xff] }
 0x2c9   : > { %v2334_v9 = vmul.f32 %v8414_v55, %v8407_v8  ;;  %3593 = vst.msk [vmem:[%s6568_s8 + $0x5a8] sm:$0xff] %vm504_vm0, %v3369_v43  ;;  %v3359_v7 = vmax.f32 %v3135_v53, 0.0  ;;  %v2716_v45 = vadd.f32 %v2499_v62, %v2332_v13  ;;  %v3160_v1 = vadd.f32 %v2936_v48, %v2712_v15  ;;  %v8419_v8 = vld [vmem:[#allocation123_spill] sm:$0xff]  ;;  %v2931_v43 = vld [vmem:[%s6523_s5 + $0x5f8] sm:$0xff]  ;;  %v8422_v53 = vld [vmem:[#allocation124_spill] sm:$0xff]  ;;  %v2514_v48 = vpop.permute.xlu0 %2513 }
 0x2ca   : > { %v2321_v28 = vmul.f32 %v8416_v51, %v8415_v27  ;;  %v3360_v38 = vmax.f32 %v3136_v14, 0.0  ;;  %3580 = vst [vmem:[%s6568_s8 + $0x540] sm:$0xff] %v3356_v12  ;;  %v2717_v30 = vadd.f32 %v2499_v62, %v2333_v3  ;;  %v3161_v33 = vadd.f32 %v2937_v42, %v2713_v54  ;;  %v8424_v42 = vld [vmem:[#allocation200_spill] sm:$0xff] }
 0x2cb   : > { %v2322_v26 = vmul.f32 %v8416_v51, %v8417_v57  ;;  %v3361_v29 = vmax.f32 %v3137_v0, 0.0  ;;  %3581 = vst [vmem:[%s6568_s8 + $0x548] sm:$0xff] %v3357_v4  ;;  %v2718_v63 = vadd.f32 %v2499_v62, %v2334_v9  ;;  %v3162_v31 = vadd.f32 %v2938_v36, %v2714_v25  ;;  %v2929_v62 = vld [vmem:[%s6523_s5 + $0x5e8] sm:$0xff]  ;;  %v8423_v4 = vld [vmem:[#allocation209_spill] sm:$0xff]  ;;  %v2934_v3 = vld [vmem:[%s6523_s5 + $0x610] sm:$0xff] }
 0x2cc   : > { %v2323_v2 = vmul.f32 %v8416_v51, %v8418_v47  ;;  %v3362_v41 = vmax.f32 %v3138_v58, 0.0  ;;  %3582 = vst [vmem:[%s6568_s8 + $0x550] sm:$0xff] %v3358_v17  ;;  %v3163_v19 = vadd.f32 %v2939_v49, %v2715_v59  ;;  %v2705_v34 = vadd.f32 %v2494_v50, %v2321_v28  ;;  %v8425_v36 = vld [vmem:[#allocation203_spill] sm:$0xff]  ;;  %v2935_v9 = vld [vmem:[%s6523_s5 + $0x618] sm:$0xff]  ;;  %v8426_v49 = vld [vmem:[#allocation204_spill] sm:$0xff] }
 0x2cd   : > { %v2324_v46 = vmul.f32 %v8416_v51, %v8419_v8  ;;  %3583 = vst [vmem:[%s6568_s8 + $0x558] sm:$0xff] %v3359_v7  ;;  %v3164_v32 = vadd.f32 %v2940_v6, %v2716_v45  ;;  %v3384_v35 = vmax.f32 %v3160_v1, 0.0  ;;  %v2706_v39 = vadd.f32 %v2494_v50, %v2322_v26  ;;  %v8428_v57 = vld [vmem:[#allocation131_spill] sm:$0xff]  ;;  %v8429_v47 = vld [vmem:[#allocation136_spill] sm:$0xff] }
 0x2ce   : > { %v2325_v60 = vmul.f32 %v8416_v51, %v8420_v10  ;;  %3584 = vst [vmem:[%s6568_s8 + $0x560] sm:$0xff] %v3360_v38  ;;  %v3165_v20 = vadd.f32 %v2941_v37, %v2717_v30  ;;  %v3385_v11 = vmax.f32 %v3161_v33, 0.0  ;;  %v2707_v5 = vadd.f32 %v2494_v50, %v2323_v2  ;;  %v2957_v38 = vld [vmem:[%s6523_s5 + $0x6c8] sm:$0xff] }
 0x2cf   : > { %v2326_v44 = vmul.f32 %v8416_v51, %v8421_v52  ;;  %3585 = vst [vmem:[%s6568_s8 + $0x568] sm:$0xff] %v3361_v29  ;;  %v3166_v61 = vadd.f32 %v2942_v21, %v2718_v63  ;;  %v3386_v22 = vmax.f32 %v3162_v31, 0.0  ;;  %v2708_v40 = vadd.f32 %v2494_v50, %v2324_v46  ;;  %v2958_v29 = vld [vmem:[%s6523_s5 + $0x6d0] sm:$0xff]  ;;  %v2960_v46 = vld [vmem:[%s6523_s5 + $0x6e0] sm:$0xff]  ;;  %v2961_v10 = vld [vmem:[%s6523_s5 + $0x6e8] sm:$0xff] }
 0x2d0   : > { %v2327_v15 = vmul.f32 %v8416_v51, %v8422_v53  ;;  %3586 = vst.msk [vmem:[%s6568_s8 + $0x570] sm:$0xff] %vm504_vm0, %v3362_v41  ;;  %v3387_v18 = vmax.f32 %v3163_v19, 0.0  ;;  %v2709_v14 = vadd.f32 %v2494_v50, %v2325_v60  ;;  %v3153_v12 = vadd.f32 %v2929_v62, %v2705_v34  ;;  %v2959_v41 = vld [vmem:[%s6523_s5 + $0x6d8] sm:$0xff]  ;;  %v8430_v34 = vld [vmem:[#allocation206_spill] sm:$0xff]  ;;  %v2509_v62 = vpop.permute.xlu1 %2508 }
 0x2d1   : > { %v3388_v54 = vmax.f32 %v3164_v32, 0.0  ;;  %3608 = vst [vmem:[%s6568_s8 + $0x620] sm:$0xff] %v3384_v35  ;;  %v2710_v13 = vadd.f32 %v2494_v50, %v2326_v44  ;;  %v3154_v0 = vadd.f32 %v2930_v16, %v2706_v39  ;;  %v2349_v25 = vmul.f32 %v8424_v42, %v8423_v4  ;;  %v8432_v16 = vld [vmem:[#allocation207_spill] sm:$0xff]  ;;  %v2962_v44 = vld [vmem:[%s6523_s5 + $0x6f0] sm:$0xff] }
 0x2d2   : > { %v3389_v56 = vmax.f32 %v3165_v20, 0.0  ;;  %3609 = vst [vmem:[%s6568_s8 + $0x628] sm:$0xff] %v3385_v11  ;;  %v2711_v58 = vadd.f32 %v2494_v50, %v2327_v15  ;;  %v3155_v17 = vadd.f32 %v2931_v43, %v2707_v5  ;;  %v2350_v59 = vmul.f32 %v8425_v36, %v8423_v4  ;;  %v8427_v50 = vld [vmem:[#allocation205_spill] sm:$0xff]  ;;  %v8431_v11 = vld [vmem:[#allocation127_spill] sm:$0xff]  ;;  %v8433_v43 = vld [vmem:[#allocation128_spill] sm:$0xff] }
 0x2d3   : > { %v3390_v55 = vmax.f32 %v3166_v61, 0.0  ;;  %3610 = vst [vmem:[%s6568_s8 + $0x630] sm:$0xff] %v3386_v22  ;;  %v3156_v7 = vadd.f32 %v2932_v23, %v2708_v40  ;;  %v2351_v45 = vmul.f32 %v8426_v49, %v8423_v4  ;;  %v2733_v1 = vadd.f32 %v2514_v48, %v2349_v25  ;;  %v2963_v15 = vld [vmem:[%s6523_s5 + $0x6f8] sm:$0xff]  ;;  %v8434_v23 = vld [vmem:[#allocation130_spill] sm:$0xff] }
 0x2d4   : > { %3611 = vst [vmem:[%s6568_s8 + $0x638] sm:$0xff] %v3387_v18  ;;  %v3157_v27 = vadd.f32 %v2933_v24, %v2709_v14  ;;  %v3377_v51 = vmax.f32 %v3153_v12, 0.0  ;;  %v2352_v28 = vmul.f32 %v8427_v50, %v8423_v4  ;;  %v2734_v6 = vadd.f32 %v2514_v48, %v2350_v59 }
 0x2d5   : > { %3612 = vst [vmem:[%s6568_s8 + $0x640] sm:$0xff] %v3388_v54  ;;  %v3158_v30 = vadd.f32 %v2934_v3, %v2710_v13  ;;  %v3378_v33 = vmax.f32 %v3154_v0, 0.0  ;;  %v2353_v26 = vmul.f32 %v8423_v4, %v8428_v57  ;;  %v2735_v37 = vadd.f32 %v2514_v48, %v2351_v45  ;;  %v8435_v13 = vld [vmem:[#allocation132_spill] sm:$0xff]  ;;  %v8436_v3 = vld [vmem:[#allocation134_spill] sm:$0xff] }
 0x2d6   : > { %3613 = vst [vmem:[%s6568_s8 + $0x648] sm:$0xff] %v3389_v56  ;;  %v3159_v63 = vadd.f32 %v2935_v9, %v2711_v58  ;;  %v3379_v31 = vmax.f32 %v3155_v17, 0.0  ;;  %v2354_v2 = vmul.f32 %v8423_v4, %v8429_v47  ;;  %v2736_v21 = vadd.f32 %v2514_v48, %v2352_v28  ;;  %v2951_v56 = vld [vmem:[%s6523_s5 + $0x698] sm:$0xff] }
 0x2d7   : > { %3614 = vst.msk [vmem:[%s6568_s8 + $0x650] sm:$0xff] %vm504_vm0, %v3390_v55  ;;  %v3380_v19 = vmax.f32 %v3156_v7, 0.0  ;;  %v2355_v8 = vmul.f32 %v8430_v34, %v8423_v4  ;;  %v2737_v32 = vadd.f32 %v2514_v48, %v2353_v26  ;;  %v3181_v35 = vadd.f32 %v2957_v38, %v2733_v1  ;;  %v2952_v55 = vld [vmem:[%s6523_s5 + $0x6a0] sm:$0xff]  ;;  %v8437_v9 = vld [vmem:[#allocation137_spill] sm:$0xff]  ;;  %v2953_v1 = vld [vmem:[%s6523_s5 + $0x6a8] sm:$0xff] }
 0x2d8   : > { %v3381_v39 = vmax.f32 %v3157_v27, 0.0  ;;  %3601 = vst [vmem:[%s6568_s8 + $0x5e8] sm:$0xff] %v3377_v51  ;;  %v2738_v60 = vadd.f32 %v2514_v48, %v2354_v2  ;;  %v3182_v20 = vadd.f32 %v2958_v29, %v2734_v6  ;;  %v2342_v5 = vmul.f32 %v8432_v16, %v8431_v11  ;;  %v8438_v27 = vld [vmem:[#allocation135_spill] sm:$0xff]  ;;  %v2954_v6 = vld [vmem:[%s6523_s5 + $0x6b0] sm:$0xff]  ;;  %v2955_v26 = vld [vmem:[%s6523_s5 + $0x6b8] sm:$0xff] }
 0x2d9   : > { %v3382_v52 = vmax.f32 %v3158_v30, 0.0  ;;  %3602 = vst [vmem:[%s6568_s8 + $0x5f0] sm:$0xff] %v3378_v33  ;;  %v2739_v61 = vadd.f32 %v2514_v48, %v2355_v8  ;;  %v3183_v22 = vadd.f32 %v2959_v41, %v2735_v37  ;;  %v2343_v40 = vmul.f32 %v8432_v16, %v8433_v43  ;;  %v2950_v48 = vld [vmem:[%s6523_s5 + $0x690] sm:$0xff] }
 0x2da   : > { %v3383_v53 = vmax.f32 %v3159_v63, 0.0  ;;  %3603 = vst [vmem:[%s6568_s8 + $0x5f8] sm:$0xff] %v3379_v31  ;;  %v3184_v18 = vadd.f32 %v2960_v46, %v2736_v21  ;;  %v2344_v14 = vmul.f32 %v8432_v16, %v8434_v23  ;;  %v2726_v12 = vadd.f32 %v2509_v62, %v2342_v5  ;;  %v2956_v31 = vld [vmem:[%s6523_s5 + $0x6c0] sm:$0xff] }
 0x2db   : > { %3604 = vst [vmem:[%s6568_s8 + $0x600] sm:$0xff] %v3380_v19  ;;  %v3185_v54 = vadd.f32 %v2961_v10, %v2737_v32  ;;  %v3405_v24 = vmax.f32 %v3181_v35, 0.0  ;;  %v2345_v0 = vmul.f32 %v8432_v16, %v8435_v13  ;;  %v2727_v4 = vadd.f32 %v2509_v62, %v2343_v40 }
 0x2dc   : > { %3605 = vst [vmem:[%s6568_s8 + $0x608] sm:$0xff] %v3381_v39  ;;  %v3186_v42 = vadd.f32 %v2962_v44, %v2738_v60  ;;  %v3406_v25 = vmax.f32 %v3182_v20, 0.0  ;;  %v2346_v58 = vmul.f32 %v8432_v16, %v8436_v3  ;;  %v2728_v17 = vadd.f32 %v2509_v62, %v2344_v14 }
 0x2dd   : > { %3606 = vst [vmem:[%s6568_s8 + $0x610] sm:$0xff] %v3382_v52  ;;  %v3187_v36 = vadd.f32 %v2963_v15, %v2739_v61  ;;  %v3407_v59 = vmax.f32 %v3183_v22, 0.0  ;;  %v2347_v7 = vmul.f32 %v8432_v16, %v8437_v9  ;;  %v2729_v49 = vadd.f32 %v2509_v62, %v2345_v0 }
 0x2de   : > { %3607 = vst.msk [vmem:[%s6568_s8 + $0x618] sm:$0xff] %vm504_vm0, %v3383_v53  ;;  %v3408_v45 = vmax.f32 %v3184_v18, 0.0  ;;  %v2348_v51 = vmul.f32 %v8432_v16, %v8438_v27  ;;  %v2730_v50 = vadd.f32 %v2509_v62, %v2346_v58  ;;  %v3174_v28 = vadd.f32 %v2950_v48, %v2726_v12 }
 0x2df   : > { %v3409_v38 = vmax.f32 %v3185_v54, 0.0  ;;  %3629 = vst [vmem:[%s6568_s8 + $0x6c8] sm:$0xff] %v3405_v24  ;;  %v2731_v30 = vadd.f32 %v2509_v62, %v2347_v7  ;;  %v3175_v33 = vadd.f32 %v2951_v56, %v2727_v4  ;;  %v3410_v57 = vmax.f32 %v3186_v42, 0.0 }
 0x2e0   : > { %3630 = vst [vmem:[%s6568_s8 + $0x6d0] sm:$0xff] %v3406_v25  ;;  %v2732_v29 = vadd.f32 %v2509_v62, %v2348_v51  ;;  %v3176_v37 = vadd.f32 %v2952_v55, %v2728_v17  ;;  %v3411_v63 = vmax.f32 %v3187_v36, 0.0  ;;  %v3177_v47 = vadd.f32 %v2953_v1, %v2729_v49 }
 0x2e1   : > { %3631 = vst [vmem:[%s6568_s8 + $0x6d8] sm:$0xff] %v3407_v59  ;;  %v3178_v2 = vadd.f32 %v2954_v6, %v2730_v50  ;;  %v3398_v41 = vmax.f32 %v3174_v28, 0.0  ;;  %v3179_v21 = vadd.f32 %v2955_v26, %v2731_v30  ;;  %v3399_v19 = vmax.f32 %v3175_v33, 0.0 }
 0x2e2   : > { %3632 = vst [vmem:[%s6568_s8 + $0x6e0] sm:$0xff] %v3408_v45  ;;  %v3180_v34 = vadd.f32 %v2956_v31, %v2732_v29  ;;  %v3400_v8 = vmax.f32 %v3176_v37, 0.0  ;;  %v3401_v46 = vmax.f32 %v3177_v47, 0.0 }
 0x2e3   : > { %3633 = vst [vmem:[%s6568_s8 + $0x6e8] sm:$0xff] %v3409_v38  ;;  %v3402_v32 = vmax.f32 %v3178_v2, 0.0  ;;  %v3403_v35 = vmax.f32 %v3179_v21, 0.0 }
 0x2e4   : > { %3634 = vst [vmem:[%s6568_s8 + $0x6f0] sm:$0xff] %v3410_v57  ;;  %v3404_v62 = vmax.f32 %v3180_v34, 0.0 }
 0x2e5   : > { %3635 = vst.msk [vmem:[%s6568_s8 + $0x6f8] sm:$0xff] %vm504_vm0, %v3411_v63 }
 0x2e6   : > { %3622 = vst [vmem:[%s6568_s8 + $0x690] sm:$0xff] %v3398_v41 }
 0x2e7   : > { %3623 = vst [vmem:[%s6568_s8 + $0x698] sm:$0xff] %v3399_v19 }
 0x2e8   : > { %3624 = vst [vmem:[%s6568_s8 + $0x6a0] sm:$0xff] %v3400_v8 }
 0x2e9   : > { %3625 = vst [vmem:[%s6568_s8 + $0x6a8] sm:$0xff] %v3401_v46 }
 0x2ea   : > { %3626 = vst [vmem:[%s6568_s8 + $0x6b0] sm:$0xff] %v3402_v32 }
 0x2eb   : > { %3627 = vst [vmem:[%s6568_s8 + $0x6b8] sm:$0xff] %v3403_v35 }
 0x2ec   : > { %3628 = vst.msk [vmem:[%s6568_s8 + $0x6c0] sm:$0xff] %vm504_vm0, %v3404_v62 }
 0x2ed PF: > { %s14_s15 = sadd.s32 1, %s3919_s15  }
 0x2ee   : > { %p11_p4 = scmp.ge.s32.totalorder %s14_s15, 4  }
 0x2f0   :  { %13 = sbr.rel (!%p11_p4) target bundleno = 1 (0x1), region = 75 }

</bundles_post_ra>
